<compile_context>
chip_gen: v6e
topology: v6e:2x2x1
jax: 0.10.0
libtpu: 0.0.40
codegen_flags: <defaults>
</compile_context>

<pallas_src>
import jax
import jax.numpy as jnp
from jax.experimental import pallas as pl
from jax.experimental.pallas import tpu as pltpu


_VMEM_LIMIT = 32 * 1024 * 1024  # explicit scoped-VMEM limit (>= every gen default)


# ----------------------------------------------------------------------------
# Packed-column bookkeeping for the fused conv3x3.
#
# The upsampled (2H, 2W, C) tensor is held as (2H, W, 2C) with lanes = (dw, c),
# i.e. column 2w+dw lives at packed column w, lane block dw.  The conv3x3
# output (2H, 2W, Cout) is likewise produced as (2H, W, 2*Cout) with lanes
# = (b, co) for output column 2w+b.  For output phase b and kernel tap dj the
# source is packed column w + shift with lane half dw, where:
#   (b, dj) -> (s = shift+1, dw)
_TAP_MAP = {(0, 0): (0, 1), (0, 1): (1, 0), (0, 2): (1, 1),
            (1, 0): (1, 0), (1, 1): (1, 1), (1, 2): (2, 0)}


def _pack_conv3x3_weight(wc, C):
    """wc: PyTorch Conv2d weight (Cout, 2*C, 3, 3) acting on cat([convT, skip]).

    Returns (9, 4*C, 2*Cout):
      slab index = di*3 + (column_shift + 1)
      rows       = [convT part (dw, c) | skip part (dw, c)]   (4*C)
      cols       = (output column parity b, c_out)            (2*Cout)
    """
    Cout = wc.shape[0]
    w_up, w_sk = wc[:, :C], wc[:, C:]                     # (Cout, C, 3, 3) each
    bw = jnp.zeros((9, 4 * C, 2 * Cout), wc.dtype)
    for (b, dj), (s, dw) in _TAP_MAP.items():
        for di in range(3):
            slab = di * 3 + s
            bw = bw.at[slab, dw * C:(dw + 1) * C,
                       b * Cout:(b + 1) * Cout].set(w_up[:, :, di, dj].T)
            bw = bw.at[slab, 2 * C + dw * C:2 * C + (dw + 1) * C,
                       b * Cout:(b + 1) * Cout].set(w_sk[:, :, di, dj].T)
    return bw


# ----------------------------------------------------------------------------
# Fused up-block kernel:  ConvTranspose2d(k=2,s=2) -> cat(skip) -> Conv2d(3x3, pad=1)
# One grid step = one batch element; everything stays in VMEM.
# ----------------------------------------------------------------------------
def _upblock_kernel(x_ref, skip_ref, wt_ref, bt_ref, bw_ref, bc_ref, o_ref, pad_ref):
    # x_ref    : (1, H,  W,  Cin)   deep feature
    # skip_ref : (1, 2H, W,  2C)    skip feature, columns packed 2-wide into lanes
    # wt_ref   : (Cin, 4C)          convT weight, cols ordered (dh, dw, c)
    # bt_ref   : (1, 4C)            convT bias tiled 4x (f32)
    # bw_ref   : (9, 4C, 2Co)       packed conv3x3 weight (see _pack_conv3x3_weight)
    # bc_ref   : (1, 2Co)           conv3x3 bias tiled 2x (f32)
    # o_ref    : (1, 2H, W, 2Co)    output, columns packed 2-wide into lanes
    # pad_ref  : VMEM (2H+2, W+2, 4C) zero-halo [convT | skip] working tile
    _, H, W, Cin = x_ref.shape
    C4 = wt_ref.shape[1]          # 4*C
    C2 = C4 // 2                  # 2*C
    Co2 = bw_ref.shape[2]         # 2*Cout (== 2*C here)
    H2 = 2 * H
    Wp = W + 2

    # --- halo-only zero: interior rows 1..H2 / cols 1..W are fully overwritten
    #     below, so only the 1-wide border needs clearing each step. ----------
    zrow = jnp.zeros((1, Wp, C4), pad_ref.dtype)
    pad_ref[0:1, :, :] = zrow
    pad_ref[H2 + 1:H2 + 2, :, :] = zrow
    zcol = jnp.zeros((H2 + 2, 1, C4), pad_ref.dtype)
    pad_ref[:, 0:1, :] = zcol
    pad_ref[:, W + 1:W + 2, :] = zcol

    # --- ConvTranspose2d(k=2, s=2): one fused dot over all 4 (dh, dw) offsets ----
    x = x_ref[...].reshape(H * W, Cin)
    y4 = jnp.dot(x, wt_ref[...], preferred_element_type=jnp.float32) + bt_ref[...]
    # Row-parity halves keep lanes packed as (dw, c): no lane-changing reshapes.
    yt = y4[:, :C2].reshape(H, 1, W, C2)          # output rows 2h
    yb = y4[:, C2:].reshape(H, 1, W, C2)          # output rows 2h + 1
    up = jnp.concatenate([yt, yb], axis=1).reshape(H2, W, C2)

    # --- cat([convT, skip], channel): two disjoint lane-range stores -------------
    pad_ref[1:H2 + 1, 1:W + 1, :C2] = up.astype(pad_ref.dtype)
    pad_ref[1:H2 + 1, 1:W + 1, C2:] = skip_ref[0]

    # --- Conv2d(3x3, pad=1) on the packed layout: packed-column shift `s` is the
    #     outer loop (3 sublane-shift slices / reshapes total); each row tap di is
    #     a contiguous leading-dim slice of the flattened slab. K = 4C per dot. ---
    acc = jnp.zeros((H2 * W, Co2), jnp.float32)
    for s in range(3):
        slab = pad_ref[:, s:s + W, :].reshape((H2 + 2) * W, C4)
        for di in range(3):
            acc = acc + jnp.dot(slab[di * W:di * W + H2 * W, :],
                                bw_ref[di * 3 + s],
                                preferred_element_type=jnp.float32)
    acc = acc + bc_ref[...]
    o_ref[...] = acc.reshape(1, H2, W, Co2).astype(o_ref.dtype)


def upsample_block(x, skip, wt, bt, wc, bc):
    """x: (N,H,W,Cin); skip: (N,2H,2W,C); wt: (Cin,C,2,2); wc: (C,2C,3,3)."""
    N, H, W, Cin = x.shape
    C = wt.shape[1]
    H2, W2 = 2 * H, 2 * W
    assert skip.shape == (N, H2, W2, C)

    # ConvTranspose weight -> single fused (Cin, 4C) matrix, cols = (dh, dw, c).
    wt4 = jnp.transpose(wt, (0, 2, 3, 1)).reshape(Cin, 4 * C).astype(x.dtype)
    bt4 = jnp.tile(bt.astype(jnp.float32), 4).reshape(1, 4 * C)
    # Conv3x3 weight -> packed-column block form (kept in activation dtype).
    bw = _pack_conv3x3_weight(wc, C).astype(x.dtype)
    bc2 = jnp.tile(bc.astype(jnp.float32), 2).reshape(1, 2 * C)
    # Pack skip columns 2-wide into lanes (free, contiguous reshape).
    skip_p = skip.reshape(N, H2, W, 2 * C)

    out_p = pl.pallas_call(
        _upblock_kernel,
        out_shape=jax.ShapeDtypeStruct((N, H2, W, 2 * C), x.dtype),
        grid=(N,),
        in_specs=[
            pl.BlockSpec((1, H, W, Cin), lambda n: (n, 0, 0, 0)),
            pl.BlockSpec((1, H2, W, 2 * C), lambda n: (n, 0, 0, 0)),
            pl.BlockSpec((Cin, 4 * C), lambda n: (0, 0)),
            pl.BlockSpec((1, 4 * C), lambda n: (0, 0)),
            pl.BlockSpec((9, 4 * C, 2 * C), lambda n: (0, 0, 0)),
            pl.BlockSpec((1, 2 * C), lambda n: (0, 0)),
        ],
        out_specs=pl.BlockSpec((1, H2, W, 2 * C), lambda n: (n, 0, 0, 0)),
        scratch_shapes=[pltpu.VMEM((H2 + 2, W + 2, 4 * C), x.dtype)],
        compiler_params=pltpu.CompilerParams(
            dimension_semantics=("parallel",),
            vmem_limit_bytes=_VMEM_LIMIT),
    )(x, skip_p, wt4, bt4, bw, bc2)
    # Unpack columns: (N, 2H, W, 2C) -> (N, 2H, 2W, C)  (free reshape).
    return out_p.reshape(N, H2, W2, C)


# ----------------------------------------------------------------------------
# Fused tail kernel: Conv2d(1x1) + 4x nearest upsample.
# conv1x1 commutes with nearest upsampling, so upsample2x -> conv1x1 ->
# upsample2x == conv1x1 (low res) -> upsample4x.  The 1x1 weight is tiled 4x so
# the dot emits the column-packed row directly; the 4x row repeat is 4 stores
# into a 5-D block whose repeat index is a leading (untiled) dim — the 16x
# expanded result is never materialized in vregs.
# ----------------------------------------------------------------------------
def _final_kernel(x_ref, w_ref, b_ref, o_ref):
    # x_ref: (1, H, W, Cin); w_ref: (Cin, 4*Cout) (weight tiled 4x over lane groups)
    # b_ref: (1, 4*Cout) f32
    # o_ref: (1, H, 4, W, 4*Cout): [h, r, w, (s, c)] -> out row 4h+r, col 4w+s, chan c
    _, H, W, Cin = x_ref.shape
    Co4 = w_ref.shape[1]
    x = x_ref[...].reshape(H * W, Cin)
    y = jnp.dot(x, w_ref[...], preferred_element_type=jnp.float32) + b_ref[...]
    y5 = y.reshape(1, H, 1, W, Co4).astype(o_ref.dtype)
    for r in range(4):                      # row repeat: 4 direct stores
        o_ref[:, :, r:r + 1, :, :] = y5


def final_conv_upsample4x(x, w, b):
    """x: (N,H,W,Cin); w: (Cout,Cin,1,1); b: (Cout,) -> (N,4H,4W,Cout)."""
    N, H, W, Cin = x.shape
    Cout = w.shape[0]
    w1 = jnp.transpose(w.reshape(Cout, Cin), (1, 0)).astype(x.dtype)  # (Cin, Cout)
    w4 = jnp.tile(w1, (1, 4))                                         # (Cin, 4*Cout)
    b4 = jnp.tile(b.astype(jnp.float32), 4).reshape(1, 4 * Cout)
    out5 = pl.pallas_call(
        _final_kernel,
        out_shape=jax.ShapeDtypeStruct((N, H, 4, W, 4 * Cout), x.dtype),
        grid=(N,),
        in_specs=[
            pl.BlockSpec((1, H, W, Cin), lambda n: (n, 0, 0, 0)),
            pl.BlockSpec((Cin, 4 * Cout), lambda n: (0, 0)),
            pl.BlockSpec((1, 4 * Cout), lambda n: (0, 0)),
        ],
        out_specs=pl.BlockSpec((1, H, 4, W, 4 * Cout), lambda n: (n, 0, 0, 0, 0)),
        compiler_params=pltpu.CompilerParams(
            dimension_semantics=("parallel",),
            vmem_limit_bytes=_VMEM_LIMIT),
    )(x, w4, b4)
    # (N, H, 4, W, 4*Cout) -> (N, 4H, 4W, Cout): contiguous (free) reshape.
    return out5.reshape(N, 4 * H, 4 * W, Cout)


# ----------------------------------------------------------------------------
# Parameter init (PyTorch-layout shapes) + full forward pass.
# ----------------------------------------------------------------------------
def init_params(key, embed_dims):
    params = {"blocks": []}
    for i in range(len(embed_dims) - 1, 0, -1):
        cin, cout = embed_dims[i], embed_dims[i - 1]
        key, k1, k2, k3, k4 = jax.random.split(key, 5)
        wt = jax.random.normal(k1, (cin, cout, 2, 2), jnp.float32) * 0.05   # ConvTranspose2d
        bt = jax.random.normal(k2, (cout,), jnp.float32) * 0.05
        wc = jax.random.normal(k3, (cout, cout * 2, 3, 3), jnp.float32) * 0.05  # Conv2d 3x3
        bc = jax.random.normal(k4, (cout,), jnp.float32) * 0.05
        params["blocks"].append((wt, bt, wc, bc))
    key, k1, k2 = jax.random.split(key, 3)
    c0 = embed_dims[0]
    params["final_w"] = jax.random.normal(k1, (c0 // 2, c0, 1, 1), jnp.float32) * 0.05
    params["final_b"] = jax.random.normal(k2, (c0 // 2,), jnp.float32) * 0.05
    return params


def unet_decoder_2d(params, x_nchw, features_nchw, features_only=False):
    # PyTorch NCHW at the boundary; NHWC (channels -> lanes) inside.
    x = jnp.transpose(x_nchw, (0, 2, 3, 1))
    feats = [jnp.transpose(f, (0, 2, 3, 1)) for f in features_nchw]
    for i, (wt, bt, wc, bc) in enumerate(params["blocks"]):
        skip = feats[-(i + 2)]
        x = upsample_block(x, skip, wt, bt, wc, bc)
        # NOTE: reference forward never applies up_block[2] (ReLU); neither do we.
    if features_only:
        # Must upsample 2x before returning on this path (matches reference).
        x = jnp.repeat(jnp.repeat(x, 2, axis=1), 2, axis=2)
        return jnp.transpose(x, (0, 3, 1, 2))
    # Tail: conv1x1 at low resolution + single fused 4x nearest upsample
    # (mathematically identical to upsample2x -> conv1x1 -> upsample2x).
    x = final_conv_upsample4x(x, params["final_w"], params["final_b"])
    return jnp.transpose(x, (0, 3, 1, 2))


# ----------------------------------------------------------------------------
# Pure-JAX reference (mirrors the PyTorch module op-by-op) for verification.
# ----------------------------------------------------------------------------
def _ref_conv_transpose_2x2(x, w, b):
    N, H, W, _ = x.shape
    Cout = w.shape[1]
    out = jnp.zeros((N, 2 * H, 2 * W, Cout), jnp.float32)
    for dh in range(2):
        for dw in range(2):
            y = jnp.einsum("nhwc,cd->nhwd", x, w[:, :, dh, dw])
            out = out.at[:, dh::2, dw::2, :].set(y)
    return out + b


def _ref_conv2d(x, w, b, pad):
    N, H, W, _ = x.shape
    Cout, _, kh, kw = w.shape
    xp = jnp.pad(x, ((0, 0), (pad, pad), (pad, pad), (0, 0)))
    acc = jnp.zeros((N, H, W, Cout), jnp.float32)
    for di in range(kh):
        for dj in range(kw):
            acc = acc + jnp.einsum("nhwc,dc->nhwd",
                                   xp[:, di:di + H, dj:dj + W, :], w[:, :, di, dj])
    return acc + b


def _ref_upsample2x(x):
    return jnp.repeat(jnp.repeat(x, 2, axis=1), 2, axis=2)


def unet_decoder_2d_reference(params, x_nchw, features_nchw, features_only=False):
    x = jnp.transpose(x_nchw, (0, 2, 3, 1))
    feats = [jnp.transpose(f, (0, 2, 3, 1)) for f in features_nchw]
    for i, (wt, bt, wc, bc) in enumerate(params["blocks"]):
        skip = feats[-(i + 2)]
        x = _ref_conv_transpose_2x2(x, wt, bt)
        x = jnp.concatenate([x, skip], axis=-1)
        x = _ref_conv2d(x, wc, bc, pad=1)
    x = _ref_upsample2x(x)
    if features_only:
        return jnp.transpose(x, (0, 3, 1, 2))
    x = _ref_conv2d(x, params["final_w"], params["final_b"], pad=0)
    x = _ref_upsample2x(x)
    return jnp.transpose(x, (0, 3, 1, 2))


if __name__ == "__main__":
    key = jax.random.PRNGKey(0)
    embed_dims = [8, 16, 32]
    N = 2
    base = 16  # spatial size of the shallowest (first) feature map

    kx, kf0, kf1, kf2, kp = jax.random.split(key, 5)
    # features[j]: channels embed_dims[j], spatial base / 2**j  (NCHW)
    features = [
        jax.random.normal(kf0, (N, embed_dims[0], base, base), jnp.float32),
        jax.random.normal(kf1, (N, embed_dims[1], base // 2, base // 2), jnp.float32),
        jax.random.normal(kf2, (N, embed_dims[2], base // 4, base // 4), jnp.float32),
    ]
    # x is the deepest feature map
    x = jax.random.normal(kx, (N, embed_dims[2], base // 4, base // 4), jnp.float32)
    params = init_params(kp, embed_dims)

    out = jax.block_until_ready(jax.jit(unet_decoder_2d)(params, x, features))
    assert out.shape == (N, embed_dims[0] // 2, base * 4, base * 4), out.shape
    assert out.dtype == jnp.float32

    ref = jax.block_until_ready(
        jax.jit(unet_decoder_2d_reference)(params, x, features))
    max_err = float(jnp.max(jnp.abs(out - ref)))
    assert jnp.allclose(out, ref, rtol=2e-2, atol=2e-2), max_err

    print("KERNEL_OK")
</pallas_src>

<mosaic_0001>
module attributes {stable_mosaic.version = 11 : i64} {
  func.func @_upblock_kernel(%arg0: i32, %arg1: memref<1x4x4x32xf32, #tpu.memory_space<vmem>>, %arg2: memref<1x8x4x32xf32, #tpu.memory_space<vmem>>, %arg3: memref<32x64xf32, #tpu.memory_space<vmem>>, %arg4: memref<1x64xf32, #tpu.memory_space<vmem>>, %arg5: memref<9x64x32xf32, #tpu.memory_space<vmem>>, %arg6: memref<1x32xf32, #tpu.memory_space<vmem>>, %arg7: memref<1x8x4x32xf32, #tpu.memory_space<vmem>>, %arg8: memref<10x6x64xf32, #tpu.memory_space<vmem>>) attributes {dimension_semantics = [#tpu.dimension_semantics<parallel>], iteration_bounds = array<i64: 2>, scalar_prefetch = 0 : i64, scratch_operands = 1 : i64, tpu.core_type = #tpu.core_type<tc>, window_params = [{transform_indices = @transform_0, window_bounds = array<i64: 1, 4, 4, 32>}, {transform_indices = @transform_1, window_bounds = array<i64: 1, 8, 4, 32>}, {pipeline_mode = #tpu.pipeline_mode<synchronous>, transform_indices = @transform_2, window_bounds = array<i64: 32, 64>}, {pipeline_mode = #tpu.pipeline_mode<synchronous>, transform_indices = @transform_3, window_bounds = array<i64: 1, 64>}, {pipeline_mode = #tpu.pipeline_mode<synchronous>, transform_indices = @transform_4, window_bounds = array<i64: 9, 64, 32>}, {pipeline_mode = #tpu.pipeline_mode<synchronous>, transform_indices = @transform_5, window_bounds = array<i64: 1, 32>}, {transform_indices = @transform_6, window_bounds = array<i64: 1, 8, 4, 32>}]} {
    %cst = arith.constant 0.000000e+00 : f32
    %0 = vector.broadcast %cst : f32 to vector<1x6x64xf32>
    %c0 = arith.constant 0 : index
    %c0_0 = arith.constant 0 : index
    %c0_1 = arith.constant 0 : index
    %1 = vector.load %arg8[%c0, %c0_0, %c0_1] : memref<10x6x64xf32, #tpu.memory_space<vmem>>, vector<1x6x64xf32>
    tpu.vector_store %arg8[%c0, %c0_0, %c0_1], %0 {strides = array<i32>} : memref<10x6x64xf32, #tpu.memory_space<vmem>>, vector<1x6x64xf32>,
    %c9 = arith.constant 9 : index
    %c0_2 = arith.constant 0 : index
    %c0_3 = arith.constant 0 : index
    %2 = vector.load %arg8[%c9, %c0_2, %c0_3] : memref<10x6x64xf32, #tpu.memory_space<vmem>>, vector<1x6x64xf32>
    tpu.vector_store %arg8[%c9, %c0_2, %c0_3], %0 {strides = array<i32>} : memref<10x6x64xf32, #tpu.memory_space<vmem>>, vector<1x6x64xf32>,
    %cst_4 = arith.constant 0.000000e+00 : f32
    %3 = vector.broadcast %cst_4 : f32 to vector<10x1x64xf32>
    %c0_5 = arith.constant 0 : index
    %c0_6 = arith.constant 0 : index
    %c0_7 = arith.constant 0 : index
    %4 = vector.load %arg8[%c0_5, %c0_6, %c0_7] : memref<10x6x64xf32, #tpu.memory_space<vmem>>, vector<10x1x64xf32>
    tpu.vector_store %arg8[%c0_5, %c0_6, %c0_7], %3 {strides = array<i32>} : memref<10x6x64xf32, #tpu.memory_space<vmem>>, vector<10x1x64xf32>,
    %c0_8 = arith.constant 0 : index
    %c5 = arith.constant 5 : index
    %c0_9 = arith.constant 0 : index
    %5 = vector.load %arg8[%c0_8, %c5, %c0_9] : memref<10x6x64xf32, #tpu.memory_space<vmem>>, vector<10x1x64xf32>
    tpu.vector_store %arg8[%c0_8, %c5, %c0_9], %3 {strides = array<i32>} : memref<10x6x64xf32, #tpu.memory_space<vmem>>, vector<10x1x64xf32>,
    %c0_10 = arith.constant 0 : index
    %c0_11 = arith.constant 0 : index
    %c0_12 = arith.constant 0 : index
    %c0_13 = arith.constant 0 : index
    %6 = vector.load %arg1[%c0_10, %c0_11, %c0_12, %c0_13] : memref<1x4x4x32xf32, #tpu.memory_space<vmem>>, vector<1x4x4x32xf32>
    %7 = vector.shape_cast %6 : vector<1x4x4x32xf32> to vector<16x32xf32>
    %c0_14 = arith.constant 0 : index
    %c0_15 = arith.constant 0 : index
    %8 = vector.load %arg3[%c0_14, %c0_15] : memref<32x64xf32, #tpu.memory_space<vmem>>, vector<32x64xf32>
    %cst_16 = arith.constant dense<0.000000e+00> : vector<16x64xf32>
    %9 = tpu.matmul %7, %8, %cst_16 {dimension_numbers = #tpu.dot_dimension_numbers<[1], [0], [0], [1], [0, 0, 1, 1], [], []>} : vector<16x32xf32>, vector<32x64xf32>, vector<16x64xf32> -> vector<16x64xf32>
    %c0_17 = arith.constant 0 : index
    %c0_18 = arith.constant 0 : index
    %10 = vector.load %arg4[%c0_17, %c0_18] : memref<1x64xf32, #tpu.memory_space<vmem>>, vector<1x64xf32>
    %11 = vector.broadcast %10 : vector<1x64xf32> to vector<16x64xf32>
    %12 = arith.addf %9, %11 : vector<16x64xf32>
    %13 = vector.extract_strided_slice %12 {offsets = [0, 0], sizes = [16, 32], strides = [1, 1]} : vector<16x64xf32> to vector<16x32xf32>
    %14 = vector.shape_cast %13 : vector<16x32xf32> to vector<4x1x4x32xf32>
    %15 = vector.extract_strided_slice %12 {offsets = [0, 32], sizes = [16, 32], strides = [1, 1]} : vector<16x64xf32> to vector<16x32xf32>
    %16 = vector.shape_cast %15 : vector<16x32xf32> to vector<4x1x4x32xf32>
    %17 = tpu.concatenate %14, %16 in 1 : vector<4x1x4x32xf32>, vector<4x1x4x32xf32> -> vector<4x2x4x32xf32>
    %18 = vector.shape_cast %17 : vector<4x2x4x32xf32> to vector<8x4x32xf32>
    %c1 = arith.constant 1 : index
    %c1_19 = arith.constant 1 : index
    %c0_20 = arith.constant 0 : index
    %19 = vector.load %arg8[%c1, %c1_19, %c0_20] : memref<10x6x64xf32, #tpu.memory_space<vmem>>, vector<8x4x32xf32>
    tpu.vector_store %arg8[%c1, %c1_19, %c0_20], %18 {strides = array<i32>} : memref<10x6x64xf32, #tpu.memory_space<vmem>>, vector<8x4x32xf32>,
    %c0_21 = arith.constant 0 : index
    %c0_22 = arith.constant 0 : index
    %c0_23 = arith.constant 0 : index
    %c0_24 = arith.constant 0 : index
    %20 = vector.load %arg2[%c0_21, %c0_22, %c0_23, %c0_24] : memref<1x8x4x32xf32, #tpu.memory_space<vmem>>, vector<1x8x4x32xf32>
    %21 = vector.shape_cast %20 : vector<1x8x4x32xf32> to vector<8x4x32xf32>
    %c1_25 = arith.constant 1 : index
    %c1_26 = arith.constant 1 : index
    %c32 = arith.constant 32 : index
    %22 = vector.load %arg8[%c1_25, %c1_26, %c32] : memref<10x6x64xf32, #tpu.memory_space<vmem>>, vector<8x4x32xf32>
    tpu.vector_store %arg8[%c1_25, %c1_26, %c32], %21 {strides = array<i32>} : memref<10x6x64xf32, #tpu.memory_space<vmem>>, vector<8x4x32xf32>,
    %cst_27 = arith.constant 0.000000e+00 : f32
    %23 = vector.broadcast %cst_27 : f32 to vector<32x32xf32>
    %c0_28 = arith.constant 0 : index
    %c0_29 = arith.constant 0 : index
    %c0_30 = arith.constant 0 : index
    %24 = vector.load %arg8[%c0_28, %c0_29, %c0_30] : memref<10x6x64xf32, #tpu.memory_space<vmem>>, vector<10x4x64xf32>
    %25 = vector.shape_cast %24 : vector<10x4x64xf32> to vector<40x64xf32>
    %26 = vector.extract_strided_slice %25 {offsets = [0, 0], sizes = [32, 64], strides = [1, 1]} : vector<40x64xf32> to vector<32x64xf32>
    %c0_31 = arith.constant 0 : index
    %c0_32 = arith.constant 0 : index
    %c0_33 = arith.constant 0 : index
    %27 = vector.load %arg5[%c0_31, %c0_32, %c0_33] : memref<9x64x32xf32, #tpu.memory_space<vmem>>, vector<1x64x32xf32>
    %28 = vector.shape_cast %27 : vector<1x64x32xf32> to vector<64x32xf32>
    %cst_34 = arith.constant dense<0.000000e+00> : vector<32x32xf32>
    %29 = tpu.matmul %26, %28, %cst_34 {dimension_numbers = #tpu.dot_dimension_numbers<[1], [0], [0], [1], [0, 0, 1, 1], [], []>} : vector<32x64xf32>, vector<64x32xf32>, vector<32x32xf32> -> vector<32x32xf32>
    %30 = arith.addf %23, %29 : vector<32x32xf32>
    %31 = vector.extract_strided_slice %25 {offsets = [4, 0], sizes = [32, 64], strides = [1, 1]} : vector<40x64xf32> to vector<32x64xf32>
    %c3 = arith.constant 3 : index
    %c0_35 = arith.constant 0 : index
    %c0_36 = arith.constant 0 : index
    %32 = vector.load %arg5[%c3, %c0_35, %c0_36] : memref<9x64x32xf32, #tpu.memory_space<vmem>>, vector<1x64x32xf32>
    %33 = vector.shape_cast %32 : vector<1x64x32xf32> to vector<64x32xf32>
    %cst_37 = arith.constant dense<0.000000e+00> : vector<32x32xf32>
    %34 = tpu.matmul %31, %33, %cst_37 {dimension_numbers = #tpu.dot_dimension_numbers<[1], [0], [0], [1], [0, 0, 1, 1], [], []>} : vector<32x64xf32>, vector<64x32xf32>, vector<32x32xf32> -> vector<32x32xf32>
    %35 = arith.addf %30, %34 : vector<32x32xf32>
    %36 = vector.extract_strided_slice %25 {offsets = [8, 0], sizes = [32, 64], strides = [1, 1]} : vector<40x64xf32> to vector<32x64xf32>
    %c6 = arith.constant 6 : index
    %c0_38 = arith.constant 0 : index
    %c0_39 = arith.constant 0 : index
    %37 = vector.load %arg5[%c6, %c0_38, %c0_39] : memref<9x64x32xf32, #tpu.memory_space<vmem>>, vector<1x64x32xf32>
    %38 = vector.shape_cast %37 : vector<1x64x32xf32> to vector<64x32xf32>
    %cst_40 = arith.constant dense<0.000000e+00> : vector<32x32xf32>
    %39 = tpu.matmul %36, %38, %cst_40 {dimension_numbers = #tpu.dot_dimension_numbers<[1], [0], [0], [1], [0, 0, 1, 1], [], []>} : vector<32x64xf32>, vector<64x32xf32>, vector<32x32xf32> -> vector<32x32xf32>
    %40 = arith.addf %35, %39 : vector<32x32xf32>
    %c0_41 = arith.constant 0 : index
    %c1_42 = arith.constant 1 : index
    %c0_43 = arith.constant 0 : index
    %41 = vector.load %arg8[%c0_41, %c1_42, %c0_43] : memref<10x6x64xf32, #tpu.memory_space<vmem>>, vector<10x4x64xf32>
    %42 = vector.shape_cast %41 : vector<10x4x64xf32> to vector<40x64xf32>
    %43 = vector.extract_strided_slice %42 {offsets = [0, 0], sizes = [32, 64], strides = [1, 1]} : vector<40x64xf32> to vector<32x64xf32>
    %c1_44 = arith.constant 1 : index
    %c0_45 = arith.constant 0 : index
    %c0_46 = arith.constant 0 : index
    %44 = vector.load %arg5[%c1_44, %c0_45, %c0_46] : memref<9x64x32xf32, #tpu.memory_space<vmem>>, vector<1x64x32xf32>
    %45 = vector.shape_cast %44 : vector<1x64x32xf32> to vector<64x32xf32>
    %cst_47 = arith.constant dense<0.000000e+00> : vector<32x32xf32>
    %46 = tpu.matmul %43, %45, %cst_47 {dimension_numbers = #tpu.dot_dimension_numbers<[1], [0], [0], [1], [0, 0, 1, 1], [], []>} : vector<32x64xf32>, vector<64x32xf32>, vector<32x32xf32> -> vector<32x32xf32>
    %47 = arith.addf %40, %46 : vector<32x32xf32>
    %48 = vector.extract_strided_slice %42 {offsets = [4, 0], sizes = [32, 64], strides = [1, 1]} : vector<40x64xf32> to vector<32x64xf32>
    %c4 = arith.constant 4 : index
    %c0_48 = arith.constant 0 : index
    %c0_49 = arith.constant 0 : index
    %49 = vector.load %arg5[%c4, %c0_48, %c0_49] : memref<9x64x32xf32, #tpu.memory_space<vmem>>, vector<1x64x32xf32>
    %50 = vector.shape_cast %49 : vector<1x64x32xf32> to vector<64x32xf32>
    %cst_50 = arith.constant dense<0.000000e+00> : vector<32x32xf32>
    %51 = tpu.matmul %48, %50, %cst_50 {dimension_numbers = #tpu.dot_dimension_numbers<[1], [0], [0], [1], [0, 0, 1, 1], [], []>} : vector<32x64xf32>, vector<64x32xf32>, vector<32x32xf32> -> vector<32x32xf32>
    %52 = arith.addf %47, %51 : vector<32x32xf32>
    %53 = vector.extract_strided_slice %42 {offsets = [8, 0], sizes = [32, 64], strides = [1, 1]} : vector<40x64xf32> to vector<32x64xf32>
    %c7 = arith.constant 7 : index
    %c0_51 = arith.constant 0 : index
    %c0_52 = arith.constant 0 : index
    %54 = vector.load %arg5[%c7, %c0_51, %c0_52] : memref<9x64x32xf32, #tpu.memory_space<vmem>>, vector<1x64x32xf32>
    %55 = vector.shape_cast %54 : vector<1x64x32xf32> to vector<64x32xf32>
    %cst_53 = arith.constant dense<0.000000e+00> : vector<32x32xf32>
    %56 = tpu.matmul %53, %55, %cst_53 {dimension_numbers = #tpu.dot_dimension_numbers<[1], [0], [0], [1], [0, 0, 1, 1], [], []>} : vector<32x64xf32>, vector<64x32xf32>, vector<32x32xf32> -> vector<32x32xf32>
    %57 = arith.addf %52, %56 : vector<32x32xf32>
    %c0_54 = arith.constant 0 : index
    %c2 = arith.constant 2 : index
    %c0_55 = arith.constant 0 : index
    %58 = vector.load %arg8[%c0_54, %c2, %c0_55] : memref<10x6x64xf32, #tpu.memory_space<vmem>>, vector<10x4x64xf32>
    %59 = vector.shape_cast %58 : vector<10x4x64xf32> to vector<40x64xf32>
    %60 = vector.extract_strided_slice %59 {offsets = [0, 0], sizes = [32, 64], strides = [1, 1]} : vector<40x64xf32> to vector<32x64xf32>
    %c2_56 = arith.constant 2 : index
    %c0_57 = arith.constant 0 : index
    %c0_58 = arith.constant 0 : index
    %61 = vector.load %arg5[%c2_56, %c0_57, %c0_58] : memref<9x64x32xf32, #tpu.memory_space<vmem>>, vector<1x64x32xf32>
    %62 = vector.shape_cast %61 : vector<1x64x32xf32> to vector<64x32xf32>
    %cst_59 = arith.constant dense<0.000000e+00> : vector<32x32xf32>
    %63 = tpu.matmul %60, %62, %cst_59 {dimension_numbers = #tpu.dot_dimension_numbers<[1], [0], [0], [1], [0, 0, 1, 1], [], []>} : vector<32x64xf32>, vector<64x32xf32>, vector<32x32xf32> -> vector<32x32xf32>
    %64 = arith.addf %57, %63 : vector<32x32xf32>
    %65 = vector.extract_strided_slice %59 {offsets = [4, 0], sizes = [32, 64], strides = [1, 1]} : vector<40x64xf32> to vector<32x64xf32>
    %c5_60 = arith.constant 5 : index
    %c0_61 = arith.constant 0 : index
    %c0_62 = arith.constant 0 : index
    %66 = vector.load %arg5[%c5_60, %c0_61, %c0_62] : memref<9x64x32xf32, #tpu.memory_space<vmem>>, vector<1x64x32xf32>
    %67 = vector.shape_cast %66 : vector<1x64x32xf32> to vector<64x32xf32>
    %cst_63 = arith.constant dense<0.000000e+00> : vector<32x32xf32>
    %68 = tpu.matmul %65, %67, %cst_63 {dimension_numbers = #tpu.dot_dimension_numbers<[1], [0], [0], [1], [0, 0, 1, 1], [], []>} : vector<32x64xf32>, vector<64x32xf32>, vector<32x32xf32> -> vector<32x32xf32>
    %69 = arith.addf %64, %68 : vector<32x32xf32>
    %70 = vector.extract_strided_slice %59 {offsets = [8, 0], sizes = [32, 64], strides = [1, 1]} : vector<40x64xf32> to vector<32x64xf32>
    %c8 = arith.constant 8 : index
    %c0_64 = arith.constant 0 : index
    %c0_65 = arith.constant 0 : index
    %71 = vector.load %arg5[%c8, %c0_64, %c0_65] : memref<9x64x32xf32, #tpu.memory_space<vmem>>, vector<1x64x32xf32>
    %72 = vector.shape_cast %71 : vector<1x64x32xf32> to vector<64x32xf32>
    %cst_66 = arith.constant dense<0.000000e+00> : vector<32x32xf32>
    %73 = tpu.matmul %70, %72, %cst_66 {dimension_numbers = #tpu.dot_dimension_numbers<[1], [0], [0], [1], [0, 0, 1, 1], [], []>} : vector<32x64xf32>, vector<64x32xf32>, vector<32x32xf32> -> vector<32x32xf32>
    %74 = arith.addf %69, %73 : vector<32x32xf32>
    %c0_67 = arith.constant 0 : index
    %c0_68 = arith.constant 0 : index
    %75 = vector.load %arg6[%c0_67, %c0_68] : memref<1x32xf32, #tpu.memory_space<vmem>>, vector<1x32xf32>
    %76 = vector.broadcast %75 : vector<1x32xf32> to vector<32x32xf32>
    %77 = arith.addf %74, %76 : vector<32x32xf32>
    %78 = vector.shape_cast %77 : vector<32x32xf32> to vector<1x8x4x32xf32>
    %c0_69 = arith.constant 0 : index
    %c0_70 = arith.constant 0 : index
    %c0_71 = arith.constant 0 : index
    %c0_72 = arith.constant 0 : index
    %79 = vector.load %arg7[%c0_69, %c0_70, %c0_71, %c0_72] : memref<1x8x4x32xf32, #tpu.memory_space<vmem>>, vector<1x8x4x32xf32>
    tpu.vector_store %arg7[%c0_69, %c0_70, %c0_71, %c0_72], %78 {strides = array<i32>} : memref<1x8x4x32xf32, #tpu.memory_space<vmem>>, vector<1x8x4x32xf32>,
    return
  }
  func.func @transform_0(%arg0: i32) -> (i32, i32, i32, i32) {
    %c0_i32 = arith.constant 0 : i32
    %c0_i32_0 = arith.constant 0 : i32
    %c0_i32_1 = arith.constant 0 : i32
    %c0_i32_2 = arith.constant 0 : i32
    return %arg0, %c0_i32, %c0_i32_0, %c0_i32_1 : i32, i32, i32, i32
  }
  func.func @transform_1(%arg0: i32) -> (i32, i32, i32, i32) {
    %c0_i32 = arith.constant 0 : i32
    %c0_i32_0 = arith.constant 0 : i32
    %c0_i32_1 = arith.constant 0 : i32
    %c0_i32_2 = arith.constant 0 : i32
    return %arg0, %c0_i32, %c0_i32_0, %c0_i32_1 : i32, i32, i32, i32
  }
  func.func @transform_2(%arg0: i32) -> (i32, i32) {
    %c0_i32 = arith.constant 0 : i32
    %c0_i32_0 = arith.constant 0 : i32
    %c0_i32_1 = arith.constant 0 : i32
    return %c0_i32, %c0_i32_0 : i32, i32
  }
  func.func @transform_3(%arg0: i32) -> (i32, i32) {
    %c0_i32 = arith.constant 0 : i32
    %c0_i32_0 = arith.constant 0 : i32
    %c0_i32_1 = arith.constant 0 : i32
    return %c0_i32, %c0_i32_0 : i32, i32
  }
  func.func @transform_4(%arg0: i32) -> (i32, i32, i32) {
    %c0_i32 = arith.constant 0 : i32
    %c0_i32_0 = arith.constant 0 : i32
    %c0_i32_1 = arith.constant 0 : i32
    %c0_i32_2 = arith.constant 0 : i32
    return %c0_i32, %c0_i32_0, %c0_i32_1 : i32, i32, i32
  }
  func.func @transform_5(%arg0: i32) -> (i32, i32) {
    %c0_i32 = arith.constant 0 : i32
    %c0_i32_0 = arith.constant 0 : i32
    %c0_i32_1 = arith.constant 0 : i32
    return %c0_i32, %c0_i32_0 : i32, i32
  }
  func.func @transform_6(%arg0: i32) -> (i32, i32, i32, i32) {
    %c0_i32 = arith.constant 0 : i32
    %c0_i32_0 = arith.constant 0 : i32
    %c0_i32_1 = arith.constant 0 : i32
    %c0_i32_2 = arith.constant 0 : i32
    return %arg0, %c0_i32, %c0_i32_0, %c0_i32_1 : i32, i32, i32, i32
  }
}

module attributes {stable_mosaic.version = 11 : i64} {
  func.func @_upblock_kernel(%arg0: i32, %arg1: memref<1x8x8x16xf32, #tpu.memory_space<vmem>>, %arg2: memref<1x16x8x16xf32, #tpu.memory_space<vmem>>, %arg3: memref<16x32xf32, #tpu.memory_space<vmem>>, %arg4: memref<1x32xf32, #tpu.memory_space<vmem>>, %arg5: memref<9x32x16xf32, #tpu.memory_space<vmem>>, %arg6: memref<1x16xf32, #tpu.memory_space<vmem>>, %arg7: memref<1x16x8x16xf32, #tpu.memory_space<vmem>>, %arg8: memref<18x10x32xf32, #tpu.memory_space<vmem>>) attributes {dimension_semantics = [#tpu.dimension_semantics<parallel>], iteration_bounds = array<i64: 2>, scalar_prefetch = 0 : i64, scratch_operands = 1 : i64, tpu.core_type = #tpu.core_type<tc>, window_params = [{transform_indices = @transform_0, window_bounds = array<i64: 1, 8, 8, 16>}, {transform_indices = @transform_1, window_bounds = array<i64: 1, 16, 8, 16>}, {pipeline_mode = #tpu.pipeline_mode<synchronous>, transform_indices = @transform_2, window_bounds = array<i64: 16, 32>}, {pipeline_mode = #tpu.pipeline_mode<synchronous>, transform_indices = @transform_3, window_bounds = array<i64: 1, 32>}, {pipeline_mode = #tpu.pipeline_mode<synchronous>, transform_indices = @transform_4, window_bounds = array<i64: 9, 32, 16>}, {pipeline_mode = #tpu.pipeline_mode<synchronous>, transform_indices = @transform_5, window_bounds = array<i64: 1, 16>}, {transform_indices = @transform_6, window_bounds = array<i64: 1, 16, 8, 16>}]} {
    %cst = arith.constant 0.000000e+00 : f32
    %0 = vector.broadcast %cst : f32 to vector<1x10x32xf32>
    %c0 = arith.constant 0 : index
    %c0_0 = arith.constant 0 : index
    %c0_1 = arith.constant 0 : index
    %1 = vector.load %arg8[%c0, %c0_0, %c0_1] : memref<18x10x32xf32, #tpu.memory_space<vmem>>, vector<1x10x32xf32>
    tpu.vector_store %arg8[%c0, %c0_0, %c0_1], %0 {strides = array<i32>} : memref<18x10x32xf32, #tpu.memory_space<vmem>>, vector<1x10x32xf32>,
    %c17 = arith.constant 17 : index
    %c0_2 = arith.constant 0 : index
    %c0_3 = arith.constant 0 : index
    %2 = vector.load %arg8[%c17, %c0_2, %c0_3] : memref<18x10x32xf32, #tpu.memory_space<vmem>>, vector<1x10x32xf32>
    tpu.vector_store %arg8[%c17, %c0_2, %c0_3], %0 {strides = array<i32>} : memref<18x10x32xf32, #tpu.memory_space<vmem>>, vector<1x10x32xf32>,
    %cst_4 = arith.constant 0.000000e+00 : f32
    %3 = vector.broadcast %cst_4 : f32 to vector<18x1x32xf32>
    %c0_5 = arith.constant 0 : index
    %c0_6 = arith.constant 0 : index
    %c0_7 = arith.constant 0 : index
    %4 = vector.load %arg8[%c0_5, %c0_6, %c0_7] : memref<18x10x32xf32, #tpu.memory_space<vmem>>, vector<18x1x32xf32>
    tpu.vector_store %arg8[%c0_5, %c0_6, %c0_7], %3 {strides = array<i32>} : memref<18x10x32xf32, #tpu.memory_space<vmem>>, vector<18x1x32xf32>,
    %c0_8 = arith.constant 0 : index
    %c9 = arith.constant 9 : index
    %c0_9 = arith.constant 0 : index
    %5 = vector.load %arg8[%c0_8, %c9, %c0_9] : memref<18x10x32xf32, #tpu.memory_space<vmem>>, vector<18x1x32xf32>
    tpu.vector_store %arg8[%c0_8, %c9, %c0_9], %3 {strides = array<i32>} : memref<18x10x32xf32, #tpu.memory_space<vmem>>, vector<18x1x32xf32>,
    %c0_10 = arith.constant 0 : index
    %c0_11 = arith.constant 0 : index
    %c0_12 = arith.constant 0 : index
    %c0_13 = arith.constant 0 : index
    %6 = vector.load %arg1[%c0_10, %c0_11, %c0_12, %c0_13] : memref<1x8x8x16xf32, #tpu.memory_space<vmem>>, vector<1x8x8x16xf32>
    %7 = vector.shape_cast %6 : vector<1x8x8x16xf32> to vector<64x16xf32>
    %c0_14 = arith.constant 0 : index
    %c0_15 = arith.constant 0 : index
    %8 = vector.load %arg3[%c0_14, %c0_15] : memref<16x32xf32, #tpu.memory_space<vmem>>, vector<16x32xf32>
    %cst_16 = arith.constant dense<0.000000e+00> : vector<64x32xf32>
    %9 = tpu.matmul %7, %8, %cst_16 {dimension_numbers = #tpu.dot_dimension_numbers<[1], [0], [0], [1], [0, 0, 1, 1], [], []>} : vector<64x16xf32>, vector<16x32xf32>, vector<64x32xf32> -> vector<64x32xf32>
    %c0_17 = arith.constant 0 : index
    %c0_18 = arith.constant 0 : index
    %10 = vector.load %arg4[%c0_17, %c0_18] : memref<1x32xf32, #tpu.memory_space<vmem>>, vector<1x32xf32>
    %11 = vector.broadcast %10 : vector<1x32xf32> to vector<64x32xf32>
    %12 = arith.addf %9, %11 : vector<64x32xf32>
    %13 = vector.extract_strided_slice %12 {offsets = [0, 0], sizes = [64, 16], strides = [1, 1]} : vector<64x32xf32> to vector<64x16xf32>
    %14 = vector.shape_cast %13 : vector<64x16xf32> to vector<8x1x8x16xf32>
    %15 = vector.extract_strided_slice %12 {offsets = [0, 16], sizes = [64, 16], strides = [1, 1]} : vector<64x32xf32> to vector<64x16xf32>
    %16 = vector.shape_cast %15 : vector<64x16xf32> to vector<8x1x8x16xf32>
    %17 = tpu.concatenate %14, %16 in 1 : vector<8x1x8x16xf32>, vector<8x1x8x16xf32> -> vector<8x2x8x16xf32>
    %18 = vector.shape_cast %17 : vector<8x2x8x16xf32> to vector<16x8x16xf32>
    %c1 = arith.constant 1 : index
    %c1_19 = arith.constant 1 : index
    %c0_20 = arith.constant 0 : index
    %19 = vector.load %arg8[%c1, %c1_19, %c0_20] : memref<18x10x32xf32, #tpu.memory_space<vmem>>, vector<16x8x16xf32>
    tpu.vector_store %arg8[%c1, %c1_19, %c0_20], %18 {strides = array<i32>} : memref<18x10x32xf32, #tpu.memory_space<vmem>>, vector<16x8x16xf32>,
    %c0_21 = arith.constant 0 : index
    %c0_22 = arith.constant 0 : index
    %c0_23 = arith.constant 0 : index
    %c0_24 = arith.constant 0 : index
    %20 = vector.load %arg2[%c0_21, %c0_22, %c0_23, %c0_24] : memref<1x16x8x16xf32, #tpu.memory_space<vmem>>, vector<1x16x8x16xf32>
    %21 = vector.shape_cast %20 : vector<1x16x8x16xf32> to vector<16x8x16xf32>
    %c1_25 = arith.constant 1 : index
    %c1_26 = arith.constant 1 : index
    %c16 = arith.constant 16 : index
    %22 = vector.load %arg8[%c1_25, %c1_26, %c16] : memref<18x10x32xf32, #tpu.memory_space<vmem>>, vector<16x8x16xf32>
    tpu.vector_store %arg8[%c1_25, %c1_26, %c16], %21 {strides = array<i32>} : memref<18x10x32xf32, #tpu.memory_space<vmem>>, vector<16x8x16xf32>,
    %cst_27 = arith.constant 0.000000e+00 : f32
    %23 = vector.broadcast %cst_27 : f32 to vector<128x16xf32>
    %c0_28 = arith.constant 0 : index
    %c0_29 = arith.constant 0 : index
    %c0_30 = arith.constant 0 : index
    %24 = vector.load %arg8[%c0_28, %c0_29, %c0_30] : memref<18x10x32xf32, #tpu.memory_space<vmem>>, vector<18x8x32xf32>
    %25 = vector.shape_cast %24 : vector<18x8x32xf32> to vector<144x32xf32>
    %26 = vector.extract_strided_slice %25 {offsets = [0, 0], sizes = [128, 32], strides = [1, 1]} : vector<144x32xf32> to vector<128x32xf32>
    %c0_31 = arith.constant 0 : index
    %c0_32 = arith.constant 0 : index
    %c0_33 = arith.constant 0 : index
    %27 = vector.load %arg5[%c0_31, %c0_32, %c0_33] : memref<9x32x16xf32, #tpu.memory_space<vmem>>, vector<1x32x16xf32>
    %28 = vector.shape_cast %27 : vector<1x32x16xf32> to vector<32x16xf32>
    %cst_34 = arith.constant dense<0.000000e+00> : vector<128x16xf32>
    %29 = tpu.matmul %26, %28, %cst_34 {dimension_numbers = #tpu.dot_dimension_numbers<[1], [0], [0], [1], [0, 0, 1, 1], [], []>} : vector<128x32xf32>, vector<32x16xf32>, vector<128x16xf32> -> vector<128x16xf32>
    %30 = arith.addf %23, %29 : vector<128x16xf32>
    %31 = vector.extract_strided_slice %25 {offsets = [8, 0], sizes = [128, 32], strides = [1, 1]} : vector<144x32xf32> to vector<128x32xf32>
    %c3 = arith.constant 3 : index
    %c0_35 = arith.constant 0 : index
    %c0_36 = arith.constant 0 : index
    %32 = vector.load %arg5[%c3, %c0_35, %c0_36] : memref<9x32x16xf32, #tpu.memory_space<vmem>>, vector<1x32x16xf32>
    %33 = vector.shape_cast %32 : vector<1x32x16xf32> to vector<32x16xf32>
    %cst_37 = arith.constant dense<0.000000e+00> : vector<128x16xf32>
    %34 = tpu.matmul %31, %33, %cst_37 {dimension_numbers = #tpu.dot_dimension_numbers<[1], [0], [0], [1], [0, 0, 1, 1], [], []>} : vector<128x32xf32>, vector<32x16xf32>, vector<128x16xf32> -> vector<128x16xf32>
    %35 = arith.addf %30, %34 : vector<128x16xf32>
    %36 = vector.extract_strided_slice %25 {offsets = [16, 0], sizes = [128, 32], strides = [1, 1]} : vector<144x32xf32> to vector<128x32xf32>
    %c6 = arith.constant 6 : index
    %c0_38 = arith.constant 0 : index
    %c0_39 = arith.constant 0 : index
    %37 = vector.load %arg5[%c6, %c0_38, %c0_39] : memref<9x32x16xf32, #tpu.memory_space<vmem>>, vector<1x32x16xf32>
    %38 = vector.shape_cast %37 : vector<1x32x16xf32> to vector<32x16xf32>
    %cst_40 = arith.constant dense<0.000000e+00> : vector<128x16xf32>
    %39 = tpu.matmul %36, %38, %cst_40 {dimension_numbers = #tpu.dot_dimension_numbers<[1], [0], [0], [1], [0, 0, 1, 1], [], []>} : vector<128x32xf32>, vector<32x16xf32>, vector<128x16xf32> -> vector<128x16xf32>
    %40 = arith.addf %35, %39 : vector<128x16xf32>
    %c0_41 = arith.constant 0 : index
    %c1_42 = arith.constant 1 : index
    %c0_43 = arith.constant 0 : index
    %41 = vector.load %arg8[%c0_41, %c1_42, %c0_43] : memref<18x10x32xf32, #tpu.memory_space<vmem>>, vector<18x8x32xf32>
    %42 = vector.shape_cast %41 : vector<18x8x32xf32> to vector<144x32xf32>
    %43 = vector.extract_strided_slice %42 {offsets = [0, 0], sizes = [128, 32], strides = [1, 1]} : vector<144x32xf32> to vector<128x32xf32>
    %c1_44 = arith.constant 1 : index
    %c0_45 = arith.constant 0 : index
    %c0_46 = arith.constant 0 : index
    %44 = vector.load %arg5[%c1_44, %c0_45, %c0_46] : memref<9x32x16xf32, #tpu.memory_space<vmem>>, vector<1x32x16xf32>
    %45 = vector.shape_cast %44 : vector<1x32x16xf32> to vector<32x16xf32>
    %cst_47 = arith.constant dense<0.000000e+00> : vector<128x16xf32>
    %46 = tpu.matmul %43, %45, %cst_47 {dimension_numbers = #tpu.dot_dimension_numbers<[1], [0], [0], [1], [0, 0, 1, 1], [], []>} : vector<128x32xf32>, vector<32x16xf32>, vector<128x16xf32> -> vector<128x16xf32>
    %47 = arith.addf %40, %46 : vector<128x16xf32>
    %48 = vector.extract_strided_slice %42 {offsets = [8, 0], sizes = [128, 32], strides = [1, 1]} : vector<144x32xf32> to vector<128x32xf32>
    %c4 = arith.constant 4 : index
    %c0_48 = arith.constant 0 : index
    %c0_49 = arith.constant 0 : index
    %49 = vector.load %arg5[%c4, %c0_48, %c0_49] : memref<9x32x16xf32, #tpu.memory_space<vmem>>, vector<1x32x16xf32>
    %50 = vector.shape_cast %49 : vector<1x32x16xf32> to vector<32x16xf32>
    %cst_50 = arith.constant dense<0.000000e+00> : vector<128x16xf32>
    %51 = tpu.matmul %48, %50, %cst_50 {dimension_numbers = #tpu.dot_dimension_numbers<[1], [0], [0], [1], [0, 0, 1, 1], [], []>} : vector<128x32xf32>, vector<32x16xf32>, vector<128x16xf32> -> vector<128x16xf32>
    %52 = arith.addf %47, %51 : vector<128x16xf32>
    %53 = vector.extract_strided_slice %42 {offsets = [16, 0], sizes = [128, 32], strides = [1, 1]} : vector<144x32xf32> to vector<128x32xf32>
    %c7 = arith.constant 7 : index
    %c0_51 = arith.constant 0 : index
    %c0_52 = arith.constant 0 : index
    %54 = vector.load %arg5[%c7, %c0_51, %c0_52] : memref<9x32x16xf32, #tpu.memory_space<vmem>>, vector<1x32x16xf32>
    %55 = vector.shape_cast %54 : vector<1x32x16xf32> to vector<32x16xf32>
    %cst_53 = arith.constant dense<0.000000e+00> : vector<128x16xf32>
    %56 = tpu.matmul %53, %55, %cst_53 {dimension_numbers = #tpu.dot_dimension_numbers<[1], [0], [0], [1], [0, 0, 1, 1], [], []>} : vector<128x32xf32>, vector<32x16xf32>, vector<128x16xf32> -> vector<128x16xf32>
    %57 = arith.addf %52, %56 : vector<128x16xf32>
    %c0_54 = arith.constant 0 : index
    %c2 = arith.constant 2 : index
    %c0_55 = arith.constant 0 : index
    %58 = vector.load %arg8[%c0_54, %c2, %c0_55] : memref<18x10x32xf32, #tpu.memory_space<vmem>>, vector<18x8x32xf32>
    %59 = vector.shape_cast %58 : vector<18x8x32xf32> to vector<144x32xf32>
    %60 = vector.extract_strided_slice %59 {offsets = [0, 0], sizes = [128, 32], strides = [1, 1]} : vector<144x32xf32> to vector<128x32xf32>
    %c2_56 = arith.constant 2 : index
    %c0_57 = arith.constant 0 : index
    %c0_58 = arith.constant 0 : index
    %61 = vector.load %arg5[%c2_56, %c0_57, %c0_58] : memref<9x32x16xf32, #tpu.memory_space<vmem>>, vector<1x32x16xf32>
    %62 = vector.shape_cast %61 : vector<1x32x16xf32> to vector<32x16xf32>
    %cst_59 = arith.constant dense<0.000000e+00> : vector<128x16xf32>
    %63 = tpu.matmul %60, %62, %cst_59 {dimension_numbers = #tpu.dot_dimension_numbers<[1], [0], [0], [1], [0, 0, 1, 1], [], []>} : vector<128x32xf32>, vector<32x16xf32>, vector<128x16xf32> -> vector<128x16xf32>
    %64 = arith.addf %57, %63 : vector<128x16xf32>
    %65 = vector.extract_strided_slice %59 {offsets = [8, 0], sizes = [128, 32], strides = [1, 1]} : vector<144x32xf32> to vector<128x32xf32>
    %c5 = arith.constant 5 : index
    %c0_60 = arith.constant 0 : index
    %c0_61 = arith.constant 0 : index
    %66 = vector.load %arg5[%c5, %c0_60, %c0_61] : memref<9x32x16xf32, #tpu.memory_space<vmem>>, vector<1x32x16xf32>
    %67 = vector.shape_cast %66 : vector<1x32x16xf32> to vector<32x16xf32>
    %cst_62 = arith.constant dense<0.000000e+00> : vector<128x16xf32>
    %68 = tpu.matmul %65, %67, %cst_62 {dimension_numbers = #tpu.dot_dimension_numbers<[1], [0], [0], [1], [0, 0, 1, 1], [], []>} : vector<128x32xf32>, vector<32x16xf32>, vector<128x16xf32> -> vector<128x16xf32>
    %69 = arith.addf %64, %68 : vector<128x16xf32>
    %70 = vector.extract_strided_slice %59 {offsets = [16, 0], sizes = [128, 32], strides = [1, 1]} : vector<144x32xf32> to vector<128x32xf32>
    %c8 = arith.constant 8 : index
    %c0_63 = arith.constant 0 : index
    %c0_64 = arith.constant 0 : index
    %71 = vector.load %arg5[%c8, %c0_63, %c0_64] : memref<9x32x16xf32, #tpu.memory_space<vmem>>, vector<1x32x16xf32>
    %72 = vector.shape_cast %71 : vector<1x32x16xf32> to vector<32x16xf32>
    %cst_65 = arith.constant dense<0.000000e+00> : vector<128x16xf32>
    %73 = tpu.matmul %70, %72, %cst_65 {dimension_numbers = #tpu.dot_dimension_numbers<[1], [0], [0], [1], [0, 0, 1, 1], [], []>} : vector<128x32xf32>, vector<32x16xf32>, vector<128x16xf32> -> vector<128x16xf32>
    %74 = arith.addf %69, %73 : vector<128x16xf32>
    %c0_66 = arith.constant 0 : index
    %c0_67 = arith.constant 0 : index
    %75 = vector.load %arg6[%c0_66, %c0_67] : memref<1x16xf32, #tpu.memory_space<vmem>>, vector<1x16xf32>
    %76 = vector.broadcast %75 : vector<1x16xf32> to vector<128x16xf32>
    %77 = arith.addf %74, %76 : vector<128x16xf32>
    %78 = vector.shape_cast %77 : vector<128x16xf32> to vector<1x16x8x16xf32>
    %c0_68 = arith.constant 0 : index
    %c0_69 = arith.constant 0 : index
    %c0_70 = arith.constant 0 : index
    %c0_71 = arith.constant 0 : index
    %79 = vector.load %arg7[%c0_68, %c0_69, %c0_70, %c0_71] : memref<1x16x8x16xf32, #tpu.memory_space<vmem>>, vector<1x16x8x16xf32>
    tpu.vector_store %arg7[%c0_68, %c0_69, %c0_70, %c0_71], %78 {strides = array<i32>} : memref<1x16x8x16xf32, #tpu.memory_space<vmem>>, vector<1x16x8x16xf32>,
    return
  }
  func.func @transform_0(%arg0: i32) -> (i32, i32, i32, i32) {
    %c0_i32 = arith.constant 0 : i32
    %c0_i32_0 = arith.constant 0 : i32
    %c0_i32_1 = arith.constant 0 : i32
    %c0_i32_2 = arith.constant 0 : i32
    return %arg0, %c0_i32, %c0_i32_0, %c0_i32_1 : i32, i32, i32, i32
  }
  func.func @transform_1(%arg0: i32) -> (i32, i32, i32, i32) {
    %c0_i32 = arith.constant 0 : i32
    %c0_i32_0 = arith.constant 0 : i32
    %c0_i32_1 = arith.constant 0 : i32
    %c0_i32_2 = arith.constant 0 : i32
    return %arg0, %c0_i32, %c0_i32_0, %c0_i32_1 : i32, i32, i32, i32
  }
  func.func @transform_2(%arg0: i32) -> (i32, i32) {
    %c0_i32 = arith.constant 0 : i32
    %c0_i32_0 = arith.constant 0 : i32
    %c0_i32_1 = arith.constant 0 : i32
    return %c0_i32, %c0_i32_0 : i32, i32
  }
  func.func @transform_3(%arg0: i32) -> (i32, i32) {
    %c0_i32 = arith.constant 0 : i32
    %c0_i32_0 = arith.constant 0 : i32
    %c0_i32_1 = arith.constant 0 : i32
    return %c0_i32, %c0_i32_0 : i32, i32
  }
  func.func @transform_4(%arg0: i32) -> (i32, i32, i32) {
    %c0_i32 = arith.constant 0 : i32
    %c0_i32_0 = arith.constant 0 : i32
    %c0_i32_1 = arith.constant 0 : i32
    %c0_i32_2 = arith.constant 0 : i32
    return %c0_i32, %c0_i32_0, %c0_i32_1 : i32, i32, i32
  }
  func.func @transform_5(%arg0: i32) -> (i32, i32) {
    %c0_i32 = arith.constant 0 : i32
    %c0_i32_0 = arith.constant 0 : i32
    %c0_i32_1 = arith.constant 0 : i32
    return %c0_i32, %c0_i32_0 : i32, i32
  }
  func.func @transform_6(%arg0: i32) -> (i32, i32, i32, i32) {
    %c0_i32 = arith.constant 0 : i32
    %c0_i32_0 = arith.constant 0 : i32
    %c0_i32_1 = arith.constant 0 : i32
    %c0_i32_2 = arith.constant 0 : i32
    return %arg0, %c0_i32, %c0_i32_0, %c0_i32_1 : i32, i32, i32, i32
  }
}

module attributes {stable_mosaic.version = 11 : i64} {
  func.func @_final_kernel(%arg0: i32, %arg1: memref<1x16x16x8xf32, #tpu.memory_space<vmem>>, %arg2: memref<8x16xf32, #tpu.memory_space<vmem>>, %arg3: memref<1x16xf32, #tpu.memory_space<vmem>>, %arg4: memref<1x16x4x16x16xf32, #tpu.memory_space<vmem>>) attributes {dimension_semantics = [#tpu.dimension_semantics<parallel>], iteration_bounds = array<i64: 2>, scalar_prefetch = 0 : i64, scratch_operands = 0 : i64, tpu.core_type = #tpu.core_type<tc>, window_params = [{transform_indices = @transform_0, window_bounds = array<i64: 1, 16, 16, 8>}, {pipeline_mode = #tpu.pipeline_mode<synchronous>, transform_indices = @transform_1, window_bounds = array<i64: 8, 16>}, {pipeline_mode = #tpu.pipeline_mode<synchronous>, transform_indices = @transform_2, window_bounds = array<i64: 1, 16>}, {transform_indices = @transform_3, window_bounds = array<i64: 1, 16, 4, 16, 16>}]} {
    %c0 = arith.constant 0 : index
    %c0_0 = arith.constant 0 : index
    %c0_1 = arith.constant 0 : index
    %c0_2 = arith.constant 0 : index
    %0 = vector.load %arg1[%c0, %c0_0, %c0_1, %c0_2] : memref<1x16x16x8xf32, #tpu.memory_space<vmem>>, vector<1x16x16x8xf32>
    %1 = vector.shape_cast %0 : vector<1x16x16x8xf32> to vector<256x8xf32>
    %c0_3 = arith.constant 0 : index
    %c0_4 = arith.constant 0 : index
    %2 = vector.load %arg2[%c0_3, %c0_4] : memref<8x16xf32, #tpu.memory_space<vmem>>, vector<8x16xf32>
    %cst = arith.constant dense<0.000000e+00> : vector<256x16xf32>
    %3 = tpu.matmul %1, %2, %cst {dimension_numbers = #tpu.dot_dimension_numbers<[1], [0], [0], [1], [0, 0, 1, 1], [], []>} : vector<256x8xf32>, vector<8x16xf32>, vector<256x16xf32> -> vector<256x16xf32>
    %c0_5 = arith.constant 0 : index
    %c0_6 = arith.constant 0 : index
    %4 = vector.load %arg3[%c0_5, %c0_6] : memref<1x16xf32, #tpu.memory_space<vmem>>, vector<1x16xf32>
    %5 = vector.broadcast %4 : vector<1x16xf32> to vector<256x16xf32>
    %6 = arith.addf %3, %5 : vector<256x16xf32>
    %7 = vector.shape_cast %6 : vector<256x16xf32> to vector<1x16x1x16x16xf32>
    %c0_7 = arith.constant 0 : index
    %c0_8 = arith.constant 0 : index
    %c0_9 = arith.constant 0 : index
    %c0_10 = arith.constant 0 : index
    %c0_11 = arith.constant 0 : index
    %8 = vector.load %arg4[%c0_7, %c0_8, %c0_9, %c0_10, %c0_11] : memref<1x16x4x16x16xf32, #tpu.memory_space<vmem>>, vector<1x16x1x16x16xf32>
    tpu.vector_store %arg4[%c0_7, %c0_8, %c0_9, %c0_10, %c0_11], %7 {strides = array<i32>} : memref<1x16x4x16x16xf32, #tpu.memory_space<vmem>>, vector<1x16x1x16x16xf32>,
    %c0_12 = arith.constant 0 : index
    %c0_13 = arith.constant 0 : index
    %c1 = arith.constant 1 : index
    %c0_14 = arith.constant 0 : index
    %c0_15 = arith.constant 0 : index
    %9 = vector.load %arg4[%c0_12, %c0_13, %c1, %c0_14, %c0_15] : memref<1x16x4x16x16xf32, #tpu.memory_space<vmem>>, vector<1x16x1x16x16xf32>
    tpu.vector_store %arg4[%c0_12, %c0_13, %c1, %c0_14, %c0_15], %7 {strides = array<i32>} : memref<1x16x4x16x16xf32, #tpu.memory_space<vmem>>, vector<1x16x1x16x16xf32>,
    %c0_16 = arith.constant 0 : index
    %c0_17 = arith.constant 0 : index
    %c2 = arith.constant 2 : index
    %c0_18 = arith.constant 0 : index
    %c0_19 = arith.constant 0 : index
    %10 = vector.load %arg4[%c0_16, %c0_17, %c2, %c0_18, %c0_19] : memref<1x16x4x16x16xf32, #tpu.memory_space<vmem>>, vector<1x16x1x16x16xf32>
    tpu.vector_store %arg4[%c0_16, %c0_17, %c2, %c0_18, %c0_19], %7 {strides = array<i32>} : memref<1x16x4x16x16xf32, #tpu.memory_space<vmem>>, vector<1x16x1x16x16xf32>,
    %c0_20 = arith.constant 0 : index
    %c0_21 = arith.constant 0 : index
    %c3 = arith.constant 3 : index
    %c0_22 = arith.constant 0 : index
    %c0_23 = arith.constant 0 : index
    %11 = vector.load %arg4[%c0_20, %c0_21, %c3, %c0_22, %c0_23] : memref<1x16x4x16x16xf32, #tpu.memory_space<vmem>>, vector<1x16x1x16x16xf32>
    tpu.vector_store %arg4[%c0_20, %c0_21, %c3, %c0_22, %c0_23], %7 {strides = array<i32>} : memref<1x16x4x16x16xf32, #tpu.memory_space<vmem>>, vector<1x16x1x16x16xf32>,
    return
  }
  func.func @transform_0(%arg0: i32) -> (i32, i32, i32, i32) {
    %c0_i32 = arith.constant 0 : i32
    %c0_i32_0 = arith.constant 0 : i32
    %c0_i32_1 = arith.constant 0 : i32
    %c0_i32_2 = arith.constant 0 : i32
    return %arg0, %c0_i32, %c0_i32_0, %c0_i32_1 : i32, i32, i32, i32
  }
  func.func @transform_1(%arg0: i32) -> (i32, i32) {
    %c0_i32 = arith.constant 0 : i32
    %c0_i32_0 = arith.constant 0 : i32
    %c0_i32_1 = arith.constant 0 : i32
    return %c0_i32, %c0_i32_0 : i32, i32
  }
  func.func @transform_2(%arg0: i32) -> (i32, i32) {
    %c0_i32 = arith.constant 0 : i32
    %c0_i32_0 = arith.constant 0 : i32
    %c0_i32_1 = arith.constant 0 : i32
    return %c0_i32, %c0_i32_0 : i32, i32
  }
  func.func @transform_3(%arg0: i32) -> (i32, i32, i32, i32, i32) {
    %c0_i32 = arith.constant 0 : i32
    %c0_i32_0 = arith.constant 0 : i32
    %c0_i32_1 = arith.constant 0 : i32
    %c0_i32_2 = arith.constant 0 : i32
    %c0_i32_3 = arith.constant 0 : i32
    return %arg0, %c0_i32, %c0_i32_0, %c0_i32_1, %c0_i32_2 : i32, i32, i32, i32, i32
  }
}

</mosaic_0001>

<bundles_post_ra>
// kernel: tile.39
= control target key start
LH: loop header
LB: loop body
LE: loop exit
PB: predicated region body
PF: predicated region fallthrough
CT: control target
= control target key end

     0   :  { %vm8_vm0 = vcmask 130048   ;;  %vm14_vm1 = vcmask 261248   ;;  %s42_s0 = inlined_call_operand.vmem [shape: f32[2,16], index: 0, kind: input, shape index: {}]   ;;  %s43_s1 = inlined_call_operand.vmem [shape: f32[1,32], index: 1, kind: output, shape index: {}]  }
   0x1   :  { %v5_v0 = vld [vmem:[%s42_s0] sm:$0x3]  ;;  %s25_s0 = smov 16  }
   0x2   :  { %6 = vst [vmem:[#allocation1] sm:$0x3] %v5_v0 }
   0x9   :  { %v11_v1 = vld [vmem:[#allocation1 + $0x1] sm:$0x1]   ;;  %v7_v2 = vld [vmem:[#allocation1] sm:$0x1]  }
   0xa   :  { %12 = vrot.lane.b32.xlu0 %v11_v1, %s25_s0  ;;  %9 = vst.msk [vmem:[#allocation0] sm:$0x1] %vm8_vm0, %v7_v2  }
  0x7c   :  { %v13_v3 = vpop.permute.xlu0 %12  }
  0x7d   :  { %15 = vst.msk [vmem:[#allocation0] sm:$0x1] %vm14_vm1, %v13_v3  }
  0x84   :  { %v20_v4 = vld [vmem:[#allocation0] sm:$0x1] }
  0x85   :  { %23 = vst [vmem:[%s43_s1] sm:$0x1] %v20_v4 }

// kernel: tile.49
= control target key start
LH: loop header
LB: loop body
LE: loop exit
PB: predicated region body
PF: predicated region fallthrough
CT: control target
= control target key end

     0   :  { %vm8_vm0 = vcmask 64512   ;;  %vm14_vm1 = vcmask 130112   ;;  %s42_s0 = inlined_call_operand.vmem [shape: f32[2,8], index: 0, kind: input, shape index: {}]   ;;  %s43_s1 = inlined_call_operand.vmem [shape: f32[1,16], index: 1, kind: output, shape index: {}]  }
   0x1   :  { %v5_v0 = vld [vmem:[%s42_s0] sm:$0x3]  ;;  %s25_s0 = smov 8  }
   0x2   :  { %6 = vst [vmem:[#allocation1] sm:$0x3] %v5_v0 }
   0x9   :  { %v11_v1 = vld [vmem:[#allocation1 + $0x1] sm:$0x1]   ;;  %v7_v2 = vld [vmem:[#allocation1] sm:$0x1]  }
   0xa   :  { %12 = vrot.lane.b32.xlu0 %v11_v1, %s25_s0  ;;  %9 = vst.msk [vmem:[#allocation0] sm:$0x1] %vm8_vm0, %v7_v2  }
  0x7c   :  { %v13_v3 = vpop.permute.xlu0 %12  }
  0x7d   :  { %15 = vst.msk [vmem:[#allocation0] sm:$0x1] %vm14_vm1, %v13_v3  }
  0x84   :  { %v20_v4 = vld [vmem:[#allocation0] sm:$0x1] }
  0x85   :  { %23 = vst [vmem:[%s43_s1] sm:$0x1] %v20_v4 }

// kernel: tile.48
= control target key start
LH: loop header
LB: loop body
LE: loop exit
PB: predicated region body
PF: predicated region fallthrough
CT: control target
= control target key end

     0   :  { %2 = vsyncpa [#allocation1], 0  ;;  %s42_s6 = smov [#allocation0]   ;;  %s59_s0 = inlined_call_operand.hbm [shape: f32[8], index: 0, kind: input, shape index: {}]   ;;  %s60_s1 = inlined_call_operand.vmem [shape: f32[2,8], index: 1, kind: output, shape index: {}]  }
   0x1   :  { %s9_s7 = sshll.u32 %s42_s6, 4  ;;  %s10_s7 = int_to_ptr.vmem [resolvable:$true] %s9_s7 }
   0x2   :  { %s28_s8 = scalar_lea.vmem %s10_s7, 16  ;;  %s32_s9 = scalar_lea.vmem %s10_s7, 32 }
   0x3   :  { %p29_p0 = scmp.ne.s32.totalorder %s10_s7, %s28_s8  ;;  %p33_p1 = scmp.lt.s32.totalorder %s10_s7, %s10_s7 }
   0x4   :  { %p34_p2 = scmp.lt.s32.totalorder %s32_s9, %s28_s8 }
   0x6   :  { %p35_p3 = por %p34_p2, %p33_p1 }
   0x8   :  { %p36_p4 = pnand %p35_p3, %p29_p0 }
   0xa   :  { %39 = shalt.err (!%p36_p4)
}
   0xb   :  { %12 = dma.hbm_to_vmem [thread:$0]  %s59_s0, 16, %s10_s7, [#allocation1]  }
   0xc   :  { %40 = dma.done.wait [#allocation1], 16  }
   0xd   :  { %41 = vsyncadd [#allocation1], 4294967280  ;;  %v16_v0 = vld [vmem:[#allocation0] ss:$0 sm:$0xff] }
   0xe   :  { %17 = vst [vmem:[%s60_s1] sm:$0x3] %v16_v0 }
   0xf   :  { %18 = vsyncpa [#allocation1], 1 }

// kernel: tile.38
= control target key start
LH: loop header
LB: loop body
LE: loop exit
PB: predicated region body
PF: predicated region fallthrough
CT: control target
= control target key end

     0   :  { %2 = vsyncpa [#allocation1], 0  ;;  %s42_s6 = smov [#allocation0]   ;;  %s59_s0 = inlined_call_operand.hbm [shape: f32[16], index: 0, kind: input, shape index: {}]   ;;  %s60_s1 = inlined_call_operand.vmem [shape: f32[2,16], index: 1, kind: output, shape index: {}]  }
   0x1   :  { %s9_s7 = sshll.u32 %s42_s6, 4  ;;  %s10_s7 = int_to_ptr.vmem [resolvable:$true] %s9_s7 }
   0x2   :  { %s28_s8 = scalar_lea.vmem %s10_s7, 16  ;;  %s32_s9 = scalar_lea.vmem %s10_s7, 32 }
   0x3   :  { %p29_p0 = scmp.ne.s32.totalorder %s10_s7, %s28_s8  ;;  %p33_p1 = scmp.lt.s32.totalorder %s10_s7, %s10_s7 }
   0x4   :  { %p34_p2 = scmp.lt.s32.totalorder %s32_s9, %s28_s8 }
   0x6   :  { %p35_p3 = por %p34_p2, %p33_p1 }
   0x8   :  { %p36_p4 = pnand %p35_p3, %p29_p0 }
   0xa   :  { %39 = shalt.err (!%p36_p4)
}
   0xb   :  { %12 = dma.hbm_to_vmem [thread:$0]  %s59_s0, 16, %s10_s7, [#allocation1]  }
   0xc   :  { %40 = dma.done.wait [#allocation1], 16  }
   0xd   :  { %41 = vsyncadd [#allocation1], 4294967280  ;;  %v16_v0 = vld [vmem:[#allocation0] ss:$0 sm:$0xff] }
   0xe   :  { %17 = vst [vmem:[%s60_s1] sm:$0x3] %v16_v0 }
   0xf   :  { %18 = vsyncpa [#allocation1], 1 }

// kernel: tile.34
= control target key start
LH: loop header
LB: loop body
LE: loop exit
PB: predicated region body
PF: predicated region fallthrough
CT: control target
= control target key end

     0   :  { %vm8_vm0 = vcmask 130048   ;;  %s40_s8 = smov 16   ;;  %s41_s9 = smov 32   ;;  %vm14_vm1 = vcmask 523648   ;;  %vm20_vm2 = vcmask 392448   ;;  %vm26_vm3 = vcmask 261248   ;;  %s58_s0 = inlined_call_operand.vmem [shape: f32[4,16], index: 0, kind: input, shape index: {}]   ;;  %s59_s1 = inlined_call_operand.vmem [shape: f32[1,64], index: 1, kind: output, shape index: {}]  }
   0x1   :  { %v5_v0 = vld [vmem:[%s58_s0] sm:$0xf]  ;;  %s39_s0 = smov 48  }
   0x2   :  { %6 = vst [vmem:[#allocation1] sm:$0xf] %v5_v0 }
   0x9   :  { %v11_v1 = vld [vmem:[#allocation1 + $0x3] sm:$0x1]   ;;  %v23_v2 = vld [vmem:[#allocation1 + $0x1] sm:$0x1]   ;;  %v7_v3 = vld [vmem:[#allocation1] sm:$0x1]  }
   0xa   :  { %12 = vrot.lane.b32.xlu0 %v11_v1, %s39_s0  ;;  %24 = vrot.lane.b32.xlu1 %v23_v2, %s40_s8  ;;  %v17_v4 = vld [vmem:[#allocation1 + $0x2] sm:$0x1]   ;;  %9 = vst.msk [vmem:[#allocation0] sm:$0x1] %vm8_vm0, %v7_v3  }
   0xe   :  { %18 = vrot.lane.b32.xlu0 %v17_v4, %s41_s9 }
  0x7c   :  { %v13_v5 = vpop.permute.xlu0 %12   ;;  %v25_v6 = vpop.permute.xlu1 %24  }
  0x7d   :  { %15 = vst.msk [vmem:[#allocation0] sm:$0x1] %vm14_vm1, %v13_v5  }
  0x80   :  { %v19_v7 = vpop.permute.xlu0 %18  }
  0x81   :  { %21 = vst.msk [vmem:[#allocation0] sm:$0x1] %vm20_vm2, %v19_v7  }
  0x82   :  { %27 = vst.msk [vmem:[#allocation0] sm:$0x1] %vm26_vm3, %v25_v6  }
  0x89   :  { %v32_v8 = vld [vmem:[#allocation0] sm:$0x1] }
  0x8a   :  { %35 = vst [vmem:[%s59_s1] sm:$0x1] %v32_v8 }

// kernel: tile.33
= control target key start
LH: loop header
LB: loop body
LE: loop exit
PB: predicated region body
PF: predicated region fallthrough
CT: control target
= control target key end

     0   :  { %2 = vsyncpa [#allocation1], 0  ;;  %s42_s6 = smov [#allocation0]   ;;  %s59_s0 = inlined_call_operand.hbm [shape: f32[16], index: 0, kind: input, shape index: {}]   ;;  %s60_s1 = inlined_call_operand.vmem [shape: f32[4,16], index: 1, kind: output, shape index: {}]  }
   0x1   :  { %s9_s7 = sshll.u32 %s42_s6, 4  ;;  %s10_s7 = int_to_ptr.vmem [resolvable:$true] %s9_s7 }
   0x2   :  { %s28_s8 = scalar_lea.vmem %s10_s7, 16  ;;  %s32_s9 = scalar_lea.vmem %s10_s7, 32 }
   0x3   :  { %p29_p0 = scmp.ne.s32.totalorder %s10_s7, %s28_s8  ;;  %p33_p1 = scmp.lt.s32.totalorder %s10_s7, %s10_s7 }
   0x4   :  { %p34_p2 = scmp.lt.s32.totalorder %s32_s9, %s28_s8 }
   0x6   :  { %p35_p3 = por %p34_p2, %p33_p1 }
   0x8   :  { %p36_p4 = pnand %p35_p3, %p29_p0 }
   0xa   :  { %39 = shalt.err (!%p36_p4)
}
   0xb   :  { %12 = dma.hbm_to_vmem [thread:$0]  %s59_s0, 16, %s10_s7, [#allocation1]  }
   0xc   :  { %40 = dma.done.wait [#allocation1], 16  }
   0xd   :  { %41 = vsyncadd [#allocation1], 4294967280  ;;  %v16_v0 = vld [vmem:[#allocation0] ss:$0 sm:$0xff] }
   0xe   :  { %17 = vst [vmem:[%s60_s1] sm:$0xf] %v16_v0 }
   0xf   :  { %18 = vsyncpa [#allocation1], 1 }

// kernel: tile.43
= control target key start
LH: loop header
LB: loop body
LE: loop exit
PB: predicated region body
PF: predicated region fallthrough
CT: control target
= control target key end

     0   :  { %2 = vsyncpa [#allocation1], 0  ;;  %s42_s6 = smov [#allocation0]   ;;  %s59_s0 = inlined_call_operand.hbm [shape: f32[8], index: 0, kind: input, shape index: {}]   ;;  %s60_s1 = inlined_call_operand.vmem [shape: f32[4,8], index: 1, kind: output, shape index: {}]  }
   0x1   :  { %s9_s7 = sshll.u32 %s42_s6, 4  ;;  %s10_s7 = int_to_ptr.vmem [resolvable:$true] %s9_s7 }
   0x2   :  { %s28_s8 = scalar_lea.vmem %s10_s7, 16  ;;  %s32_s9 = scalar_lea.vmem %s10_s7, 32 }
   0x3   :  { %p29_p0 = scmp.ne.s32.totalorder %s10_s7, %s28_s8  ;;  %p33_p1 = scmp.lt.s32.totalorder %s10_s7, %s10_s7 }
   0x4   :  { %p34_p2 = scmp.lt.s32.totalorder %s32_s9, %s28_s8 }
   0x6   :  { %p35_p3 = por %p34_p2, %p33_p1 }
   0x8   :  { %p36_p4 = pnand %p35_p3, %p29_p0 }
   0xa   :  { %39 = shalt.err (!%p36_p4)
}
   0xb   :  { %12 = dma.hbm_to_vmem [thread:$0]  %s59_s0, 16, %s10_s7, [#allocation1]  }
   0xc   :  { %40 = dma.done.wait [#allocation1], 16  }
   0xd   :  { %41 = vsyncadd [#allocation1], 4294967280  ;;  %v16_v0 = vld [vmem:[#allocation0] ss:$0 sm:$0xff] }
   0xe   :  { %17 = vst [vmem:[%s60_s1] sm:$0xf] %v16_v0 }
   0xf   :  { %18 = vsyncpa [#allocation1], 1 }

// kernel: tile.58
= control target key start
LH: loop header
LB: loop body
LE: loop exit
PB: predicated region body
PF: predicated region fallthrough
CT: control target
= control target key end

     0   :  { %2 = vsyncpa [#allocation1], 0  ;;  %s42_s6 = smov [#allocation0]   ;;  %s59_s0 = inlined_call_operand.hbm [shape: f32[4], index: 0, kind: input, shape index: {}]   ;;  %s60_s1 = inlined_call_operand.vmem [shape: f32[4,4], index: 1, kind: output, shape index: {}]  }
   0x1   :  { %s9_s7 = sshll.u32 %s42_s6, 4  ;;  %s10_s7 = int_to_ptr.vmem [resolvable:$true] %s9_s7 }
   0x2   :  { %s28_s8 = scalar_lea.vmem %s10_s7, 16  ;;  %s32_s9 = scalar_lea.vmem %s10_s7, 32 }
   0x3   :  { %p29_p0 = scmp.ne.s32.totalorder %s10_s7, %s28_s8  ;;  %p33_p1 = scmp.lt.s32.totalorder %s10_s7, %s10_s7 }
   0x4   :  { %p34_p2 = scmp.lt.s32.totalorder %s32_s9, %s28_s8 }
   0x6   :  { %p35_p3 = por %p34_p2, %p33_p1 }
   0x8   :  { %p36_p4 = pnand %p35_p3, %p29_p0 }
   0xa   :  { %39 = shalt.err (!%p36_p4)
}
   0xb   :  { %12 = dma.hbm_to_vmem [thread:$0]  %s59_s0, 16, %s10_s7, [#allocation1]  }
   0xc   :  { %40 = dma.done.wait [#allocation1], 16  }
   0xd   :  { %41 = vsyncadd [#allocation1], 4294967280  ;;  %v16_v0 = vld [vmem:[#allocation0] ss:$0 sm:$0xff] }
   0xe   :  { %17 = vst [vmem:[%s60_s1] sm:$0xf] %v16_v0 }
   0xf   :  { %18 = vsyncpa [#allocation1], 1 }

// kernel: tile.44
= control target key start
LH: loop header
LB: loop body
LE: loop exit
PB: predicated region body
PF: predicated region fallthrough
CT: control target
= control target key end

     0   :  { %vm8_vm0 = vcmask 64512   ;;  %s40_s8 = smov 8   ;;  %s41_s9 = smov 16   ;;  %vm14_vm1 = vcmask 261312   ;;  %vm20_vm2 = vcmask 195712   ;;  %vm26_vm3 = vcmask 130112   ;;  %s58_s0 = inlined_call_operand.vmem [shape: f32[4,8], index: 0, kind: input, shape index: {}]   ;;  %s59_s1 = inlined_call_operand.vmem [shape: f32[1,32], index: 1, kind: output, shape index: {}]  }
   0x1   :  { %v5_v0 = vld [vmem:[%s58_s0] sm:$0xf]  ;;  %s39_s0 = smov 24  }
   0x2   :  { %6 = vst [vmem:[#allocation1] sm:$0xf] %v5_v0 }
   0x9   :  { %v11_v1 = vld [vmem:[#allocation1 + $0x3] sm:$0x1]   ;;  %v23_v2 = vld [vmem:[#allocation1 + $0x1] sm:$0x1]   ;;  %v7_v3 = vld [vmem:[#allocation1] sm:$0x1]  }
   0xa   :  { %12 = vrot.lane.b32.xlu0 %v11_v1, %s39_s0  ;;  %24 = vrot.lane.b32.xlu1 %v23_v2, %s40_s8  ;;  %v17_v4 = vld [vmem:[#allocation1 + $0x2] sm:$0x1]   ;;  %9 = vst.msk [vmem:[#allocation0] sm:$0x1] %vm8_vm0, %v7_v3  }
   0xe   :  { %18 = vrot.lane.b32.xlu0 %v17_v4, %s41_s9 }
  0x7c   :  { %v13_v5 = vpop.permute.xlu0 %12   ;;  %v25_v6 = vpop.permute.xlu1 %24  }
  0x7d   :  { %15 = vst.msk [vmem:[#allocation0] sm:$0x1] %vm14_vm1, %v13_v5  }
  0x80   :  { %v19_v7 = vpop.permute.xlu0 %18  }
  0x81   :  { %21 = vst.msk [vmem:[#allocation0] sm:$0x1] %vm20_vm2, %v19_v7  }
  0x82   :  { %27 = vst.msk [vmem:[#allocation0] sm:$0x1] %vm26_vm3, %v25_v6  }
  0x89   :  { %v32_v8 = vld [vmem:[#allocation0] sm:$0x1] }
  0x8a   :  { %35 = vst [vmem:[%s59_s1] sm:$0x1] %v32_v8 }

// kernel: tile.59
= control target key start
LH: loop header
LB: loop body
LE: loop exit
PB: predicated region body
PF: predicated region fallthrough
CT: control target
= control target key end

     0   :  { %vm8_vm0 = vcmask 31744   ;;  %s40_s8 = smov 4   ;;  %s41_s9 = smov 8   ;;  %vm14_vm1 = vcmask 130144   ;;  %vm20_vm2 = vcmask 97344   ;;  %vm26_vm3 = vcmask 64544   ;;  %s58_s0 = inlined_call_operand.vmem [shape: f32[4,4], index: 0, kind: input, shape index: {}]   ;;  %s59_s1 = inlined_call_operand.vmem [shape: f32[1,16], index: 1, kind: output, shape index: {}]  }
   0x1   :  { %v5_v0 = vld [vmem:[%s58_s0] sm:$0xf]  ;;  %s39_s0 = smov 12  }
   0x2   :  { %6 = vst [vmem:[#allocation1] sm:$0xf] %v5_v0 }
   0x9   :  { %v11_v1 = vld [vmem:[#allocation1 + $0x3] sm:$0x1]   ;;  %v23_v2 = vld [vmem:[#allocation1 + $0x1] sm:$0x1]   ;;  %v7_v3 = vld [vmem:[#allocation1] sm:$0x1]  }
   0xa   :  { %12 = vrot.lane.b32.xlu0 %v11_v1, %s39_s0  ;;  %24 = vrot.lane.b32.xlu1 %v23_v2, %s40_s8  ;;  %v17_v4 = vld [vmem:[#allocation1 + $0x2] sm:$0x1]   ;;  %9 = vst.msk [vmem:[#allocation0] sm:$0x1] %vm8_vm0, %v7_v3  }
   0xe   :  { %18 = vrot.lane.b32.xlu0 %v17_v4, %s41_s9 }
  0x7c   :  { %v13_v5 = vpop.permute.xlu0 %12   ;;  %v25_v6 = vpop.permute.xlu1 %24  }
  0x7d   :  { %15 = vst.msk [vmem:[#allocation0] sm:$0x1] %vm14_vm1, %v13_v5  }
  0x80   :  { %v19_v7 = vpop.permute.xlu0 %18  }
  0x81   :  { %21 = vst.msk [vmem:[#allocation0] sm:$0x1] %vm20_vm2, %v19_v7  }
  0x82   :  { %27 = vst.msk [vmem:[#allocation0] sm:$0x1] %vm26_vm3, %v25_v6  }
  0x89   :  { %v32_v8 = vld [vmem:[#allocation0] sm:$0x1] }
  0x8a   :  { %35 = vst [vmem:[%s59_s1] sm:$0x1] %v32_v8 }

// kernel: unet_decoder_2d.3
= control target key start
LH: loop header
LB: loop body
LE: loop exit
PB: predicated region body
PF: predicated region fallthrough
CT: control target
= control target key end

     0   :  { %11 = vsyncpa [#allocation4], 0  ;;  %s2713_s0 = inlined_call_operand.hbm [shape: f32[2,4,4,32], index: 0, kind: input, shape index: {}]   ;;  %s2714_s1 = inlined_call_operand.vmem [shape: f32[2,8,4,32], index: 1, kind: input, shape index: {}]   ;;  %s2715_s2 = inlined_call_operand.vmem [shape: f32[32,64], index: 2, kind: input, shape index: {}]   ;;  %s2716_s3 = inlined_call_operand.vmem [shape: f32[1,64], index: 3, kind: input, shape index: {}]   ;;  %s2717_s4 = inlined_call_operand.vmem [shape: f32[9,64,32], index: 4, kind: input, shape index: {}]   ;;  %s2718_s5 = inlined_call_operand.vmem [shape: f32[1,32], index: 5, kind: input, shape index: {}]   ;;  %s2719_s6 = inlined_call_operand.vmem [shape: f32[2,8,4,32], index: 6, kind: output, shape index: {}]  }
   0x1   :  { %13 = vsyncpa [#allocation4 + $0x1], 0  ;;  %s2240_s21 = smov 0   ;;  %s2242_s22 = smov 0  }
   0x2   :  { %s2244_s23 = smov 0   ;;  %s2246_s24 = smov 0  }
   0x3 LB: > { %s2259_s25 = sadd.s32 4294967295, %s2197_s24   ;;  %s2262_s26 = sadd.s32 1, %s2197_s24   ;;  %s2197_s24 = sphi %s2246_s24, %s2728_s24   ;;  %s2193_s23 = sphi %s2244_s23, %s2727_s23   ;;  %s2189_s22 = sphi %s2242_s22, %s2726_s22   ;;  %s2185_s21 = sphi %s2240_s21, %s2725_s21  }
   0x4   : > { %s23_s27 = ssub.s32 %s2197_s24, %s2262_s26  ;;  %s26_s28 = sadd.s32 1, %s2193_s23 }
   0x5   : > { %p24_p0 = scmp.eq.s32.totalorder %s23_s27, 0  ;;  %p33_p1 = scmp.ne.s32.totalorder %s2193_s23, %s2189_s22 }
   0x6   : > { %p34_p2 = scmp.eq.s32.totalorder %s2197_s24, 0  ;;  %p39_p3 = scmp.ne.s32.totalorder %s2189_s22, %s2185_s21 }
   0x7   : > { %s2272_s29 = scalar_select %p24_p0, %s2193_s23, %s26_s28  }
   0x8   : > { %p35_p4 = por %p34_p2, %p33_p1  ;;  %p40_p5 = scmp.eq.s32.totalorder %s2259_s25, 0 }
   0x9   : > { %p2070_p6 = scmp.lt.s32.totalorder %s2197_s24, 2  ;;  %s211_s7 = sand.u32 1, %s2193_s23  }
   0xa   : > { %p2276_p7 = por %p40_p5, %p39_p3  ;;  %s1623_s8 = sshll.u32 %s211_s7, 4 }
   0xb   : > { %s1738_s9 = sshll.u32 %s2197_s24, 8  ;;  %s215_s13 = scalar_lea.vmem [#allocation3], %s1623_s8 }
   0xc   : > { %s2721_s30 = scalar_select %p2276_p7, 1, 0 }
   0xd   : > { %s2285_s12 = scalar_lea.hbm %s2713_s0, %s1738_s9  ;;  %s222_s14 = sshll.u32 %s215_s13, 4  ;;  %s2287_s14 = int_to_ptr.vmem [resolvable:$true] %s222_s14 }
   0xe   : > { %p2289_p8 = pnand %p2070_p6, %p35_p4  ;;  %s2294_s16 = scalar_lea.sflag [#allocation4], %s211_s7 }
   0xf   : > { %s2135_s17 = scalar_lea.hbm %s2285_s12, 256  ;;  %s2140_s20 = scalar_lea.hbm %s2713_s0, 512 }
  0x10   : > { %p2136_p10 = scmp.ne.s32.totalorder %s2285_s12, %s2135_s17  ;;  %p2137_p11 = pneg %p2289_p8 }
  0x11   : > { %p2141_p0 = scmp.lt.s32.totalorder %s2285_s12, %s2713_s0  ;;  %p2142_p1 = scmp.lt.s32.totalorder %s2140_s20, %s2135_s17 }
  0x12   : > { %p2138_p12 = pnand %p2137_p11, %p2136_p10 }
  0x13   : > { %p2143_p2 = por %p2142_p1, %p2141_p0 }
  0x14   : > { %p2139_p13 = pneg %p2138_p12 }
  0x16   : > { %p2144_p3 = pnand %p2143_p2, %p2139_p13 }
  0x18   : > { %2147 = shalt.err (!%p2144_p3)
}
  0x19   : > { %s2148_s28 = scalar_lea.vmem %s2287_s14, 256  ;;  %s2199_s7 = smov [#allocation3]  }
  0x1a   : > { %p2149_p4 = scmp.ne.s32.totalorder %s2287_s14, %s2148_s28  ;;  %s2153_s8 = sshll.u32 %s2199_s7, 4  ;;  %s2154_s8 = int_to_ptr.vmem [resolvable:$false] %s2153_s8 }
  0x1b   : > { %s2155_s9 = scalar_lea.vmem %s2154_s8, 512  ;;  %p2156_p10 = scmp.lt.s32.totalorder %s2287_s14, %s2154_s8 }
  0x1c   : > { %p2151_p5 = pnand %p2149_p4, %p2137_p11  ;;  %p2157_p12 = scmp.lt.s32.totalorder %s2155_s9, %s2148_s28 }
  0x1e   : > { %p2152_p6 = pneg %p2151_p5  ;;  %p2158_p9 = por %p2157_p12, %p2156_p10 }
  0x20   : > { %p2159_p7 = pnand %p2158_p9, %p2152_p6 }
  0x22   : > { %2162 = shalt.err (!%p2159_p7)
}
  0x23   : > { %s2200_s10 = smov 64   ;;  %s2201_s11 = smov 4  }
  0x24   : > { %2069 = dma.hbm_to_vmem [thread:$0]  (!%p2289_p8), %s2285_s12, 256, %s2287_s14, %s2294_s16, %s2200_s10, %s2200_s10, %s2201_s11  }
  0x25   : > { %p238_p11 = scmp.lt.s32.totalorder %s2197_s24, 3  ;;  %p2723_p13 = scmp.ge.s32.totalorder %s2197_s24, 1 }
  0x27   : > { %p239_p0 = pnand %p2723_p13, %p238_p11 }
  0x28   : > { %s244_s13 = sand.u32 (!%p239_p0), 1, %s2189_s22   ;;  %p2724_p7 = scmp.ne.s32.totalorder (!%p239_p0), %s2721_s30, 0 }
  0x29   : > { %242 = sbr.rel (%p239_p0) target bundleno = 668 (0x29c), region = 44  ;;  %s1627_s17 = sshll.u32 (!%p239_p0), %s244_s13, 4 }
  0x2a   : > { %s245_s18 = scalar_lea.sflag (!%p239_p0), [#allocation4], %s244_s13  ;;  %s248_s19 = scalar_lea.vmem (!%p239_p0), [#allocation3], %s1627_s17 }
  0x2e   : > { %2180 = dma.done.wait (%p2724_p7), %s245_s18, 256  }
  0x2f   : > { %2182 = vsyncadd (%p2724_p7), %s245_s18, 4294967040  ;;  %p282_p9 = scmp.lt.s32.totalorder %s2259_s25, 1  ;;  %v324_v0 = vld [vmem:[%s2715_s2 + $0x18] sm:$0xff]  ;;  %v323_v1 = vld [vmem:[%s2715_s2 + $0x10] sm:$0xff]  ;;  %vm338_vm0 = vcmask 261120   ;;  %s2202_s9 = smov 32  }
  0x30   : > { %1855 = vmatprep.subr.mxu0 %v324_v0  ;;  %v322_v2 = vld [vmem:[%s2715_s2 + $0x8] sm:$0xff]  ;;  %v2108_v3 = vld [vmem:[%s248_s19] sm:$0xff]   ;;  %vm292_vm1 = vcmask 521216   ;;  %v2203_v9 = vmov 0.0   ;;  %vm296_vm2 = vcmask 516096   ;;  %v1642_v10 = vld [vmem:[%s2717_s4 + $0xf8] sm:$0xff] }
  0x31   : > { %s2730_s25 = smov (!%p282_p9, %s2259_s25), 1  ;;  %1856 = vmatpush3.msra.mxu0 %v324_v0  ;;  %v321_v5 = vld [vmem:[%s2715_s2] sm:$0xff]  ;;  %1863 = vmatprep.mubr.msk.f32.mxu0 %vm338_vm0, %v2108_v3  ;;  %v2109_v6 = vld [vmem:[%s248_s19 + $0x8] sm:$0xff]   ;;  %293 = vst.msk [vmem:[#allocation2] sm:$0x3f] %vm292_vm1, %v2203_v9  ;;  %v1641_v12 = vld [vmem:[%s2717_s4 + $0xf0] sm:$0xff] }
  0x32   : > { %s1739_s24 = sshll.u32 %s2730_s25, 5  ;;  %1857 = vmatprep.subr.mxu0 %v323_v1  ;;  %295 = vst.msk [vmem:[#allocation2 + $0x48] sm:$0x3f] %vm292_vm1, %v2203_v9  ;;  %v512_v11 = vld [vmem:[%s2717_s4 + $0x38] sm:$0xff]  ;;  %1866 = vmatprep.subr.mxu1 %v1642_v10  ;;  %v511_v13 = vld [vmem:[%s2717_s4 + $0x30] sm:$0xff]  ;;  %v1640_v14 = vld [vmem:[%s2717_s4 + $0xe8] sm:$0xff] }
  0x33   : > { %s2339_s21 = scalar_lea.vmem %s2714_s1, %s1739_s24  ;;  %1858 = vmatpush3.msra.mxu0 %v323_v1  ;;  %297 = vst.msk [vmem:[#allocation2] sm:$0x1] %vm296_vm2, %v2203_v9  ;;  %298 = vst.msk [vmem:[#allocation2 + $0x8] sm:$0x1] %vm296_vm2, %v2203_v9  ;;  %1867 = vmatpush3.msra.mxu1 %v1642_v10  ;;  %v510_v15 = vld [vmem:[%s2717_s4 + $0x28] sm:$0xff]  ;;  %v1639_v16 = vld [vmem:[%s2717_s4 + $0xe0] sm:$0xff]  ;;  %s291_s16 = scalar_lea.vmem %s2719_s6, %s1739_s24 }
  0x34   : > { %v446_v4 = vld [vmem:[%s2339_s21] sm:$0xf]  ;;  %1859 = vmatprep.subr.mxu0 %v322_v2  ;;  %v447_v7 = vld [vmem:[%s2339_s21 + $0x4] sm:$0xf]  ;;  %v449_v8 = vld [vmem:[%s2339_s21 + $0xc] sm:$0xf]  ;;  %1868 = vmatprep.subr.mxu1 %v1641_v12 }
  0x35   : > { %462 = vrot.lane.b32.xlu1 %v446_v4, %s2202_s9  ;;  %1860 = vmatpush3.msra.mxu0 %v322_v2  ;;  %299 = vst.msk [vmem:[#allocation2 + $0x10] sm:$0x1] %vm296_vm2, %v2203_v9  ;;  %300 = vst.msk [vmem:[#allocation2 + $0x18] sm:$0x1] %vm296_vm2, %v2203_v9  ;;  %v509_v17 = vld [vmem:[%s2717_s4 + $0x20] sm:$0xff]  ;;  %vm437_vm3 = vcmask 257024  }
  0x36   : > { %1861 = vmatprep.subr.mxu0 %v321_v5  ;;  %301 = vst.msk [vmem:[#allocation2 + $0x20] sm:$0x1] %vm296_vm2, %v2203_v9  ;;  %302 = vst.msk [vmem:[#allocation2 + $0x28] sm:$0x1] %vm296_vm2, %v2203_v9  ;;  %1869 = vmatpush3.msra.mxu1 %v1641_v12  ;;  %v1632_v18 = vld [vmem:[%s2716_s3] ss:$0 sm:$0xff] }
  0x37   : > { %1862 = vmatpush3.msra.mxu0 %v321_v5  ;;  %303 = vst.msk [vmem:[#allocation2 + $0x30] sm:$0x1] %vm296_vm2, %v2203_v9  ;;  %304 = vst.msk [vmem:[#allocation2 + $0x38] sm:$0x1] %vm296_vm2, %v2203_v9  ;;  %1870 = vmatprep.subr.mxu1 %v1640_v14  ;;  %v1638_v20 = vld [vmem:[%s2717_s4 + $0xd8] sm:$0xff]  ;;  %v1637_v22 = vld [vmem:[%s2717_s4 + $0xd0] sm:$0xff] }
  0x38   : > { %1864 = vmatmul.mubr.msk.f32.vlgmr.msra.gmra.mxu0 %vm338_vm0, %v2109_v6  ;;  %305 = vst.msk [vmem:[#allocation2 + $0x40] sm:$0x1] %vm296_vm2, %v2203_v9  ;;  %307 = vst.msk [vmem:[#allocation2 + $0x5] sm:$0x1] %vm296_vm2, %v2203_v9  ;;  %1888 = vmatprep.subr.mxu0 %v512_v11  ;;  %v508_v21 = vld [vmem:[%s2717_s4 + $0x18] sm:$0xff]  ;;  %v507_v24 = vld [vmem:[%s2717_s4 + $0x10] sm:$0xff] }
  0x39   : > { %464 = vrot.lane.b32.xlu1 %v447_v7, %s2202_s9  ;;  %308 = vst.msk [vmem:[#allocation2 + $0xd] sm:$0x1] %vm296_vm2, %v2203_v9  ;;  %309 = vst.msk [vmem:[#allocation2 + $0x15] sm:$0x1] %vm296_vm2, %v2203_v9  ;;  %1889 = vmatpush3.msra.mxu0 %v512_v11  ;;  %vm486_vm4 = vcmask 519424   ;;  %v1636_v28 = vld [vmem:[%s2717_s4 + $0xc8] sm:$0xff] }
  0x3a   : > { %310 = vst.msk [vmem:[#allocation2 + $0x1d] sm:$0x1] %vm296_vm2, %v2203_v9  ;;  %311 = vst.msk [vmem:[#allocation2 + $0x25] sm:$0x1] %vm296_vm2, %v2203_v9  ;;  %1890 = vmatprep.subr.mxu0 %v511_v13  ;;  %1871 = vmatpush3.msra.mxu1 %v1640_v14  ;;  %v506_v29 = vld [vmem:[%s2717_s4 + $0x8] sm:$0xff]  ;;  %s2204_s7 = smov 96  }
  0x3b   : > { %312 = vst.msk [vmem:[#allocation2 + $0x2d] sm:$0x1] %vm296_vm2, %v2203_v9  ;;  %313 = vst.msk [vmem:[#allocation2 + $0x35] sm:$0x1] %vm296_vm2, %v2203_v9  ;;  %1891 = vmatpush3.msra.mxu0 %v511_v13  ;;  %1872 = vmatprep.subr.mxu1 %v1639_v16  ;;  %v451_v32 = vld [vmem:[%s2339_s21 + $0x14] sm:$0xf] }
  0x3c   : > { %314 = vst.msk [vmem:[#allocation2 + $0x3d] sm:$0x1] %vm296_vm2, %v2203_v9  ;;  %315 = vst.msk [vmem:[#allocation2 + $0x45] sm:$0x1] %vm296_vm2, %v2203_v9  ;;  %1892 = vmatprep.subr.mxu0 %v510_v15  ;;  %1873 = vmatpush3.msra.mxu1 %v1639_v16  ;;  %v1635_v33 = vld [vmem:[%s2717_s4 + $0xc0] sm:$0xff]  ;;  %v1658_v35 = vld [vmem:[%s2717_s4 + $0x1b8] sm:$0xff] }
  0x3d   : > { %468 = vrot.lane.b32.xlu1 %v449_v8, %s2202_s9  ;;  %306 = vst.msk [vmem:[#allocation2 + $0x48] sm:$0x1] %vm296_vm2, %v2203_v9  ;;  %316 = vst.msk [vmem:[#allocation2 + $0x4d] sm:$0x1] %vm296_vm2, %v2203_v9  ;;  %1893 = vmatpush3.msra.mxu0 %v510_v15  ;;  %v505_v34 = vld [vmem:[%s2717_s4] sm:$0xff]  ;;  %v1670_v36 = vld [vmem:[%s2717_s4 + $0x78] sm:$0xff] }
  0x3e   : > { %1894 = vmatprep.subr.mxu0 %v509_v17  ;;  %1874 = vmatprep.subr.mxu1 %v1638_v20  ;;  %v448_v37 = vld [vmem:[%s2339_s21 + $0x8] sm:$0xf]  ;;  %v453_v38 = vld [vmem:[%s2339_s21 + $0x1c] sm:$0xf]  ;;  %v495_v39 = vld [vmem:[#allocation2] sm:$0xf] }
  0x3f   : > { %1895 = vmatpush3.msra.mxu0 %v509_v17  ;;  %1875 = vmatpush3.msra.mxu1 %v1638_v20  ;;  %vm534_vm5 = vcmask 523264   ;;  %v450_v42 = vld [vmem:[%s2339_s21 + $0x10] sm:$0xf]  ;;  %v452_v43 = vld [vmem:[%s2339_s21 + $0x18] sm:$0xf]  ;;  %v1656_v63 = vld [vmem:[%s2717_s4 + $0x1a8] sm:$0xff] }
  0x40   : > { %1896 = vmatprep.subr.mxu0 %v508_v21  ;;  %1876 = vmatprep.subr.mxu1 %v1637_v22  ;;  %v1657_v60 = vld [vmem:[%s2717_s4 + $0x1b0] sm:$0xff]  ;;  %v1668_v0 = vld [vmem:[%s2717_s4 + $0x68] sm:$0xff]  ;;  %v1655_v1 = vld [vmem:[%s2717_s4 + $0x1a0] sm:$0xff] }
  0x41   : > { %1897 = vmatpush3.msra.mxu0 %v508_v21  ;;  %1877 = vmatpush3.msra.mxu1 %v1637_v22  ;;  %v1669_v61 = vld [vmem:[%s2717_s4 + $0x70] sm:$0xff]  ;;  %v1667_v2 = vld [vmem:[%s2717_s4 + $0x60] sm:$0xff]  ;;  %v1654_v4 = vld [vmem:[%s2717_s4 + $0x198] sm:$0xff] }
  0x42   : > { %1898 = vmatprep.subr.mxu0 %v507_v24  ;;  %1878 = vmatprep.subr.mxu1 %v1636_v28  ;;  %v1666_v5 = vld [vmem:[%s2717_s4 + $0x58] sm:$0xff]  ;;  %v1653_v10 = vld [vmem:[%s2717_s4 + $0x190] sm:$0xff]  ;;  %v1652_v13 = vld [vmem:[%s2717_s4 + $0x188] sm:$0xff] }
  0x43   : > { %1899 = vmatpush3.msra.mxu0 %v507_v24  ;;  %1879 = vmatpush3.msra.mxu1 %v1636_v28  ;;  %v1665_v11 = vld [vmem:[%s2717_s4 + $0x50] sm:$0xff]  ;;  %v1664_v14 = vld [vmem:[%s2717_s4 + $0x48] sm:$0xff]  ;;  %v828_v17 = vld [vmem:[#allocation2 + $0x1] sm:$0xf] }
  0x44   : > { %1900 = vmatprep.subr.mxu0 %v506_v29  ;;  %1880 = vmatprep.subr.mxu1 %v1635_v33  ;;  %v1663_v20 = vld [vmem:[%s2717_s4 + $0x40] sm:$0xff]  ;;  %v1694_v24 = vld [vmem:[%s2717_s4 + $0x1f8] sm:$0xff] }
  0x45   : > { %1901 = vmatpush3.msra.mxu0 %v506_v29  ;;  %1881 = vmatpush3.msra.mxu1 %v1635_v33 }
  0x46   : > { %1902 = vmatprep.subr.mxu0 %v505_v34  ;;  %1910 = vmatprep.subr.mxu1 %v1658_v35 }
  0x47   : > { %1903 = vmatpush3.msra.mxu0 %v505_v34  ;;  %v1680_v34 = vld [vmem:[%s2717_s4 + $0x128] sm:$0xff] }
  0x48   : > { %1932 = vmatprep.subr.mxu0 %v1670_v36 }
  0xa7   : > { %v463_v31 = vpop.permute.xlu1 %462 }
  0xab   : > { %v465_v44 = vpop.permute.xlu1 %464 }
  0xaf   : > { %v469_v45 = vpop.permute.xlu1 %468 }
  0xf8   : > { %v1865_v19 = vpop.f32.mrf.mxu0 }
  0xf9   : > { %v415_v23 = vadd.f32 %v1865_v19, %v1632_v18  ;;  %v1651_v19 = vld [vmem:[%s2717_s4 + $0x180] sm:$0xff] }
  0xfa   : > { %v409_v25 = vpop.f32.mrf.mxu0 }
  0xfb   : > { %442 = vst.msk [vmem:[#allocation2 + $0x29] sm:$0xf] %vm437_vm3, %v415_v23  ;;  %v410_v26 = vadd.f32 %v1632_v18, %v409_v25  ;;  %v421_v27 = vcombine.high %v415_v23, %v415_v23 }
  0xfd   : > { %438 = vst.msk [vmem:[#allocation2 + $0x9] sm:$0xf] %vm437_vm3, %v410_v26  ;;  %430 = vrot.lane.b32.xlu1 %v421_v27, %s2204_s7  ;;  %444 = vst.msk [vmem:[#allocation2 + $0x39] sm:$0xf] %vm437_vm3, %v421_v27  ;;  %424 = vrot.lane.b32.xlu0 %v410_v26, %s2204_s7  ;;  %v420_v30 = vcombine.high %v410_v26, %v410_v26 }
  0xfe   : > { %487 = vst.msk [vmem:[#allocation2 + $0x9] sm:$0xf] %vm486_vm4, %v463_v31  ;;  %v1693_v31 = vld [vmem:[%s2717_s4 + $0x1f0] sm:$0xff] }
  0xff   : > { %440 = vst.msk [vmem:[#allocation2 + $0x19] sm:$0xf] %vm437_vm3, %v420_v30 }
 0x101   : > { %426 = vrot.lane.b32.xlu0 %v420_v30, %s2204_s7  ;;  %472 = vrot.lane.b32.xlu1 %v451_v32, %s2202_s9  ;;  %v1681_v30 = vld [vmem:[%s2717_s4 + $0x130] sm:$0xff]  ;;  %v504_v32 = vld [vmem:[#allocation2 + $0x48] sm:$0xf] }
 0x105   : > { %466 = vrot.lane.b32.xlu0 %v448_v37, %s2202_s9  ;;  %476 = vrot.lane.b32.xlu1 %v453_v38, %s2202_s9  ;;  %v496_v40 = vld [vmem:[#allocation2 + $0x8] sm:$0xf] }
 0x106   : > { %v629_v41 = vcombine.low %v495_v39, %v496_v40  ;;  %v829_v18 = vld [vmem:[#allocation2 + $0x9] sm:$0xf]  ;;  %v1679_v39 = vld [vmem:[%s2717_s4 + $0x120] sm:$0xff] }
 0x107   : > { %v855_v21 = vcombine.low %v828_v17, %v829_v18 }
 0x108   : > { %1904 = vmatprep.mubr.msk.f32.mxu0 %vm534_vm5, %v629_v41  ;;  %v1691_v41 = vld [vmem:[%s2717_s4 + $0x1e0] sm:$0xff] }
 0x109   : > { %428 = vrot.lane.b32.xlu0 %v415_v23, %s2204_s7  ;;  %v1682_v23 = vld [vmem:[%s2717_s4 + $0x138] sm:$0xff] }
 0x10d   : > { %470 = vrot.lane.b32.xlu0 %v450_v42, %s2202_s9  ;;  %v1678_v42 = vld [vmem:[%s2717_s4 + $0x118] sm:$0xff] }
 0x111   : > { %474 = vrot.lane.b32.xlu0 %v452_v43, %s2202_s9  ;;  %v1690_v43 = vld [vmem:[%s2717_s4 + $0x1d8] sm:$0xff] }
 0x16f   : > { %v431_v46 = vpop.permute.xlu1 %430  ;;  %v425_v47 = vpop.permute.xlu0 %424 }
 0x170   : > { %445 = vst.msk [vmem:[#allocation2 + $0x41] sm:$0xf] %vm437_vm3, %v431_v46  ;;  %439 = vst.msk [vmem:[#allocation2 + $0x11] sm:$0xf] %vm437_vm3, %v425_v47  ;;  %v1676_v46 = vld [vmem:[%s2717_s4 + $0x108] sm:$0xff] }
 0x171   : > { %488 = vst.msk [vmem:[#allocation2 + $0x11] sm:$0xf] %vm486_vm4, %v465_v44  ;;  %v1677_v44 = vld [vmem:[%s2717_s4 + $0x110] sm:$0xff]  ;;  %v1688_v47 = vld [vmem:[%s2717_s4 + $0x1c8] sm:$0xff] }
 0x173   : > { %v427_v48 = vpop.permute.xlu0 %426  ;;  %v473_v49 = vpop.permute.xlu1 %472 }
 0x174   : > { %441 = vst.msk [vmem:[#allocation2 + $0x21] sm:$0xf] %vm437_vm3, %v427_v48  ;;  %v1675_v48 = vld [vmem:[%s2717_s4 + $0x100] sm:$0xff] }
 0x175   : > { %490 = vst.msk [vmem:[#allocation2 + $0x21] sm:$0xf] %vm486_vm4, %v469_v45  ;;  %v1689_v45 = vld [vmem:[%s2717_s4 + $0x1d0] sm:$0xff] }
 0x177   : > { %v467_v50 = vpop.permute.xlu0 %466  ;;  %v477_v51 = vpop.permute.xlu1 %476 }
 0x178   : > { %489 = vst.msk [vmem:[#allocation2 + $0x19] sm:$0xf] %vm486_vm4, %v467_v50  ;;  %v497_v52 = vld [vmem:[#allocation2 + $0x10] sm:$0xf]  ;;  %494 = vst.msk [vmem:[#allocation2 + $0x41] sm:$0xf] %vm486_vm4, %v477_v51 }
 0x179   : > { %v530_v53 = vcombine.low %v496_v40, %v497_v52  ;;  %v830_v25 = vld [vmem:[#allocation2 + $0x11] sm:$0xf]  ;;  %v1706_v51 = vld [vmem:[%s2717_s4 + $0xb8] sm:$0xff] }
 0x17a   : > { %v966_v40 = vcombine.low %v829_v18, %v830_v25 }
 0x17b   : > { %v429_v54 = vpop.permute.xlu0 %428  ;;  %1882 = vmatprep.mubr.msk.f32.mxu1 %vm534_vm5, %v530_v53 }
 0x17c   : > { %443 = vst.msk [vmem:[#allocation2 + $0x31] sm:$0xf] %vm437_vm3, %v429_v54  ;;  %v499_v55 = vld [vmem:[#allocation2 + $0x20] sm:$0xf]  ;;  %v837_v54 = vld [vmem:[#allocation2 + $0x49] sm:$0xf] }
 0x17d   : > { %492 = vst.msk [vmem:[#allocation2 + $0x31] sm:$0xf] %vm486_vm4, %v473_v49  ;;  %v2532_v28 = vld [vmem:[#allocation2 + $0x21] sm:$0xf] }
 0x17e   : > { %v1687_v49 = vld [vmem:[%s2717_s4 + $0x1c0] sm:$0xff] }
 0x17f   : > { %v498_v56 = vld [vmem:[#allocation2 + $0x18] sm:$0xf]  ;;  %v471_v57 = vpop.permute.xlu0 %470  ;;  %v2493_v9 = vld [vmem:[#allocation2 + $0x40] sm:$0xf] }
 0x180   : > { %v531_v58 = vcombine.low %v498_v56, %v499_v55  ;;  %v2462_v59 = vcombine.low %v497_v52, %v498_v56  ;;  %491 = vst.msk [vmem:[#allocation2 + $0x29] sm:$0xf] %vm486_vm4, %v471_v57  ;;  %v2518_v22 = vld [vmem:[#allocation2 + $0x19] sm:$0xf]  ;;  %v736_v37 = vcombine.low %v2493_v9, %v504_v32  ;;  %v1717_v56 = vld [vmem:[%s2717_s4 + $0x170] sm:$0xff]  ;;  %v1723_v32 = vld [vmem:[%s2717_s4 + $0x200] sm:$0xff] }
 0x181   : > { %v856_v27 = vcombine.low %v830_v25, %v2518_v22  ;;  %v967_v50 = vcombine.low %v2518_v22, %v2532_v28  ;;  %v1718_v52 = vld [vmem:[%s2717_s4 + $0x178] sm:$0xff]  ;;  %v836_v57 = vld [vmem:[#allocation2 + $0x41] sm:$0xf] }
 0x182   : > { %1883 = vmatmul.mubr.msk.f32.vlgmr.msra.gmra.mxu1 %vm534_vm5, %v531_v58  ;;  %1905 = vmatmul.mubr.msk.f32.vlgmr.msra.gmra.mxu0 %vm534_vm5, %v2462_v59  ;;  %v1169_v58 = vld [vmem:[#allocation2 + $0x2] sm:$0xf] }
 0x183   : > { %1911 = vmatpush3.msra.mxu1 %v1658_v35  ;;  %1933 = vmatpush3.msra.mxu0 %v1670_v36  ;;  %v475_v62 = vpop.permute.xlu0 %474  ;;  %v1692_v35 = vld [vmem:[%s2717_s4 + $0x1e8] sm:$0xff]  ;;  %v1177_v22 = vld [vmem:[#allocation2 + $0x42] sm:$0xf] }
 0x184   : > { %493 = vst.msk [vmem:[#allocation2 + $0x39] sm:$0xf] %vm486_vm4, %v475_v62  ;;  %1912 = vmatprep.subr.mxu1 %v1657_v60  ;;  %1934 = vmatprep.subr.mxu0 %v1669_v61  ;;  %v501_v3 = vld [vmem:[#allocation2 + $0x30] sm:$0xf]  ;;  %v1704_v62 = vld [vmem:[%s2717_s4 + $0xa8] sm:$0xff] }
 0x185   : > { %1913 = vmatpush3.msra.mxu1 %v1657_v60  ;;  %1935 = vmatpush3.msra.mxu0 %v1669_v61  ;;  %v834_v36 = vld [vmem:[#allocation2 + $0x31] sm:$0xf]  ;;  %v1077_v61 = vcombine.low %v836_v57, %v837_v54 }
 0x186   : > { %1914 = vmatprep.subr.mxu1 %v1656_v63  ;;  %1936 = vmatprep.subr.mxu0 %v1668_v0 }
 0x187   : > { %1915 = vmatpush3.msra.mxu1 %v1656_v63  ;;  %1937 = vmatpush3.msra.mxu0 %v1668_v0  ;;  %v500_v6 = vld [vmem:[#allocation2 + $0x28] sm:$0xf]  ;;  %v1171_v0 = vld [vmem:[#allocation2 + $0x12] sm:$0xf] }
 0x188   : > { %1916 = vmatprep.subr.mxu1 %v1655_v1  ;;  %1938 = vmatprep.subr.mxu0 %v1667_v2  ;;  %v532_v7 = vcombine.low %v500_v6, %v501_v3  ;;  %v631_v8 = vcombine.low %v499_v55, %v500_v6  ;;  %v2529_v26 = vld [vmem:[#allocation2 + $0x29] sm:$0xf]  ;;  %v1705_v55 = vld [vmem:[%s2717_s4 + $0xb0] sm:$0xff]  ;;  %v1714_v6 = vld [vmem:[%s2717_s4 + $0x158] sm:$0xff] }
 0x189   : > { %1917 = vmatpush3.msra.mxu1 %v1655_v1  ;;  %1939 = vmatpush3.msra.mxu0 %v1667_v2  ;;  %v857_v29 = vcombine.low %v2532_v28, %v2529_v26  ;;  %v968_v53 = vcombine.low %v2529_v26, %v834_v36  ;;  %v1716_v63 = vld [vmem:[%s2717_s4 + $0x168] sm:$0xff]  ;;  %v1727_v28 = vld [vmem:[%s2717_s4 + $0x220] sm:$0xff] }
 0x18a   : > { %1918 = vmatprep.subr.mxu1 %v1654_v4  ;;  %1940 = vmatprep.subr.mxu0 %v1666_v5  ;;  %v1728_v26 = vld [vmem:[%s2717_s4 + $0x228] sm:$0xff] }
 0x18b   : > { %1885 = vmatprep.mubr.msk.f32.mxu1 %vm534_vm5, %v532_v7  ;;  %1907 = vmatprep.mubr.msk.f32.mxu0 %vm534_vm5, %v631_v8  ;;  %v502_v12 = vld [vmem:[#allocation2 + $0x38] sm:$0xf]  ;;  %v1701_v7 = vld [vmem:[%s2717_s4 + $0x90] sm:$0xff] }
 0x18c   : > { %1919 = vmatpush3.msra.mxu1 %v1654_v4  ;;  %1941 = vmatpush3.msra.mxu0 %v1666_v5  ;;  %v533_v15 = vcombine.low %v502_v12, %v2493_v9  ;;  %v632_v16 = vcombine.low %v501_v3, %v502_v12  ;;  %v2544_v33 = vld [vmem:[#allocation2 + $0x39] sm:$0xf]  ;;  %v1703_v3 = vld [vmem:[%s2717_s4 + $0xa0] sm:$0xff]  ;;  %v1700_v9 = vld [vmem:[%s2717_s4 + $0x88] sm:$0xff] }
 0x18d   : > { %1920 = vmatprep.subr.mxu1 %v1653_v10  ;;  %1942 = vmatprep.subr.mxu0 %v1665_v11  ;;  %v858_v38 = vcombine.low %v834_v36, %v2544_v33  ;;  %v969_v60 = vcombine.low %v2544_v33, %v836_v57  ;;  %v1715_v4 = vld [vmem:[%s2717_s4 + $0x160] sm:$0xff]  ;;  %v1702_v5 = vld [vmem:[%s2717_s4 + $0x98] sm:$0xff]  ;;  %v1178_v33 = vld [vmem:[#allocation2 + $0x4a] sm:$0xf] }
 0x18e   : > { %1921 = vmatpush3.msra.mxu1 %v1653_v10  ;;  %1943 = vmatpush3.msra.mxu0 %v1665_v11  ;;  %v1712_v10 = vld [vmem:[%s2717_s4 + $0x148] sm:$0xff]  ;;  %v1699_v11 = vld [vmem:[%s2717_s4 + $0x80] sm:$0xff]  ;;  %v1172_v12 = vld [vmem:[#allocation2 + $0x1a] sm:$0xf] }
 0x18f   : > { %1922 = vmatprep.subr.mxu1 %v1652_v13  ;;  %1944 = vmatprep.subr.mxu0 %v1664_v14  ;;  %v1197_v17 = vcombine.low %v1171_v0, %v1172_v12 }
 0x190   : > { %1886 = vmatmul.mubr.msk.f32.gmra.mxu1 %vm534_vm5, %v533_v15  ;;  %1908 = vmatmul.mubr.msk.f32.gmra.mxu0 %vm534_vm5, %v632_v16  ;;  %v1174_v15 = vld [vmem:[#allocation2 + $0x2a] sm:$0xf] }
 0x191   : > { %1923 = vmatpush3.msra.mxu1 %v1652_v13  ;;  %1945 = vmatpush3.msra.mxu0 %v1664_v14  ;;  %v1173_v13 = vld [vmem:[#allocation2 + $0x22] sm:$0xf] }
 0x192   : > { %1924 = vmatprep.subr.mxu1 %v1651_v19  ;;  %1926 = vmatprep.mubr.msk.f32.mxu1 %vm534_vm5, %v2462_v59  ;;  %v1170_v59 = vld [vmem:[#allocation2 + $0xa] sm:$0xf]  ;;  %v1711_v14 = vld [vmem:[%s2717_s4 + $0x140] sm:$0xff]  ;;  %v1308_v18 = vcombine.low %v1172_v12, %v1173_v13 }
 0x193   : > { %1946 = vmatprep.subr.mxu0 %v1663_v20  ;;  %1948 = vmatprep.mubr.msk.f32.mxu0 %vm534_vm5, %v855_v21  ;;  %v1196_v1 = vcombine.low %v1169_v58, %v1170_v59  ;;  %v1307_v2 = vcombine.low %v1170_v59, %v1171_v0  ;;  %v1176_v21 = vld [vmem:[#allocation2 + $0x3a] sm:$0xf] }
 0x194   : > { %1925 = vmatpush3.msra.mxu1 %v1651_v19  ;;  %1947 = vmatpush3.msra.mxu0 %v1663_v20  ;;  %v1730_v19 = vld [vmem:[%s2717_s4 + $0x238] sm:$0xff]  ;;  %v1198_v20 = vcombine.low %v1173_v13, %v1174_v15  ;;  %v1310_v25 = vcombine.low %v1176_v21, %v1177_v22 }
 0x195   : > { %1954 = vmatprep.subr.mxu1 %v1682_v23  ;;  %1976 = vmatprep.subr.mxu0 %v1694_v24 }
 0x196   : > { %1927 = vmatmul.mubr.msk.f32.vlgmr.msra.gmra.mxu1 %vm534_vm5, %v631_v8  ;;  %1949 = vmatmul.mubr.msk.f32.vlgmr.msra.gmra.mxu0 %vm534_vm5, %v856_v27  ;;  %v1713_v8 = vld [vmem:[%s2717_s4 + $0x150] sm:$0xff] }
 0x197   : > { %1955 = vmatpush3.msra.mxu1 %v1682_v23  ;;  %1977 = vmatpush3.msra.mxu0 %v1694_v24  ;;  %v1729_v24 = vld [vmem:[%s2717_s4 + $0x230] sm:$0xff] }
 0x198   : > { %1929 = vmatprep.mubr.msk.f32.mxu1 %vm534_vm5, %v632_v16  ;;  %1951 = vmatprep.mubr.msk.f32.mxu0 %vm534_vm5, %v857_v29  ;;  %v1175_v16 = vld [vmem:[#allocation2 + $0x32] sm:$0xf] }
 0x199   : > { %1956 = vmatprep.subr.mxu1 %v1681_v30  ;;  %1978 = vmatprep.subr.mxu0 %v1693_v31  ;;  %v1309_v23 = vcombine.low %v1174_v15, %v1175_v16 }
 0x19a   : > { %1957 = vmatpush3.msra.mxu1 %v1681_v30  ;;  %1979 = vmatpush3.msra.mxu0 %v1693_v31  ;;  %v1725_v30 = vld [vmem:[%s2717_s4 + $0x210] sm:$0xff]  ;;  %v1724_v31 = vld [vmem:[%s2717_s4 + $0x208] sm:$0xff] }
 0x19b   : > { %1958 = vmatprep.subr.mxu1 %v1680_v34  ;;  %1980 = vmatprep.subr.mxu0 %v1692_v35 }
 0x19c   : > { %1930 = vmatmul.mubr.msk.f32.gmra.mxu1 %vm534_vm5, %v736_v37  ;;  %1952 = vmatmul.mubr.msk.f32.gmra.mxu0 %vm534_vm5, %v858_v38 }
 0x19d   : > { %1959 = vmatpush3.msra.mxu1 %v1680_v34  ;;  %1981 = vmatpush3.msra.mxu0 %v1692_v35  ;;  %v1418_v34 = vcombine.low %v1177_v22, %v1178_v33 }
 0x19e   : > { %1960 = vmatprep.subr.mxu1 %v1679_v39  ;;  %1970 = vmatprep.mubr.msk.f32.mxu1 %vm534_vm5, %v966_v40 }
 0x19f   : > { %1982 = vmatprep.subr.mxu0 %v1691_v41  ;;  %1992 = vmatprep.mubr.msk.f32.mxu0 %vm534_vm5, %v856_v27  ;;  %v1199_v27 = vcombine.low %v1175_v16, %v1176_v21 }
 0x1a0   : > { %1961 = vmatpush3.msra.mxu1 %v1679_v39  ;;  %1983 = vmatpush3.msra.mxu0 %v1691_v41 }
 0x1a1   : > { %1962 = vmatprep.subr.mxu1 %v1678_v42  ;;  %1984 = vmatprep.subr.mxu0 %v1690_v43 }
 0x1a2   : > { %1963 = vmatpush3.msra.mxu1 %v1678_v42  ;;  %1985 = vmatpush3.msra.mxu0 %v1690_v43 }
 0x1a3   : > { %1964 = vmatprep.subr.mxu1 %v1677_v44  ;;  %1986 = vmatprep.subr.mxu0 %v1689_v45 }
 0x1a4   : > { %1965 = vmatpush3.msra.mxu1 %v1677_v44  ;;  %1987 = vmatpush3.msra.mxu0 %v1689_v45 }
 0x1a5   : > { %1966 = vmatprep.subr.mxu1 %v1676_v46  ;;  %1988 = vmatprep.subr.mxu0 %v1688_v47 }
 0x1a6   : > { %1967 = vmatpush3.msra.mxu1 %v1676_v46  ;;  %1989 = vmatpush3.msra.mxu0 %v1688_v47 }
 0x1a7   : > { %1968 = vmatprep.subr.mxu1 %v1675_v48  ;;  %1990 = vmatprep.subr.mxu0 %v1687_v49 }
 0x1a8   : > { %1969 = vmatpush3.msra.mxu1 %v1675_v48  ;;  %1991 = vmatpush3.msra.mxu0 %v1687_v49 }
 0x1a9   : > { %1971 = vmatmul.mubr.msk.f32.vlgmr.msra.gmra.mxu1 %vm534_vm5, %v967_v50  ;;  %1993 = vmatmul.mubr.msk.f32.vlgmr.msra.gmra.mxu0 %vm534_vm5, %v857_v29  ;;  %v1726_v29 = vld [vmem:[%s2717_s4 + $0x218] sm:$0xff] }
 0x1aa   : > { %1998 = vmatprep.subr.mxu1 %v1706_v51  ;;  %2020 = vmatprep.subr.mxu0 %v1718_v52 }
 0x1ab   : > { %1973 = vmatprep.mubr.msk.f32.mxu1 %vm534_vm5, %v968_v53  ;;  %1995 = vmatprep.mubr.msk.f32.mxu0 %vm534_vm5, %v858_v38 }
 0x1ac   : > { %1999 = vmatpush3.msra.mxu1 %v1706_v51  ;;  %2021 = vmatpush3.msra.mxu0 %v1718_v52 }
 0x1ad   : > { %2000 = vmatprep.subr.mxu1 %v1705_v55  ;;  %2022 = vmatprep.subr.mxu0 %v1717_v56 }
 0x1ae   : > { %2001 = vmatpush3.msra.mxu1 %v1705_v55  ;;  %2023 = vmatpush3.msra.mxu0 %v1717_v56 }
 0x1af   : > { %1974 = vmatmul.mubr.msk.f32.gmra.mxu1 %vm534_vm5, %v969_v60  ;;  %1996 = vmatmul.mubr.msk.f32.gmra.mxu0 %vm534_vm5, %v1077_v61 }
 0x1b0   : > { %2002 = vmatprep.subr.mxu1 %v1704_v62  ;;  %2024 = vmatprep.subr.mxu0 %v1716_v63 }
 0x1b1   : > { %2003 = vmatpush3.msra.mxu1 %v1704_v62  ;;  %2014 = vmatprep.mubr.msk.f32.mxu1 %vm534_vm5, %v1196_v1 }
 0x1b2   : > { %2025 = vmatpush3.msra.mxu0 %v1716_v63  ;;  %2036 = vmatprep.mubr.msk.f32.mxu0 %vm534_vm5, %v1307_v2 }
 0x1b3   : > { %2004 = vmatprep.subr.mxu1 %v1703_v3  ;;  %2026 = vmatprep.subr.mxu0 %v1715_v4 }
 0x1b4   : > { %2005 = vmatpush3.msra.mxu1 %v1703_v3  ;;  %2027 = vmatpush3.msra.mxu0 %v1715_v4 }
 0x1b5   : > { %2006 = vmatprep.subr.mxu1 %v1702_v5  ;;  %2028 = vmatprep.subr.mxu0 %v1714_v6 }
 0x1b6   : > { %2007 = vmatpush3.msra.mxu1 %v1702_v5  ;;  %2029 = vmatpush3.msra.mxu0 %v1714_v6 }
 0x1b7   : > { %2008 = vmatprep.subr.mxu1 %v1701_v7  ;;  %2030 = vmatprep.subr.mxu0 %v1713_v8 }
 0x1b8   : > { %2009 = vmatpush3.msra.mxu1 %v1701_v7  ;;  %2031 = vmatpush3.msra.mxu0 %v1713_v8 }
 0x1b9   : > { %2010 = vmatprep.subr.mxu1 %v1700_v9  ;;  %2032 = vmatprep.subr.mxu0 %v1712_v10 }
 0x1ba   : > { %2011 = vmatpush3.msra.mxu1 %v1700_v9  ;;  %2033 = vmatpush3.msra.mxu0 %v1712_v10 }
 0x1bb   : > { %2012 = vmatprep.subr.mxu1 %v1699_v11  ;;  %2034 = vmatprep.subr.mxu0 %v1711_v14 }
 0x1bc   : > { %2013 = vmatpush3.msra.mxu1 %v1699_v11  ;;  %2035 = vmatpush3.msra.mxu0 %v1711_v14 }
 0x1bd   : > { %2015 = vmatmul.mubr.msk.f32.vlgmr.msra.gmra.mxu1 %vm534_vm5, %v1197_v17  ;;  %2037 = vmatmul.mubr.msk.f32.vlgmr.msra.gmra.mxu0 %vm534_vm5, %v1308_v18 }
 0x1be   : > { %2042 = vmatprep.subr.mxu1 %v1730_v19  ;;  %2017 = vmatprep.mubr.msk.f32.mxu1 %vm534_vm5, %v1198_v20 }
 0x1bf   : > { %2039 = vmatprep.mubr.msk.f32.mxu0 %vm534_vm5, %v1309_v23  ;;  %2043 = vmatpush3.msra.mxu1 %v1730_v19 }
 0x1c0   : > { %2044 = vmatprep.subr.mxu1 %v1729_v24 }
 0x1c1   : > { %2045 = vmatpush3.msra.mxu1 %v1729_v24  ;;  %2040 = vmatmul.mubr.msk.f32.gmra.mxu0 %vm534_vm5, %v1310_v25 }
 0x1c2   : > { %2018 = vmatmul.mubr.msk.f32.gmra.mxu1 %vm534_vm5, %v1199_v27  ;;  %2046 = vmatprep.subr.mxu1 %v1728_v26 }
 0x1c3   : > { %2047 = vmatpush3.msra.mxu1 %v1728_v26  ;;  %2058 = vmatprep.mubr.msk.f32.mxu1 %vm534_vm5, %v1197_v17 }
 0x1c4   : > { %2048 = vmatprep.subr.mxu1 %v1727_v28 }
 0x1c5   : > { %2049 = vmatpush3.msra.mxu1 %v1727_v28 }
 0x1c6   : > { %2050 = vmatprep.subr.mxu1 %v1726_v29 }
 0x1c7   : > { %2051 = vmatpush3.msra.mxu1 %v1726_v29 }
 0x1c8   : > { %2052 = vmatprep.subr.mxu1 %v1725_v30 }
 0x1c9   : > { %2053 = vmatpush3.msra.mxu1 %v1725_v30 }
 0x1ca   : > { %2054 = vmatprep.subr.mxu1 %v1724_v31 }
 0x1cb   : > { %2055 = vmatpush3.msra.mxu1 %v1724_v31 }
 0x1cc   : > { %2056 = vmatprep.subr.mxu1 %v1723_v32 }
 0x1cd   : > { %2057 = vmatpush3.msra.mxu1 %v1723_v32 }
 0x1ce   : > { %2059 = vmatmul.mubr.msk.f32.vlgmr.msra.gmra.mxu1 %vm534_vm5, %v1198_v20 }
 0x1cf   : > { %2061 = vmatprep.mubr.msk.f32.mxu1 %vm534_vm5, %v1199_v27  ;;  %v1735_v27 = vld [vmem:[%s2718_s5] ss:$0 sm:$0xff] }
 0x1d2   : > { %2062 = vmatmul.mubr.msk.f32.gmra.mxu1 %vm534_vm5, %v1418_v34 }
 0x242   : > { %v1884_v35 = vpop.f32.mrf.mxu1  ;;  %v1906_v37 = vpop.f32.mrf.mxu0 }
 0x243   : > { %v713_v55 = vadd.f32 %v1906_v37, %v1884_v35 }
 0x244   : > { %v609_v36 = vpop.f32.mrf.mxu1  ;;  %v707_v39 = vpop.f32.mrf.mxu0 }
 0x245   : > { %v708_v57 = vadd.f32 %v707_v39, %v609_v36 }
 0x250   : > { %v1887_v38 = vpop.f32.mrf.mxu1  ;;  %v1909_v41 = vpop.f32.mrf.mxu0 }
 0x251   : > { %v723_v60 = vadd.f32 %v1909_v41, %v1887_v38 }
 0x252   : > { %v619_v40 = vpop.f32.mrf.mxu1  ;;  %v717_v43 = vpop.f32.mrf.mxu0 }
 0x253   : > { %v718_v0 = vadd.f32 %v717_v43, %v619_v40 }
 0x256   : > { %v1928_v42 = vpop.f32.mrf.mxu1  ;;  %v1950_v45 = vpop.f32.mrf.mxu0 }
 0x257   : > { %v825_v58 = vadd.f32 %v1928_v42, %v713_v55 }
 0x258   : > { %v805_v44 = vpop.f32.mrf.mxu1  ;;  %v933_v47 = vpop.f32.mrf.mxu0 }
 0x259   : > { %v824_v61 = vadd.f32 %v805_v44, %v708_v57  ;;  %v953_v1 = vadd.f32 %v1950_v45, %v825_v58 }
 0x25b   : > { %v952_v3 = vadd.f32 %v933_v47, %v824_v61 }
 0x25c   : > { %v1931_v46 = vpop.f32.mrf.mxu1  ;;  %v1953_v49 = vpop.f32.mrf.mxu0 }
 0x25d   : > { %v827_v2 = vadd.f32 %v1931_v46, %v723_v60 }
 0x25e   : > { %v815_v48 = vpop.f32.mrf.mxu1  ;;  %v943_v51 = vpop.f32.mrf.mxu0 }
 0x25f   : > { %v826_v4 = vadd.f32 %v815_v48, %v718_v0  ;;  %v955_v8 = vadd.f32 %v1953_v49, %v827_v2 }
 0x261   : > { %v954_v11 = vadd.f32 %v943_v51, %v826_v4 }
 0x269   : > { %v1972_v50 = vpop.f32.mrf.mxu1  ;;  %v1994_v53 = vpop.f32.mrf.mxu0 }
 0x26a   : > { %v1064_v5 = vadd.f32 %v1972_v50, %v953_v1 }
 0x26b   : > { %v1044_v52 = vpop.f32.mrf.mxu1  ;;  %v1146_v56 = vpop.f32.mrf.mxu0 }
 0x26c   : > { %v1063_v9 = vadd.f32 %v1044_v52, %v952_v3  ;;  %v1166_v12 = vadd.f32 %v1994_v53, %v1064_v5 }
 0x26e   : > { %v1165_v15 = vadd.f32 %v1146_v56, %v1063_v9 }
 0x26f   : > { %v1975_v54 = vpop.f32.mrf.mxu1  ;;  %v1997_v62 = vpop.f32.mrf.mxu0 }
 0x270   : > { %v1066_v13 = vadd.f32 %v1975_v54, %v955_v8 }
 0x271   : > { %v1054_v59 = vpop.f32.mrf.mxu1  ;;  %v1156_v6 = vpop.f32.mrf.mxu0 }
 0x272   : > { %v1065_v16 = vadd.f32 %v1054_v59, %v954_v11  ;;  %v1168_v19 = vadd.f32 %v1997_v62, %v1066_v13 }
 0x274   : > { %v1167_v22 = vadd.f32 %v1156_v6, %v1065_v16 }
 0x27d   : > { %v2016_v63 = vpop.f32.mrf.mxu1  ;;  %v2038_v10 = vpop.f32.mrf.mxu0 }
 0x27e   : > { %v1294_v17 = vadd.f32 %v2016_v63, %v1166_v12 }
 0x27f   : > { %v1274_v7 = vpop.f32.mrf.mxu1  ;;  %v1385_v18 = vpop.f32.mrf.mxu0 }
 0x280   : > { %v1293_v20 = vadd.f32 %v1274_v7, %v1165_v15  ;;  %v1405_v23 = vadd.f32 %v2038_v10, %v1294_v17 }
 0x281   : > { %v2041_v25 = vpop.f32.mrf.mxu0 }
 0x282   : > { %v2019_v14 = vpop.f32.mrf.mxu1  ;;  %v1404_v28 = vadd.f32 %v1385_v18, %v1293_v20 }
 0x283   : > { %v1296_v24 = vadd.f32 %v2019_v14, %v1168_v19  ;;  %v1395_v35 = vpop.f32.mrf.mxu0 }
 0x284   : > { %v1284_v21 = vpop.f32.mrf.mxu1 }
 0x285   : > { %v1295_v29 = vadd.f32 %v1284_v21, %v1167_v22  ;;  %v1407_v32 = vadd.f32 %v2041_v25, %v1296_v24 }
 0x287   : > { %v1406_v37 = vadd.f32 %v1395_v35, %v1295_v29 }
 0x28e   : > { %v2060_v26 = vpop.f32.mrf.mxu1 }
 0x28f   : > { %v1507_v30 = vadd.f32 %v2060_v26, %v1405_v23 }
 0x290   : > { %v1487_v31 = vpop.f32.mrf.mxu1 }
 0x291   : > { %v1518_v33 = vadd.f32 %v1735_v27, %v1507_v30  ;;  %v1506_v34 = vadd.f32 %v1487_v31, %v1404_v28 }
 0x292   : > { %v2063_v36 = vpop.f32.mrf.mxu1 }
 0x293   : > { %v1526_v38 = vcombine.high %v1518_v33, %v1518_v33  ;;  %1535 = vst.msk [vmem:[%s291_s16 + $0x8] sm:$0xf] %vm437_vm3, %v1518_v33  ;;  %v1517_v39 = vadd.f32 %v1735_v27, %v1506_v34  ;;  %v1509_v40 = vadd.f32 %v2063_v36, %v1407_v32 }
 0x294   : > { %v1497_v41 = vpop.f32.mrf.mxu1 }
 0x295   : > { %1536 = vst.msk [vmem:[%s291_s16 + $0xc] sm:$0xf] %vm437_vm3, %v1526_v38  ;;  %v1525_v42 = vcombine.high %v1517_v39, %v1517_v39  ;;  %1533 = vst.msk [vmem:[%s291_s16] sm:$0xf] %vm437_vm3, %v1517_v39  ;;  %v1520_v43 = vadd.f32 %v1735_v27, %v1509_v40  ;;  %v1508_v44 = vadd.f32 %v1497_v41, %v1406_v37 }
 0x297   : > { %1534 = vst.msk [vmem:[%s291_s16 + $0x4] sm:$0xf] %vm437_vm3, %v1525_v42  ;;  %v1528_v45 = vcombine.high %v1520_v43, %v1520_v43  ;;  %1539 = vst.msk [vmem:[%s291_s16 + $0x18] sm:$0xf] %vm437_vm3, %v1520_v43  ;;  %v1519_v46 = vadd.f32 %v1735_v27, %v1508_v44 }
 0x299   : > { %1540 = vst.msk [vmem:[%s291_s16 + $0x1c] sm:$0xf] %vm437_vm3, %v1528_v45  ;;  %v1527_v47 = vcombine.high %v1519_v46, %v1519_v46  ;;  %1537 = vst.msk [vmem:[%s291_s16 + $0x10] sm:$0xf] %vm437_vm3, %v1519_v46 }
 0x29b   : > { %1538 = vst.msk [vmem:[%s291_s16 + $0x14] sm:$0xf] %vm437_vm3, %v1527_v47 }
 0x29c PF: > { %p16_p8 = scmp.ge.s32.totalorder %s2262_s26, 4   ;;  %s2725_s21 = smov %s2189_s22 }
 0x29d   : > { %s2726_s22 = smov %s2193_s23  ;;  %s2727_s23 = smov %s2272_s29 }
 0x29e   : > { %s2728_s24 = smov %s2262_s26  ;;  %18 = sbr.rel (!%p16_p8) target bundleno = 3 (0x3), region = 97 }
 0x2a3   :  { %1562 = vsyncpa [#allocation4], 1 }
 0x2a4   :  { %1564 = vsyncpa [#allocation4 + $0x1], 1 }

// kernel: unet_decoder_2d.5
= control target key start
LH: loop header
LB: loop body
LE: loop exit
PB: predicated region body
PF: predicated region fallthrough
CT: control target
= control target key end

     0   :  { %s983_s12 = smov 0   ;;  %s1368_s0 = inlined_call_operand.vmem [shape: f32[2,16,16,8], index: 0, kind: input, shape index: {}]   ;;  %s1369_s1 = inlined_call_operand.vmem [shape: f32[8,16], index: 1, kind: input, shape index: {}]   ;;  %s1370_s2 = inlined_call_operand.vmem [shape: f32[1,16], index: 2, kind: input, shape index: {}]   ;;  %s1371_s3 = inlined_call_operand.vmem [shape: f32[2,16,4,16,16], index: 3, kind: output, shape index: {}]  }
   0x1 LB: > { %s720_s13 = sadd.s32 4294967295, %s961_s12   ;;  %p724_p0 = scmp.ge.s32.totalorder %s961_s12, 1  ;;  %s961_s12 = sphi %s983_s12, %s13_s12  }
   0x2   : > { %p137_p1 = scmp.lt.s32.totalorder %s961_s12, 3 }
   0x4   : > { %p138_p2 = pnand %p724_p0, %p137_p1 }
   0x5   : > { %p161_p3 = scmp.lt.s32.totalorder (!%p138_p2), %s720_s13, 1 }
   0x6   : > { %141 = sbr.rel (%p138_p2) target bundleno = 275 (0x113), region = 32 }
   0xb   : > { %v203_v0 = vld [vmem:[%s1369_s1] sm:$0xff]  ;;  %s1373_s13 = smov (!%p161_p3, %s720_s13), 1  ;;  %vm211_vm0 = vcmask 64512   ;;  %vm533_vm1 = vcmask 130048  }
   0xc   : > { %895 = vmatprep.subr.mxu0 %v203_v0  ;;  %945 = vmatprep.subr.mxu1 %v203_v0  ;;  %s860_s16 = sshll.u32 %s1373_s13, 8  ;;  %s861_s20 = sshll.u32 %s1373_s13, 10  ;;  %v1070_v33 = vld [vmem:[%s1370_s2] ss:$0 sm:$0xff] }
   0xd   : > { %896 = vmatpush3.msra.mxu0 %v203_v0  ;;  %946 = vmatpush3.msra.mxu1 %v203_v0  ;;  %s1000_s19 = scalar_lea.vmem %s1368_s0, %s860_s16  ;;  %s1075_s25 = scalar_lea.vmem %s1371_s3, %s861_s20 }
   0xe   : > { %v171_v1 = vld [vmem:[%s1000_s19] sm:$0xff]  ;;  %v172_v3 = vld [vmem:[%s1000_s19 + $0x8] sm:$0xff]  ;;  %v173_v5 = vld [vmem:[%s1000_s19 + $0x10] sm:$0xff] }
   0xf   : > { %v187_v2 = vld [vmem:[%s1000_s19 + $0x80] sm:$0xff]  ;;  %897 = vmatprep.mubr.msk.f32.mxu0 %vm211_vm0, %v171_v1  ;;  %v188_v4 = vld [vmem:[%s1000_s19 + $0x88] sm:$0xff]  ;;  %v189_v6 = vld [vmem:[%s1000_s19 + $0x90] sm:$0xff] }
  0x10   : > { %921 = vmatprep.mubr.msk.f32.mxu1 %vm211_vm0, %v187_v2  ;;  %898 = vmatmul.mubr.msk.f32.vlgmr.msra.gmra.mxu0 %vm211_vm0, %v172_v3  ;;  %v174_v7 = vld [vmem:[%s1000_s19 + $0x18] sm:$0xff]  ;;  %v175_v9 = vld [vmem:[%s1000_s19 + $0x20] sm:$0xff]  ;;  %v176_v11 = vld [vmem:[%s1000_s19 + $0x28] sm:$0xff] }
  0x11   : > { %922 = vmatmul.mubr.msk.f32.vlgmr.msra.gmra.mxu1 %vm211_vm0, %v188_v4  ;;  %900 = vmatprep.mubr.msk.f32.mxu0 %vm211_vm0, %v173_v5  ;;  %v190_v8 = vld [vmem:[%s1000_s19 + $0x98] sm:$0xff]  ;;  %v191_v10 = vld [vmem:[%s1000_s19 + $0xa0] sm:$0xff]  ;;  %v192_v12 = vld [vmem:[%s1000_s19 + $0xa8] sm:$0xff] }
  0x12   : > { %924 = vmatprep.mubr.msk.f32.mxu1 %vm211_vm0, %v189_v6  ;;  %v177_v13 = vld [vmem:[%s1000_s19 + $0x30] sm:$0xff]  ;;  %v178_v15 = vld [vmem:[%s1000_s19 + $0x38] sm:$0xff]  ;;  %v179_v17 = vld [vmem:[%s1000_s19 + $0x40] sm:$0xff] }
  0x13   : > { %v193_v14 = vld [vmem:[%s1000_s19 + $0xb0] sm:$0xff]  ;;  %v194_v16 = vld [vmem:[%s1000_s19 + $0xb8] sm:$0xff]  ;;  %v195_v18 = vld [vmem:[%s1000_s19 + $0xc0] sm:$0xff] }
  0x14   : > { %901 = vmatmul.mubr.msk.f32.gmra.mxu0 %vm211_vm0, %v174_v7  ;;  %v180_v19 = vld [vmem:[%s1000_s19 + $0x48] sm:$0xff]  ;;  %v181_v21 = vld [vmem:[%s1000_s19 + $0x50] sm:$0xff]  ;;  %v182_v23 = vld [vmem:[%s1000_s19 + $0x58] sm:$0xff] }
  0x15   : > { %925 = vmatmul.mubr.msk.f32.gmra.mxu1 %vm211_vm0, %v190_v8  ;;  %903 = vmatprep.mubr.msk.f32.mxu0 %vm211_vm0, %v175_v9  ;;  %v196_v20 = vld [vmem:[%s1000_s19 + $0xc8] sm:$0xff]  ;;  %v197_v22 = vld [vmem:[%s1000_s19 + $0xd0] sm:$0xff]  ;;  %v198_v24 = vld [vmem:[%s1000_s19 + $0xd8] sm:$0xff] }
  0x16   : > { %927 = vmatprep.mubr.msk.f32.mxu1 %vm211_vm0, %v191_v10  ;;  %v183_v25 = vld [vmem:[%s1000_s19 + $0x60] sm:$0xff]  ;;  %v184_v27 = vld [vmem:[%s1000_s19 + $0x68] sm:$0xff]  ;;  %v185_v29 = vld [vmem:[%s1000_s19 + $0x70] sm:$0xff] }
  0x17   : > { %v199_v26 = vld [vmem:[%s1000_s19 + $0xe0] sm:$0xff]  ;;  %v200_v28 = vld [vmem:[%s1000_s19 + $0xe8] sm:$0xff]  ;;  %v201_v30 = vld [vmem:[%s1000_s19 + $0xf0] sm:$0xff] }
  0x18   : > { %904 = vmatmul.mubr.msk.f32.gmra.mxu0 %vm211_vm0, %v176_v11  ;;  %v186_v31 = vld [vmem:[%s1000_s19 + $0x78] sm:$0xff] }
  0x19   : > { %928 = vmatmul.mubr.msk.f32.gmra.mxu1 %vm211_vm0, %v192_v12  ;;  %906 = vmatprep.mubr.msk.f32.mxu0 %vm211_vm0, %v177_v13  ;;  %v202_v32 = vld [vmem:[%s1000_s19 + $0xf8] sm:$0xff] }
  0x1a   : > { %930 = vmatprep.mubr.msk.f32.mxu1 %vm211_vm0, %v193_v14 }
  0x1c   : > { %907 = vmatmul.mubr.msk.f32.gmra.mxu0 %vm211_vm0, %v178_v15 }
  0x1d   : > { %931 = vmatmul.mubr.msk.f32.gmra.mxu1 %vm211_vm0, %v194_v16  ;;  %909 = vmatprep.mubr.msk.f32.mxu0 %vm211_vm0, %v179_v17 }
  0x1e   : > { %933 = vmatprep.mubr.msk.f32.mxu1 %vm211_vm0, %v195_v18 }
  0x20   : > { %910 = vmatmul.mubr.msk.f32.gmra.mxu0 %vm211_vm0, %v180_v19 }
  0x21   : > { %934 = vmatmul.mubr.msk.f32.gmra.mxu1 %vm211_vm0, %v196_v20  ;;  %912 = vmatprep.mubr.msk.f32.mxu0 %vm211_vm0, %v181_v21 }
  0x22   : > { %936 = vmatprep.mubr.msk.f32.mxu1 %vm211_vm0, %v197_v22 }
  0x24   : > { %913 = vmatmul.mubr.msk.f32.gmra.mxu0 %vm211_vm0, %v182_v23 }
  0x25   : > { %937 = vmatmul.mubr.msk.f32.gmra.mxu1 %vm211_vm0, %v198_v24  ;;  %915 = vmatprep.mubr.msk.f32.mxu0 %vm211_vm0, %v183_v25 }
  0x26   : > { %939 = vmatprep.mubr.msk.f32.mxu1 %vm211_vm0, %v199_v26 }
  0x28   : > { %916 = vmatmul.mubr.msk.f32.gmra.mxu0 %vm211_vm0, %v184_v27 }
  0x29   : > { %940 = vmatmul.mubr.msk.f32.gmra.mxu1 %vm211_vm0, %v200_v28  ;;  %918 = vmatprep.mubr.msk.f32.mxu0 %vm211_vm0, %v185_v29 }
  0x2a   : > { %942 = vmatprep.mubr.msk.f32.mxu1 %vm211_vm0, %v201_v30 }
  0x2c   : > { %919 = vmatmul.mubr.msk.f32.gmra.mxu0 %vm211_vm0, %v186_v31 }
  0x2d   : > { %943 = vmatmul.mubr.msk.f32.gmra.mxu1 %vm211_vm0, %v202_v32 }
  0xd0   : > { %v899_v34 = vpop.f32.mrf.mxu0 }
  0xd1   : > { %v923_v35 = vpop.f32.mrf.mxu1  ;;  %v380_v36 = vadd.f32 %v899_v34, %v1070_v33 }
  0xd2   : > { %v460_v37 = vadd.f32 %v923_v35, %v1070_v33  ;;  %v374_v38 = vpop.f32.mrf.mxu0 }
  0xd3   : > { %v454_v39 = vpop.f32.mrf.mxu1  ;;  %535 = vst.msk [vmem:[%s1075_s25 + $0x8] sm:$0xff] %vm533_vm1, %v380_v36  ;;  %763 = vst.msk [vmem:[%s1075_s25 + $0x18] sm:$0xff] %vm533_vm1, %v380_v36  ;;  %v375_v40 = vadd.f32 %v1070_v33, %v374_v38 }
  0xd4   : > { %795 = vst.msk [vmem:[%s1075_s25 + $0x28] sm:$0xff] %vm533_vm1, %v380_v36  ;;  %827 = vst.msk [vmem:[%s1075_s25 + $0x38] sm:$0xff] %vm533_vm1, %v380_v36  ;;  %v455_v41 = vadd.f32 %v1070_v33, %v454_v39  ;;  %v902_v42 = vpop.f32.mrf.mxu0 }
  0xd5   : > { %551 = vst.msk [vmem:[%s1075_s25 + $0x208] sm:$0xff] %vm533_vm1, %v460_v37  ;;  %779 = vst.msk [vmem:[%s1075_s25 + $0x218] sm:$0xff] %vm533_vm1, %v460_v37  ;;  %v926_v43 = vpop.f32.mrf.mxu1  ;;  %v390_v44 = vadd.f32 %v902_v42, %v1070_v33 }
  0xd6   : > { %811 = vst.msk [vmem:[%s1075_s25 + $0x228] sm:$0xff] %vm533_vm1, %v460_v37  ;;  %843 = vst.msk [vmem:[%s1075_s25 + $0x238] sm:$0xff] %vm533_vm1, %v460_v37  ;;  %v470_v45 = vadd.f32 %v926_v43, %v1070_v33  ;;  %v384_v46 = vpop.f32.mrf.mxu0 }
  0xd7   : > { %534 = vst.msk [vmem:[%s1075_s25] sm:$0xff] %vm533_vm1, %v375_v40  ;;  %762 = vst.msk [vmem:[%s1075_s25 + $0x10] sm:$0xff] %vm533_vm1, %v375_v40  ;;  %v464_v47 = vpop.f32.mrf.mxu1  ;;  %v385_v48 = vadd.f32 %v1070_v33, %v384_v46 }
  0xd8   : > { %794 = vst.msk [vmem:[%s1075_s25 + $0x20] sm:$0xff] %vm533_vm1, %v375_v40  ;;  %826 = vst.msk [vmem:[%s1075_s25 + $0x30] sm:$0xff] %vm533_vm1, %v375_v40  ;;  %v465_v49 = vadd.f32 %v1070_v33, %v464_v47  ;;  %v905_v50 = vpop.f32.mrf.mxu0 }
  0xd9   : > { %550 = vst.msk [vmem:[%s1075_s25 + $0x200] sm:$0xff] %vm533_vm1, %v455_v41  ;;  %778 = vst.msk [vmem:[%s1075_s25 + $0x210] sm:$0xff] %vm533_vm1, %v455_v41  ;;  %v929_v51 = vpop.f32.mrf.mxu1  ;;  %v400_v52 = vadd.f32 %v905_v50, %v1070_v33 }
  0xda   : > { %810 = vst.msk [vmem:[%s1075_s25 + $0x220] sm:$0xff] %vm533_vm1, %v455_v41  ;;  %842 = vst.msk [vmem:[%s1075_s25 + $0x230] sm:$0xff] %vm533_vm1, %v455_v41  ;;  %v480_v53 = vadd.f32 %v929_v51, %v1070_v33  ;;  %v394_v54 = vpop.f32.mrf.mxu0 }
  0xdb   : > { %537 = vst.msk [vmem:[%s1075_s25 + $0x48] sm:$0xff] %vm533_vm1, %v390_v44  ;;  %765 = vst.msk [vmem:[%s1075_s25 + $0x58] sm:$0xff] %vm533_vm1, %v390_v44  ;;  %v474_v55 = vpop.f32.mrf.mxu1  ;;  %v395_v56 = vadd.f32 %v1070_v33, %v394_v54 }
  0xdc   : > { %797 = vst.msk [vmem:[%s1075_s25 + $0x68] sm:$0xff] %vm533_vm1, %v390_v44  ;;  %829 = vst.msk [vmem:[%s1075_s25 + $0x78] sm:$0xff] %vm533_vm1, %v390_v44  ;;  %v475_v57 = vadd.f32 %v1070_v33, %v474_v55  ;;  %v908_v58 = vpop.f32.mrf.mxu0 }
  0xdd   : > { %553 = vst.msk [vmem:[%s1075_s25 + $0x248] sm:$0xff] %vm533_vm1, %v470_v45  ;;  %781 = vst.msk [vmem:[%s1075_s25 + $0x258] sm:$0xff] %vm533_vm1, %v470_v45  ;;  %v932_v59 = vpop.f32.mrf.mxu1  ;;  %v410_v60 = vadd.f32 %v908_v58, %v1070_v33 }
  0xde   : > { %813 = vst.msk [vmem:[%s1075_s25 + $0x268] sm:$0xff] %vm533_vm1, %v470_v45  ;;  %845 = vst.msk [vmem:[%s1075_s25 + $0x278] sm:$0xff] %vm533_vm1, %v470_v45  ;;  %v490_v61 = vadd.f32 %v932_v59, %v1070_v33  ;;  %v404_v62 = vpop.f32.mrf.mxu0 }
  0xdf   : > { %536 = vst.msk [vmem:[%s1075_s25 + $0x40] sm:$0xff] %vm533_vm1, %v385_v48  ;;  %764 = vst.msk [vmem:[%s1075_s25 + $0x50] sm:$0xff] %vm533_vm1, %v385_v48  ;;  %v484_v63 = vpop.f32.mrf.mxu1  ;;  %v405_v0 = vadd.f32 %v1070_v33, %v404_v62 }
  0xe0   : > { %796 = vst.msk [vmem:[%s1075_s25 + $0x60] sm:$0xff] %vm533_vm1, %v385_v48  ;;  %828 = vst.msk [vmem:[%s1075_s25 + $0x70] sm:$0xff] %vm533_vm1, %v385_v48  ;;  %v485_v1 = vadd.f32 %v1070_v33, %v484_v63  ;;  %v911_v2 = vpop.f32.mrf.mxu0 }
  0xe1   : > { %552 = vst.msk [vmem:[%s1075_s25 + $0x240] sm:$0xff] %vm533_vm1, %v465_v49  ;;  %780 = vst.msk [vmem:[%s1075_s25 + $0x250] sm:$0xff] %vm533_vm1, %v465_v49  ;;  %v935_v3 = vpop.f32.mrf.mxu1  ;;  %v420_v4 = vadd.f32 %v911_v2, %v1070_v33 }
  0xe2   : > { %812 = vst.msk [vmem:[%s1075_s25 + $0x260] sm:$0xff] %vm533_vm1, %v465_v49  ;;  %844 = vst.msk [vmem:[%s1075_s25 + $0x270] sm:$0xff] %vm533_vm1, %v465_v49  ;;  %v500_v5 = vadd.f32 %v935_v3, %v1070_v33  ;;  %v414_v6 = vpop.f32.mrf.mxu0 }
  0xe3   : > { %539 = vst.msk [vmem:[%s1075_s25 + $0x88] sm:$0xff] %vm533_vm1, %v400_v52  ;;  %767 = vst.msk [vmem:[%s1075_s25 + $0x98] sm:$0xff] %vm533_vm1, %v400_v52  ;;  %v494_v7 = vpop.f32.mrf.mxu1  ;;  %v415_v8 = vadd.f32 %v1070_v33, %v414_v6 }
  0xe4   : > { %799 = vst.msk [vmem:[%s1075_s25 + $0xa8] sm:$0xff] %vm533_vm1, %v400_v52  ;;  %831 = vst.msk [vmem:[%s1075_s25 + $0xb8] sm:$0xff] %vm533_vm1, %v400_v52  ;;  %v495_v9 = vadd.f32 %v1070_v33, %v494_v7  ;;  %v914_v10 = vpop.f32.mrf.mxu0 }
  0xe5   : > { %555 = vst.msk [vmem:[%s1075_s25 + $0x288] sm:$0xff] %vm533_vm1, %v480_v53  ;;  %783 = vst.msk [vmem:[%s1075_s25 + $0x298] sm:$0xff] %vm533_vm1, %v480_v53  ;;  %v938_v11 = vpop.f32.mrf.mxu1  ;;  %v430_v12 = vadd.f32 %v914_v10, %v1070_v33 }
  0xe6   : > { %815 = vst.msk [vmem:[%s1075_s25 + $0x2a8] sm:$0xff] %vm533_vm1, %v480_v53  ;;  %847 = vst.msk [vmem:[%s1075_s25 + $0x2b8] sm:$0xff] %vm533_vm1, %v480_v53  ;;  %v510_v13 = vadd.f32 %v938_v11, %v1070_v33  ;;  %v424_v14 = vpop.f32.mrf.mxu0 }
  0xe7   : > { %538 = vst.msk [vmem:[%s1075_s25 + $0x80] sm:$0xff] %vm533_vm1, %v395_v56  ;;  %766 = vst.msk [vmem:[%s1075_s25 + $0x90] sm:$0xff] %vm533_vm1, %v395_v56  ;;  %v504_v15 = vpop.f32.mrf.mxu1  ;;  %v425_v16 = vadd.f32 %v1070_v33, %v424_v14 }
  0xe8   : > { %798 = vst.msk [vmem:[%s1075_s25 + $0xa0] sm:$0xff] %vm533_vm1, %v395_v56  ;;  %830 = vst.msk [vmem:[%s1075_s25 + $0xb0] sm:$0xff] %vm533_vm1, %v395_v56  ;;  %v505_v17 = vadd.f32 %v1070_v33, %v504_v15  ;;  %v917_v18 = vpop.f32.mrf.mxu0 }
  0xe9   : > { %554 = vst.msk [vmem:[%s1075_s25 + $0x280] sm:$0xff] %vm533_vm1, %v475_v57  ;;  %782 = vst.msk [vmem:[%s1075_s25 + $0x290] sm:$0xff] %vm533_vm1, %v475_v57  ;;  %v941_v19 = vpop.f32.mrf.mxu1  ;;  %v440_v20 = vadd.f32 %v917_v18, %v1070_v33 }
  0xea   : > { %814 = vst.msk [vmem:[%s1075_s25 + $0x2a0] sm:$0xff] %vm533_vm1, %v475_v57  ;;  %846 = vst.msk [vmem:[%s1075_s25 + $0x2b0] sm:$0xff] %vm533_vm1, %v475_v57  ;;  %v520_v21 = vadd.f32 %v941_v19, %v1070_v33  ;;  %v434_v22 = vpop.f32.mrf.mxu0 }
  0xeb   : > { %541 = vst.msk [vmem:[%s1075_s25 + $0xc8] sm:$0xff] %vm533_vm1, %v410_v60  ;;  %769 = vst.msk [vmem:[%s1075_s25 + $0xd8] sm:$0xff] %vm533_vm1, %v410_v60  ;;  %v514_v23 = vpop.f32.mrf.mxu1  ;;  %v435_v24 = vadd.f32 %v1070_v33, %v434_v22 }
  0xec   : > { %801 = vst.msk [vmem:[%s1075_s25 + $0xe8] sm:$0xff] %vm533_vm1, %v410_v60  ;;  %833 = vst.msk [vmem:[%s1075_s25 + $0xf8] sm:$0xff] %vm533_vm1, %v410_v60  ;;  %v515_v25 = vadd.f32 %v1070_v33, %v514_v23  ;;  %v920_v26 = vpop.f32.mrf.mxu0 }
  0xed   : > { %557 = vst.msk [vmem:[%s1075_s25 + $0x2c8] sm:$0xff] %vm533_vm1, %v490_v61  ;;  %785 = vst.msk [vmem:[%s1075_s25 + $0x2d8] sm:$0xff] %vm533_vm1, %v490_v61  ;;  %v944_v27 = vpop.f32.mrf.mxu1  ;;  %v450_v28 = vadd.f32 %v920_v26, %v1070_v33 }
  0xee   : > { %817 = vst.msk [vmem:[%s1075_s25 + $0x2e8] sm:$0xff] %vm533_vm1, %v490_v61  ;;  %849 = vst.msk [vmem:[%s1075_s25 + $0x2f8] sm:$0xff] %vm533_vm1, %v490_v61  ;;  %v530_v29 = vadd.f32 %v944_v27, %v1070_v33  ;;  %v444_v30 = vpop.f32.mrf.mxu0 }
  0xef   : > { %540 = vst.msk [vmem:[%s1075_s25 + $0xc0] sm:$0xff] %vm533_vm1, %v405_v0  ;;  %768 = vst.msk [vmem:[%s1075_s25 + $0xd0] sm:$0xff] %vm533_vm1, %v405_v0  ;;  %v524_v31 = vpop.f32.mrf.mxu1  ;;  %v445_v32 = vadd.f32 %v1070_v33, %v444_v30 }
  0xf0   : > { %800 = vst.msk [vmem:[%s1075_s25 + $0xe0] sm:$0xff] %vm533_vm1, %v405_v0  ;;  %832 = vst.msk [vmem:[%s1075_s25 + $0xf0] sm:$0xff] %vm533_vm1, %v405_v0  ;;  %v525_v34 = vadd.f32 %v1070_v33, %v524_v31 }
  0xf1   : > { %556 = vst.msk [vmem:[%s1075_s25 + $0x2c0] sm:$0xff] %vm533_vm1, %v485_v1  ;;  %784 = vst.msk [vmem:[%s1075_s25 + $0x2d0] sm:$0xff] %vm533_vm1, %v485_v1 }
  0xf2   : > { %816 = vst.msk [vmem:[%s1075_s25 + $0x2e0] sm:$0xff] %vm533_vm1, %v485_v1  ;;  %848 = vst.msk [vmem:[%s1075_s25 + $0x2f0] sm:$0xff] %vm533_vm1, %v485_v1 }
  0xf3   : > { %543 = vst.msk [vmem:[%s1075_s25 + $0x108] sm:$0xff] %vm533_vm1, %v420_v4  ;;  %771 = vst.msk [vmem:[%s1075_s25 + $0x118] sm:$0xff] %vm533_vm1, %v420_v4 }
  0xf4   : > { %803 = vst.msk [vmem:[%s1075_s25 + $0x128] sm:$0xff] %vm533_vm1, %v420_v4  ;;  %835 = vst.msk [vmem:[%s1075_s25 + $0x138] sm:$0xff] %vm533_vm1, %v420_v4 }
  0xf5   : > { %559 = vst.msk [vmem:[%s1075_s25 + $0x308] sm:$0xff] %vm533_vm1, %v500_v5  ;;  %787 = vst.msk [vmem:[%s1075_s25 + $0x318] sm:$0xff] %vm533_vm1, %v500_v5 }
  0xf6   : > { %819 = vst.msk [vmem:[%s1075_s25 + $0x328] sm:$0xff] %vm533_vm1, %v500_v5  ;;  %851 = vst.msk [vmem:[%s1075_s25 + $0x338] sm:$0xff] %vm533_vm1, %v500_v5 }
  0xf7   : > { %542 = vst.msk [vmem:[%s1075_s25 + $0x100] sm:$0xff] %vm533_vm1, %v415_v8  ;;  %770 = vst.msk [vmem:[%s1075_s25 + $0x110] sm:$0xff] %vm533_vm1, %v415_v8 }
  0xf8   : > { %802 = vst.msk [vmem:[%s1075_s25 + $0x120] sm:$0xff] %vm533_vm1, %v415_v8  ;;  %834 = vst.msk [vmem:[%s1075_s25 + $0x130] sm:$0xff] %vm533_vm1, %v415_v8 }
  0xf9   : > { %558 = vst.msk [vmem:[%s1075_s25 + $0x300] sm:$0xff] %vm533_vm1, %v495_v9  ;;  %786 = vst.msk [vmem:[%s1075_s25 + $0x310] sm:$0xff] %vm533_vm1, %v495_v9 }
  0xfa   : > { %818 = vst.msk [vmem:[%s1075_s25 + $0x320] sm:$0xff] %vm533_vm1, %v495_v9  ;;  %850 = vst.msk [vmem:[%s1075_s25 + $0x330] sm:$0xff] %vm533_vm1, %v495_v9 }
  0xfb   : > { %545 = vst.msk [vmem:[%s1075_s25 + $0x148] sm:$0xff] %vm533_vm1, %v430_v12  ;;  %773 = vst.msk [vmem:[%s1075_s25 + $0x158] sm:$0xff] %vm533_vm1, %v430_v12 }
  0xfc   : > { %805 = vst.msk [vmem:[%s1075_s25 + $0x168] sm:$0xff] %vm533_vm1, %v430_v12  ;;  %837 = vst.msk [vmem:[%s1075_s25 + $0x178] sm:$0xff] %vm533_vm1, %v430_v12 }
  0xfd   : > { %561 = vst.msk [vmem:[%s1075_s25 + $0x348] sm:$0xff] %vm533_vm1, %v510_v13  ;;  %789 = vst.msk [vmem:[%s1075_s25 + $0x358] sm:$0xff] %vm533_vm1, %v510_v13 }
  0xfe   : > { %821 = vst.msk [vmem:[%s1075_s25 + $0x368] sm:$0xff] %vm533_vm1, %v510_v13  ;;  %853 = vst.msk [vmem:[%s1075_s25 + $0x378] sm:$0xff] %vm533_vm1, %v510_v13 }
  0xff   : > { %544 = vst.msk [vmem:[%s1075_s25 + $0x140] sm:$0xff] %vm533_vm1, %v425_v16  ;;  %772 = vst.msk [vmem:[%s1075_s25 + $0x150] sm:$0xff] %vm533_vm1, %v425_v16 }
 0x100   : > { %804 = vst.msk [vmem:[%s1075_s25 + $0x160] sm:$0xff] %vm533_vm1, %v425_v16  ;;  %836 = vst.msk [vmem:[%s1075_s25 + $0x170] sm:$0xff] %vm533_vm1, %v425_v16 }
 0x101   : > { %560 = vst.msk [vmem:[%s1075_s25 + $0x340] sm:$0xff] %vm533_vm1, %v505_v17  ;;  %788 = vst.msk [vmem:[%s1075_s25 + $0x350] sm:$0xff] %vm533_vm1, %v505_v17 }
 0x102   : > { %820 = vst.msk [vmem:[%s1075_s25 + $0x360] sm:$0xff] %vm533_vm1, %v505_v17  ;;  %852 = vst.msk [vmem:[%s1075_s25 + $0x370] sm:$0xff] %vm533_vm1, %v505_v17 }
 0x103   : > { %547 = vst.msk [vmem:[%s1075_s25 + $0x188] sm:$0xff] %vm533_vm1, %v440_v20  ;;  %775 = vst.msk [vmem:[%s1075_s25 + $0x198] sm:$0xff] %vm533_vm1, %v440_v20 }
 0x104   : > { %807 = vst.msk [vmem:[%s1075_s25 + $0x1a8] sm:$0xff] %vm533_vm1, %v440_v20  ;;  %839 = vst.msk [vmem:[%s1075_s25 + $0x1b8] sm:$0xff] %vm533_vm1, %v440_v20 }
 0x105   : > { %563 = vst.msk [vmem:[%s1075_s25 + $0x388] sm:$0xff] %vm533_vm1, %v520_v21  ;;  %791 = vst.msk [vmem:[%s1075_s25 + $0x398] sm:$0xff] %vm533_vm1, %v520_v21 }
 0x106   : > { %823 = vst.msk [vmem:[%s1075_s25 + $0x3a8] sm:$0xff] %vm533_vm1, %v520_v21  ;;  %855 = vst.msk [vmem:[%s1075_s25 + $0x3b8] sm:$0xff] %vm533_vm1, %v520_v21 }
 0x107   : > { %546 = vst.msk [vmem:[%s1075_s25 + $0x180] sm:$0xff] %vm533_vm1, %v435_v24  ;;  %774 = vst.msk [vmem:[%s1075_s25 + $0x190] sm:$0xff] %vm533_vm1, %v435_v24 }
 0x108   : > { %806 = vst.msk [vmem:[%s1075_s25 + $0x1a0] sm:$0xff] %vm533_vm1, %v435_v24  ;;  %838 = vst.msk [vmem:[%s1075_s25 + $0x1b0] sm:$0xff] %vm533_vm1, %v435_v24 }
 0x109   : > { %562 = vst.msk [vmem:[%s1075_s25 + $0x380] sm:$0xff] %vm533_vm1, %v515_v25  ;;  %790 = vst.msk [vmem:[%s1075_s25 + $0x390] sm:$0xff] %vm533_vm1, %v515_v25 }
 0x10a   : > { %822 = vst.msk [vmem:[%s1075_s25 + $0x3a0] sm:$0xff] %vm533_vm1, %v515_v25  ;;  %854 = vst.msk [vmem:[%s1075_s25 + $0x3b0] sm:$0xff] %vm533_vm1, %v515_v25 }
 0x10b   : > { %549 = vst.msk [vmem:[%s1075_s25 + $0x1c8] sm:$0xff] %vm533_vm1, %v450_v28  ;;  %777 = vst.msk [vmem:[%s1075_s25 + $0x1d8] sm:$0xff] %vm533_vm1, %v450_v28 }
 0x10c   : > { %809 = vst.msk [vmem:[%s1075_s25 + $0x1e8] sm:$0xff] %vm533_vm1, %v450_v28  ;;  %841 = vst.msk [vmem:[%s1075_s25 + $0x1f8] sm:$0xff] %vm533_vm1, %v450_v28 }
 0x10d   : > { %565 = vst.msk [vmem:[%s1075_s25 + $0x3c8] sm:$0xff] %vm533_vm1, %v530_v29  ;;  %793 = vst.msk [vmem:[%s1075_s25 + $0x3d8] sm:$0xff] %vm533_vm1, %v530_v29 }
 0x10e   : > { %825 = vst.msk [vmem:[%s1075_s25 + $0x3e8] sm:$0xff] %vm533_vm1, %v530_v29  ;;  %857 = vst.msk [vmem:[%s1075_s25 + $0x3f8] sm:$0xff] %vm533_vm1, %v530_v29 }
 0x10f   : > { %548 = vst.msk [vmem:[%s1075_s25 + $0x1c0] sm:$0xff] %vm533_vm1, %v445_v32  ;;  %776 = vst.msk [vmem:[%s1075_s25 + $0x1d0] sm:$0xff] %vm533_vm1, %v445_v32 }
 0x110   : > { %808 = vst.msk [vmem:[%s1075_s25 + $0x1e0] sm:$0xff] %vm533_vm1, %v445_v32  ;;  %840 = vst.msk [vmem:[%s1075_s25 + $0x1f0] sm:$0xff] %vm533_vm1, %v445_v32 }
 0x111   : > { %564 = vst.msk [vmem:[%s1075_s25 + $0x3c0] sm:$0xff] %vm533_vm1, %v525_v34  ;;  %792 = vst.msk [vmem:[%s1075_s25 + $0x3d0] sm:$0xff] %vm533_vm1, %v525_v34 }
 0x112   : > { %824 = vst.msk [vmem:[%s1075_s25 + $0x3e0] sm:$0xff] %vm533_vm1, %v525_v34  ;;  %856 = vst.msk [vmem:[%s1075_s25 + $0x3f0] sm:$0xff] %vm533_vm1, %v525_v34 }
 0x113 PF: > { %s13_s12 = sadd.s32 1, %s961_s12  }
 0x114   : > { %p10_p4 = scmp.ge.s32.totalorder %s13_s12, 4  }
 0x116   :  { %12 = sbr.rel (!%p10_p4) target bundleno = 1 (0x1), region = 65 }

// kernel: unet_decoder_2d.4
= control target key start
LH: loop header
LB: loop body
LE: loop exit
PB: predicated region body
PF: predicated region fallthrough
CT: control target
= control target key end

     0   :  { %s3153_s21 = smov 0   ;;  %s3929_s0 = inlined_call_operand.vmem [shape: f32[2,8,8,16], index: 0, kind: input, shape index: {}]   ;;  %s3930_s1 = inlined_call_operand.vmem [shape: f32[2,16,8,16], index: 1, kind: input, shape index: {}]   ;;  %s3931_s2 = inlined_call_operand.vmem [shape: f32[16,32], index: 2, kind: input, shape index: {}]   ;;  %s3932_s3 = inlined_call_operand.vmem [shape: f32[1,32], index: 3, kind: input, shape index: {}]   ;;  %s3933_s4 = inlined_call_operand.vmem [shape: f32[9,32,16], index: 4, kind: input, shape index: {}]   ;;  %s3934_s5 = inlined_call_operand.vmem [shape: f32[1,16], index: 5, kind: input, shape index: {}]   ;;  %s3935_s6 = inlined_call_operand.vmem [shape: f32[2,16,8,16], index: 6, kind: output, shape index: {}]  }
   0x1 LB: > { %s2392_s22 = sadd.s32 4294967295, %s3113_s21   ;;  %p2396_p0 = scmp.ge.s32.totalorder %s3113_s21, 1  ;;  %s3113_s21 = sphi %s3153_s21, %s16_s21  }
   0x2   : > { %p222_p1 = scmp.lt.s32.totalorder %s3113_s21, 3 }
   0x4   : > { %p223_p2 = pnand %p2396_p0, %p222_p1 }
   0x6   : > { %226 = sbr.rel (%p223_p2) target bundleno = 692 (0x2b4), region = 44 }
   0xb   : > { %v325_v0 = vld [vmem:[%s3931_s2 + $0x8] sm:$0xff]  ;;  %v324_v1 = vld [vmem:[%s3931_s2] sm:$0xff]  ;;  %p257_p3 = scmp.lt.s32.totalorder %s2392_s22, 1  ;;  %vm333_vm0 = vcmask 130048   ;;  %s3115_s11 = smov 16   ;;  %vm272_vm1 = vcmask 261120  }
   0xc   : > { %2784 = vmatprep.subr.mxu0 %v325_v0  ;;  %vm279_vm2 = vcmask 253952   ;;  %v3116_v20 = vmov 0.0   ;;  %v2415_v25 = vld [vmem:[%s3933_s4 + $0x78] sm:$0xff]  ;;  %v2414_v26 = vld [vmem:[%s3933_s4 + $0x70] sm:$0xff]  ;;  %v2413_v27 = vld [vmem:[%s3933_s4 + $0x68] sm:$0xff]  ;;  %s3117_s24 = smov 112  }
   0xd   : > { %2785 = vmatpush3.msra.mxu0 %v325_v0  ;;  %s3987_s22 = smov (!%p257_p3, %s2392_s22), 1  ;;  %285 = vst.msk [vmem:[#allocation2 + $0x50] sm:$0x1] %vm279_vm2, %v3116_v20  ;;  %281 = vst.msk [vmem:[#allocation2 + $0x10] sm:$0x1] %vm279_vm2, %v3116_v20  ;;  %3088 = vmatprep.subr.mxu1 %v2415_v25  ;;  %v2412_v30 = vld [vmem:[%s3933_s4 + $0x60] sm:$0xff] }
   0xe   : > { %2786 = vmatprep.subr.mxu0 %v324_v1  ;;  %s2591_s27 = sshll.u32 %s3987_s22, 6  ;;  %s2592_s28 = sshll.u32 %s3987_s22, 7  ;;  %273 = vst.msk [vmem:[#allocation2] sm:$0xff] %vm272_vm1, %v3116_v20  ;;  %277 = vst.msk [vmem:[#allocation2 + $0x110] sm:$0xff] %vm272_vm1, %v3116_v20  ;;  %3092 = vmatpush3.msra.mxu1 %v2415_v25  ;;  %v2403_v31 = vld [vmem:[%s3932_s3] ss:$0 sm:$0xff] }
   0xf   : > { %2787 = vmatpush3.msra.mxu0 %v324_v1  ;;  %s261_s7 = scalar_lea.vmem %s3929_s0, %s2591_s27  ;;  %s3179_s10 = scalar_lea.vmem %s3930_s1, %s2592_s28  ;;  %282 = vst.msk [vmem:[#allocation2 + $0x20] sm:$0x1] %vm279_vm2, %v3116_v20  ;;  %283 = vst.msk [vmem:[#allocation2 + $0x30] sm:$0x1] %vm279_vm2, %v3116_v20  ;;  %3089 = vmatprep.subr.mxu1 %v2414_v26  ;;  %vm592_vm3 = vcmask 261248   ;;  %v3312_v40 = vld [vmem:[%s3933_s4 + $0xd8] sm:$0xff] }
  0x10   : > { %v316_v2 = vld [vmem:[%s261_s7] sm:$0xff]  ;;  %v317_v3 = vld [vmem:[%s261_s7 + $0x8] sm:$0xff]  ;;  %v318_v4 = vld [vmem:[%s261_s7 + $0x10] sm:$0xff]  ;;  %284 = vst.msk [vmem:[#allocation2 + $0x40] sm:$0x1] %vm279_vm2, %v3116_v20  ;;  %2800 = vmatprep.subr.mxu0 %v2415_v25  ;;  %3093 = vmatpush3.msra.mxu1 %v2414_v26  ;;  %vm274_vm4 = vcmask 254976  }
  0x11   : > { %2788 = vmatprep.mubr.msk.f32.mxu0 %vm333_vm0, %v316_v2  ;;  %v516_v5 = vld [vmem:[%s3179_s10 + $0x20] sm:$0xff]  ;;  %v319_v6 = vld [vmem:[%s261_s7 + $0x18] sm:$0xff]  ;;  %v517_v7 = vld [vmem:[%s3179_s10 + $0x28] sm:$0xff]  ;;  %286 = vst.msk [vmem:[#allocation2 + $0x60] sm:$0x1] %vm279_vm2, %v3116_v20  ;;  %3090 = vmatprep.subr.mxu1 %v2413_v27 }
  0x12   : > { %2789 = vmatmul.mubr.msk.f32.vlgmr.msra.gmra.mxu0 %vm333_vm0, %v317_v3  ;;  %552 = vrot.lane.b32.xlu0 %v516_v5, %s3115_s11  ;;  %v320_v8 = vld [vmem:[%s261_s7 + $0x20] sm:$0xff]  ;;  %v518_v9 = vld [vmem:[%s3179_s10 + $0x30] sm:$0xff]  ;;  %v519_v10 = vld [vmem:[%s3179_s10 + $0x38] sm:$0xff]  ;;  %287 = vst.msk [vmem:[#allocation2 + $0x70] sm:$0x1] %vm279_vm2, %v3116_v20 }
  0x13   : > { %2791 = vmatprep.mubr.msk.f32.mxu0 %vm333_vm0, %v318_v4  ;;  %554 = vrot.lane.b32.xlu1 %v517_v7, %s3115_s11  ;;  %v321_v11 = vld [vmem:[%s261_s7 + $0x28] sm:$0xff]  ;;  %v322_v12 = vld [vmem:[%s261_s7 + $0x30] sm:$0xff]  ;;  %v520_v14 = vld [vmem:[%s3179_s10 + $0x40] sm:$0xff]  ;;  %288 = vst.msk [vmem:[#allocation2 + $0x80] sm:$0x1] %vm279_vm2, %v3116_v20 }
  0x14   : > { %v521_v13 = vld [vmem:[%s3179_s10 + $0x48] sm:$0xff]  ;;  %v323_v15 = vld [vmem:[%s261_s7 + $0x38] sm:$0xff]  ;;  %v522_v16 = vld [vmem:[%s3179_s10 + $0x50] sm:$0xff]  ;;  %289 = vst.msk [vmem:[#allocation2 + $0x90] sm:$0x1] %vm279_vm2, %v3116_v20  ;;  %2801 = vmatpush3.msra.mxu0 %v2415_v25  ;;  %3094 = vmatpush3.msra.mxu1 %v2413_v27  ;;  %s3823_s7 = scalar_lea.vmem %s3935_s6, %s2592_s28 }
  0x15   : > { %v523_v17 = vld [vmem:[%s3179_s10 + $0x58] sm:$0xff]  ;;  %v513_v18 = vld [vmem:[%s3179_s10 + $0x8] sm:$0xff]  ;;  %v512_v19 = vld [vmem:[%s3179_s10] sm:$0xff]  ;;  %290 = vst.msk [vmem:[#allocation2 + $0xa0] sm:$0x1] %vm279_vm2, %v3116_v20  ;;  %2802 = vmatprep.subr.mxu0 %v2414_v26  ;;  %3091 = vmatprep.subr.mxu1 %v2412_v30 }
  0x16   : > { %2792 = vmatmul.mubr.msk.f32.gmra.mxu0 %vm333_vm0, %v319_v6  ;;  %556 = vrot.lane.b32.xlu0 %v518_v9, %s3115_s11  ;;  %291 = vst.msk [vmem:[#allocation2 + $0xb0] sm:$0x1] %vm279_vm2, %v3116_v20  ;;  %292 = vst.msk [vmem:[#allocation2 + $0xc0] sm:$0x1] %vm279_vm2, %v3116_v20  ;;  %v525_v44 = vld [vmem:[%s3179_s10 + $0x68] sm:$0xff]  ;;  %v524_v48 = vld [vmem:[%s3179_s10 + $0x60] sm:$0xff] }
  0x17   : > { %2794 = vmatprep.mubr.msk.f32.mxu0 %vm333_vm0, %v320_v8  ;;  %558 = vrot.lane.b32.xlu1 %v519_v10, %s3115_s11  ;;  %293 = vst.msk [vmem:[#allocation2 + $0xd0] sm:$0x1] %vm279_vm2, %v3116_v20  ;;  %294 = vst.msk [vmem:[#allocation2 + $0xe0] sm:$0x1] %vm279_vm2, %v3116_v20  ;;  %v630_v54 = vld [vmem:[%s3933_s4 + $0x18] sm:$0xff]  ;;  %v514_v56 = vld [vmem:[%s3179_s10 + $0x10] sm:$0xff] }
  0x18   : > { %295 = vst.msk [vmem:[#allocation2 + $0xf0] sm:$0x1] %vm279_vm2, %v3116_v20  ;;  %296 = vst.msk [vmem:[#allocation2 + $0x100] sm:$0x1] %vm279_vm2, %v3116_v20  ;;  %2803 = vmatpush3.msra.mxu0 %v2414_v26  ;;  %3095 = vmatpush3.msra.mxu1 %v2412_v30  ;;  %v515_v58 = vld [vmem:[%s3179_s10 + $0x18] sm:$0xff]  ;;  %v526_v59 = vld [vmem:[%s3179_s10 + $0x70] sm:$0xff] }
  0x19   : > { %299 = vst.msk [vmem:[#allocation2 + $0x19] sm:$0x1] %vm279_vm2, %v3116_v20  ;;  %300 = vst.msk [vmem:[#allocation2 + $0x29] sm:$0x1] %vm279_vm2, %v3116_v20  ;;  %2804 = vmatprep.subr.mxu0 %v2413_v27  ;;  %2864 = vmatprep.subr.mxu1 %v3312_v40  ;;  %v527_v60 = vld [vmem:[%s3179_s10 + $0x78] sm:$0xff]  ;;  %v629_v4 = vld [vmem:[%s3933_s4 + $0x10] sm:$0xff] }
  0x1a   : > { %2795 = vmatmul.mubr.msk.f32.gmra.mxu0 %vm333_vm0, %v321_v11  ;;  %562 = vrot.lane.b32.xlu0 %v521_v13, %s3115_s11  ;;  %301 = vst.msk [vmem:[#allocation2 + $0x39] sm:$0x1] %vm279_vm2, %v3116_v20  ;;  %302 = vst.msk [vmem:[#allocation2 + $0x49] sm:$0x1] %vm279_vm2, %v3116_v20  ;;  %v628_v6 = vld [vmem:[%s3933_s4 + $0x8] sm:$0xff]  ;;  %v2450_v9 = vld [vmem:[%s3933_s4 + $0xd0] sm:$0xff] }
  0x1b   : > { %2797 = vmatprep.mubr.msk.f32.mxu0 %vm333_vm0, %v322_v12  ;;  %560 = vrot.lane.b32.xlu1 %v520_v14, %s3115_s11  ;;  %303 = vst.msk [vmem:[#allocation2 + $0x59] sm:$0x1] %vm279_vm2, %v3116_v20  ;;  %304 = vst.msk [vmem:[#allocation2 + $0x69] sm:$0x1] %vm279_vm2, %v3116_v20  ;;  %v627_v12 = vld [vmem:[%s3933_s4] sm:$0xff]  ;;  %v2449_v13 = vld [vmem:[%s3933_s4 + $0xc8] sm:$0xff] }
  0x1c   : > { %305 = vst.msk [vmem:[#allocation2 + $0x79] sm:$0x1] %vm279_vm2, %v3116_v20  ;;  %306 = vst.msk [vmem:[#allocation2 + $0x89] sm:$0x1] %vm279_vm2, %v3116_v20  ;;  %2805 = vmatpush3.msra.mxu0 %v2413_v27 }
  0x1d   : > { %307 = vst.msk [vmem:[#allocation2 + $0x99] sm:$0x1] %vm279_vm2, %v3116_v20  ;;  %308 = vst.msk [vmem:[#allocation2 + $0xa9] sm:$0x1] %vm279_vm2, %v3116_v20  ;;  %2806 = vmatprep.subr.mxu0 %v2412_v30 }
  0x1e   : > { %2798 = vmatmul.mubr.msk.f32.gmra.mxu0 %vm333_vm0, %v323_v15  ;;  %564 = vrot.lane.b32.xlu0 %v522_v16, %s3115_s11  ;;  %309 = vst.msk [vmem:[#allocation2 + $0xb9] sm:$0x1] %vm279_vm2, %v3116_v20  ;;  %310 = vst.msk [vmem:[#allocation2 + $0xc9] sm:$0x1] %vm279_vm2, %v3116_v20  ;;  %v2448_v16 = vld [vmem:[%s3933_s4 + $0xc0] sm:$0xff] }
  0x1f   : > { %566 = vrot.lane.b32.xlu1 %v523_v17, %s3115_s11  ;;  %311 = vst.msk [vmem:[#allocation2 + $0xd9] sm:$0x1] %vm279_vm2, %v3116_v20  ;;  %312 = vst.msk [vmem:[#allocation2 + $0xe9] sm:$0x1] %vm279_vm2, %v3116_v20  ;;  %2807 = vmatpush3.msra.mxu0 %v2412_v30 }
  0x20   : > { %313 = vst.msk [vmem:[#allocation2 + $0xf9] sm:$0x1] %vm279_vm2, %v3116_v20  ;;  %314 = vst.msk [vmem:[#allocation2 + $0x109] sm:$0x1] %vm279_vm2, %v3116_v20  ;;  %2832 = vmatprep.subr.mxu0 %v630_v54 }
  0x21   : > { %280 = vst.msk [vmem:[#allocation2] sm:$0x1] %vm279_vm2, %v3116_v20  ;;  %297 = vst.msk [vmem:[#allocation2 + $0x110] sm:$0x1] %vm279_vm2, %v3116_v20 }
  0x22   : > { %546 = vrot.lane.b32.xlu0 %v513_v18, %s3115_s11  ;;  %275 = vst.msk [vmem:[#allocation2 + $0x8] sm:$0x3] %vm274_vm4, %v3116_v20  ;;  %278 = vst.msk [vmem:[#allocation2 + $0x118] sm:$0x3] %vm274_vm4, %v3116_v20 }
  0x23   : > { %544 = vrot.lane.b32.xlu1 %v512_v19, %s3115_s11  ;;  %298 = vst.msk [vmem:[#allocation2 + $0x9] sm:$0x1] %vm279_vm2, %v3116_v20  ;;  %315 = vst.msk [vmem:[#allocation2 + $0x119] sm:$0x1] %vm279_vm2, %v3116_v20  ;;  %v2471_v19 = vld [vmem:[%s3933_s4 + $0x38] sm:$0xff] }
  0x24   : > { %v2491_v20 = vld [vmem:[%s3933_s4 + $0x98] sm:$0xff] }
  0x28   : > { %v609_v30 = vld [vmem:[#allocation2] sm:$0xff] }
  0x84   : > { %v553_v23 = vpop.permute.xlu0 %552 }
  0x85   : > { %v3281_v21 = vpop.permute.xlu1 %554 }
  0x88   : > { %v557_v28 = vpop.permute.xlu0 %556 }
  0x89   : > { %v3283_v22 = vpop.permute.xlu1 %558 }
  0x8c   : > { %v3305_v36 = vpop.permute.xlu0 %562 }
  0x8d   : > { %v3285_v24 = vpop.permute.xlu1 %560 }
  0x90   : > { %v565_v46 = vpop.permute.xlu0 %564 }
  0x91   : > { %v3296_v29 = vpop.permute.xlu1 %566 }
  0x94   : > { %v547_v61 = vpop.permute.xlu0 %546 }
  0x95   : > { %v545_v37 = vpop.permute.xlu1 %544 }
  0xd2   : > { %v2790_v32 = vpop.f32.mrf.mxu0 }
  0xd3   : > { %v430_v33 = vadd.f32 %v2790_v32, %v2403_v31 }
  0xd4   : > { %v424_v34 = vpop.f32.mrf.mxu0 }
  0xd5   : > { %498 = vst.msk [vmem:[#allocation2 + $0x31] sm:$0xff] %vm333_vm0, %v430_v33  ;;  %v425_v35 = vadd.f32 %v2403_v31, %v424_v34  ;;  %v2470_v34 = vld [vmem:[%s3933_s4 + $0x30] sm:$0xff] }
  0xd6   : > { %v2793_v38 = vpop.f32.mrf.mxu0 }
  0xd7   : > { %496 = vst.msk [vmem:[#allocation2 + $0x11] sm:$0xff] %vm333_vm0, %v425_v35  ;;  %v440_v39 = vadd.f32 %v2793_v38, %v2403_v31  ;;  %471 = vrot.lane.b32.xlu0 %v425_v35, %s3117_s24  ;;  %v2490_v38 = vld [vmem:[%s3933_s4 + $0x90] sm:$0xff] }
  0xd8   : > { %v434_v41 = vpop.f32.mrf.mxu0  ;;  %593 = vst.msk [vmem:[#allocation2 + $0x11] sm:$0xff] %vm592_vm3, %v545_v37  ;;  %v2468_v37 = vld [vmem:[%s3933_s4 + $0x20] sm:$0xff] }
  0xd9   : > { %502 = vst.msk [vmem:[#allocation2 + $0x71] sm:$0xff] %vm333_vm0, %v440_v39  ;;  %v435_v42 = vadd.f32 %v2403_v31, %v434_v41  ;;  %477 = vrot.lane.b32.xlu1 %v440_v39, %s3117_s24  ;;  %v2489_v39 = vld [vmem:[%s3933_s4 + $0x88] sm:$0xff]  ;;  %v2511_v41 = vld [vmem:[%s3933_s4 + $0xf8] sm:$0xff] }
  0xda   : > { %v2796_v43 = vpop.f32.mrf.mxu0  ;;  %599 = vst.msk [vmem:[#allocation2 + $0x71] sm:$0xff] %vm592_vm3, %v557_v28 }
  0xdb   : > { %500 = vst.msk [vmem:[#allocation2 + $0x51] sm:$0xff] %vm333_vm0, %v435_v42  ;;  %475 = vrot.lane.b32.xlu0 %v435_v42, %s3117_s24  ;;  %v450_v45 = vadd.f32 %v2796_v43, %v2403_v31  ;;  %v2531_v42 = vld [vmem:[%s3933_s4 + $0x58] sm:$0xff]  ;;  %v1146_v43 = vld [vmem:[#allocation2 + $0x1] sm:$0xff] }
  0xdc   : > { %v444_v47 = vpop.f32.mrf.mxu0  ;;  %597 = vst.msk [vmem:[#allocation2 + $0x51] sm:$0xff] %vm592_vm3, %v553_v23 }
  0xdd   : > { %506 = vst.msk [vmem:[#allocation2 + $0xb1] sm:$0xff] %vm333_vm0, %v450_v45  ;;  %570 = vrot.lane.b32.xlu1 %v525_v44, %s3115_s11  ;;  %v445_v49 = vadd.f32 %v2403_v31, %v444_v47 }
  0xde   : > { %v2799_v50 = vpop.f32.mrf.mxu0  ;;  %603 = vst.msk [vmem:[#allocation2 + $0xb1] sm:$0xff] %vm592_vm3, %v565_v46  ;;  %v2510_v46 = vld [vmem:[%s3933_s4 + $0xf0] sm:$0xff] }
  0xdf   : > { %504 = vst.msk [vmem:[#allocation2 + $0x91] sm:$0xff] %vm333_vm0, %v445_v49  ;;  %568 = vrot.lane.b32.xlu0 %v524_v48, %s3115_s11  ;;  %v460_v51 = vadd.f32 %v2799_v50, %v2403_v31  ;;  %v3329_v52 = vld [vmem:[#allocation2 + $0x10] sm:$0xff]  ;;  %v2509_v48 = vld [vmem:[%s3933_s4 + $0xe8] sm:$0xff]  ;;  %v2508_v50 = vld [vmem:[%s3933_s4 + $0xe0] sm:$0xff] }
  0xe0   : > { %v454_v53 = vpop.f32.mrf.mxu0  ;;  %601 = vst.msk [vmem:[#allocation2 + $0x91] sm:$0xff] %vm592_vm3, %v3285_v24  ;;  %2808 = vmatprep.mubr.msk.f32.mxu0 %vm272_vm1, %v3329_v52  ;;  %v1147_v44 = vld [vmem:[#allocation2 + $0x11] sm:$0xff] }
  0xe1   : > { %481 = vrot.lane.b32.xlu1 %v450_v45, %s3117_s24  ;;  %510 = vst.msk [vmem:[#allocation2 + $0xf1] sm:$0xff] %vm333_vm0, %v460_v51  ;;  %v455_v55 = vadd.f32 %v2403_v31, %v454_v53  ;;  %v3395_v11 = vld [vmem:[#allocation2 + $0x70] sm:$0xff] }
  0xe2   : > { %v626_v45 = vld [vmem:[#allocation2 + $0x110] sm:$0xff] }
  0xe3   : > { %479 = vrot.lane.b32.xlu0 %v445_v49, %s3117_s24  ;;  %508 = vst.msk [vmem:[#allocation2 + $0xd1] sm:$0xff] %vm333_vm0, %v455_v55  ;;  %v3343_v57 = vld [vmem:[#allocation2 + $0x50] sm:$0xff] }
  0xe4   : > { %2814 = vmatprep.mubr.msk.f32.mxu1 %vm272_vm1, %v3343_v57  ;;  %v1151_v53 = vld [vmem:[#allocation2 + $0x51] sm:$0xff] }
  0xe5   : > { %548 = vrot.lane.b32.xlu1 %v514_v56, %s3115_s11  ;;  %v3432_v25 = vld [vmem:[#allocation2 + $0xb0] sm:$0xff]  ;;  %v2528_v56 = vld [vmem:[%s3933_s4 + $0x40] sm:$0xff] }
  0xe7   : > { %473 = vrot.lane.b32.xlu0 %v430_v33, %s3117_s24  ;;  %v3415_v18 = vld [vmem:[#allocation2 + $0x90] sm:$0xff] }
  0xe9   : > { %483 = vrot.lane.b32.xlu1 %v455_v55, %s3117_s24 }
  0xeb   : > { %550 = vrot.lane.b32.xlu0 %v515_v58, %s3115_s11  ;;  %v2551_v58 = vld [vmem:[%s3933_s4 + $0xb8] sm:$0xff] }
  0xed   : > { %485 = vrot.lane.b32.xlu1 %v460_v51, %s3117_s24 }
  0xef   : > { %572 = vrot.lane.b32.xlu0 %v526_v59, %s3115_s11 }
  0xf1   : > { %574 = vrot.lane.b32.xlu1 %v527_v60, %s3115_s11  ;;  %v2571_v60 = vld [vmem:[%s3933_s4 + $0x118] sm:$0xff] }
 0x149   : > { %v472_v62 = vpop.permute.xlu0 %471 }
 0x14a   : > { %497 = vst.msk [vmem:[#allocation2 + $0x21] sm:$0xff] %vm333_vm0, %v472_v62 }
 0x14b   : > { %594 = vst.msk [vmem:[#allocation2 + $0x21] sm:$0xff] %vm592_vm3, %v547_v61  ;;  %v478_v63 = vpop.permute.xlu1 %477  ;;  %v1155_v61 = vld [vmem:[#allocation2 + $0x91] sm:$0xff] }
 0x14c   : > { %503 = vst.msk [vmem:[#allocation2 + $0x81] sm:$0xff] %vm333_vm0, %v478_v63  ;;  %v1157_v63 = vld [vmem:[#allocation2 + $0xb1] sm:$0xff] }
 0x14d   : > { %600 = vst.msk [vmem:[#allocation2 + $0x81] sm:$0xff] %vm592_vm3, %v3283_v22  ;;  %v476_v0 = vpop.permute.xlu0 %475 }
 0x14e   : > { %501 = vst.msk [vmem:[#allocation2 + $0x61] sm:$0xff] %vm333_vm0, %v476_v0 }
 0x14f   : > { %598 = vst.msk [vmem:[#allocation2 + $0x61] sm:$0xff] %vm592_vm3, %v3281_v21  ;;  %v571_v1 = vpop.permute.xlu1 %570 }
 0x151   : > { %v569_v2 = vpop.permute.xlu0 %568 }
 0x152   : > { %605 = vst.msk [vmem:[#allocation2 + $0xd1] sm:$0xff] %vm592_vm3, %v569_v2  ;;  %v3372_v3 = vld [vmem:[#allocation2 + $0x20] sm:$0xff] }
 0x153   : > { %v482_v5 = vpop.permute.xlu1 %481  ;;  %2809 = vmatmul.mubr.msk.f32.vlgmr.msra.gmra.mxu0 %vm272_vm1, %v3372_v3  ;;  %v3523_v47 = vld [vmem:[#allocation2 + $0x21] sm:$0xff] }
 0x154   : > { %507 = vst.msk [vmem:[#allocation2 + $0xc1] sm:$0xff] %vm333_vm0, %v482_v5  ;;  %2833 = vmatpush3.msra.mxu0 %v630_v54  ;;  %v3408_v15 = vld [vmem:[#allocation2 + $0x80] sm:$0xff]  ;;  %v2529_v54 = vld [vmem:[%s3933_s4 + $0x48] sm:$0xff] }
 0x155   : > { %604 = vst.msk [vmem:[#allocation2 + $0xc1] sm:$0xff] %vm592_vm3, %v3296_v29  ;;  %v480_v7 = vpop.permute.xlu0 %479  ;;  %2834 = vmatprep.subr.mxu0 %v629_v4  ;;  %v1154_v59 = vld [vmem:[#allocation2 + $0x81] sm:$0xff] }
 0x156   : > { %505 = vst.msk [vmem:[#allocation2 + $0xa1] sm:$0xff] %vm333_vm0, %v480_v7  ;;  %v3386_v8 = vld [vmem:[#allocation2 + $0x60] sm:$0xff]  ;;  %2835 = vmatpush3.msra.mxu0 %v629_v4  ;;  %v2550_v4 = vld [vmem:[%s3933_s4 + $0xb0] sm:$0xff]  ;;  %v2549_v7 = vld [vmem:[%s3933_s4 + $0xa8] sm:$0xff] }
 0x157   : > { %602 = vst.msk [vmem:[#allocation2 + $0xa1] sm:$0xff] %vm592_vm3, %v3305_v36  ;;  %v549_v10 = vpop.permute.xlu1 %548  ;;  %2815 = vmatmul.mubr.msk.f32.vlgmr.msra.gmra.mxu1 %vm272_vm1, %v3386_v8  ;;  %2836 = vmatprep.subr.mxu0 %v628_v6  ;;  %v2469_v36 = vld [vmem:[%s3933_s4 + $0x28] sm:$0xff] }
 0x158   : > { %595 = vst.msk [vmem:[#allocation2 + $0x31] sm:$0xff] %vm592_vm3, %v549_v10  ;;  %2817 = vmatprep.mubr.msk.f32.mxu1 %vm272_vm1, %v3395_v11  ;;  %2865 = vmatpush3.msra.mxu1 %v3312_v40  ;;  %v2488_v40 = vld [vmem:[%s3933_s4 + $0x80] sm:$0xff]  ;;  %v2570_v10 = vld [vmem:[%s3933_s4 + $0x110] sm:$0xff] }
 0x159   : > { %v474_v14 = vpop.permute.xlu0 %473  ;;  %2866 = vmatprep.subr.mxu1 %v2450_v9  ;;  %2837 = vmatpush3.msra.mxu0 %v628_v6  ;;  %v622_v29 = vld [vmem:[#allocation2 + $0xd0] sm:$0xff]  ;;  %v1152_v55 = vld [vmem:[#allocation2 + $0x61] sm:$0xff] }
 0x15a   : > { %499 = vst.msk [vmem:[#allocation2 + $0x41] sm:$0xff] %vm333_vm0, %v474_v14  ;;  %2867 = vmatpush3.msra.mxu1 %v2450_v9  ;;  %2838 = vmatprep.subr.mxu0 %v627_v12  ;;  %v1716_v5 = vld [vmem:[#allocation2 + $0x2] sm:$0xff]  ;;  %v1717_v9 = vld [vmem:[#allocation2 + $0x12] sm:$0xff] }
 0x15b   : > { %v484_v17 = vpop.permute.xlu1 %483  ;;  %2818 = vmatmul.mubr.msk.f32.gmra.mxu1 %vm272_vm1, %v3408_v15  ;;  %2868 = vmatprep.subr.mxu1 %v2449_v13  ;;  %v2568_v14 = vld [vmem:[%s3933_s4 + $0x100] sm:$0xff] }
 0x15c   : > { %509 = vst.msk [vmem:[#allocation2 + $0xe1] sm:$0xff] %vm333_vm0, %v484_v17  ;;  %2820 = vmatprep.mubr.msk.f32.mxu1 %vm272_vm1, %v3415_v18  ;;  %2869 = vmatpush3.msra.mxu1 %v2449_v13  ;;  %v621_v27 = vld [vmem:[#allocation2 + $0xc0] sm:$0xff] }
 0x15d   : > { %606 = vst.msk [vmem:[#allocation2 + $0xe1] sm:$0xff] %vm592_vm3, %v571_v1  ;;  %v551_v21 = vpop.permute.xlu0 %550  ;;  %2839 = vmatpush3.msra.mxu0 %v627_v12  ;;  %2870 = vmatprep.subr.mxu1 %v2448_v16  ;;  %v1158_v0 = vld [vmem:[#allocation2 + $0xc1] sm:$0xff]  ;;  %v1159_v1 = vld [vmem:[#allocation2 + $0xd1] sm:$0xff] }
 0x15e   : > { %596 = vst.msk [vmem:[#allocation2 + $0x41] sm:$0xff] %vm592_vm3, %v551_v21  ;;  %v3428_v22 = vld [vmem:[#allocation2 + $0xa0] sm:$0xff]  ;;  %2871 = vmatpush3.msra.mxu1 %v2448_v16  ;;  %2896 = vmatprep.subr.mxu0 %v2471_v19  ;;  %v2569_v12 = vld [vmem:[%s3933_s4 + $0x108] sm:$0xff]  ;;  %v1721_v16 = vld [vmem:[#allocation2 + $0x52] sm:$0xff] }
 0x15f   : > { %v486_v23 = vpop.permute.xlu1 %485  ;;  %2821 = vmatmul.mubr.msk.f32.gmra.mxu1 %vm272_vm1, %v3428_v22  ;;  %v612_v24 = vld [vmem:[#allocation2 + $0x30] sm:$0xff]  ;;  %2928 = vmatprep.subr.mxu1 %v2491_v20  ;;  %v1156_v62 = vld [vmem:[#allocation2 + $0xa1] sm:$0xff] }
 0x160   : > { %511 = vst.msk [vmem:[#allocation2 + $0x101] sm:$0xff] %vm333_vm0, %v486_v23  ;;  %2811 = vmatprep.mubr.msk.f32.mxu0 %vm272_vm1, %v612_v24  ;;  %2823 = vmatprep.mubr.msk.f32.mxu1 %vm272_vm1, %v3432_v25  ;;  %v1149_v49 = vld [vmem:[#allocation2 + $0x31] sm:$0xff]  ;;  %v1722_v17 = vld [vmem:[#allocation2 + $0x62] sm:$0xff] }
 0x161   : > { %v573_v26 = vpop.permute.xlu0 %572  ;;  %v1719_v13 = vld [vmem:[#allocation2 + $0x32] sm:$0xff]  ;;  %v1726_v21 = vld [vmem:[#allocation2 + $0xa2] sm:$0xff] }
 0x162   : > { %607 = vst.msk [vmem:[#allocation2 + $0xf1] sm:$0xff] %vm592_vm3, %v573_v26  ;;  %v1163_v23 = vld [vmem:[#allocation2 + $0x111] sm:$0xff] }
 0x163   : > { %v575_v28 = vpop.permute.xlu1 %574  ;;  %2824 = vmatmul.mubr.msk.f32.gmra.mxu1 %vm272_vm1, %v621_v27 }
 0x164   : > { %608 = vst.msk [vmem:[#allocation2 + $0x101] sm:$0xff] %vm592_vm3, %v575_v28  ;;  %2826 = vmatprep.mubr.msk.f32.mxu1 %vm272_vm1, %v622_v29  ;;  %v623_v32 = vld [vmem:[#allocation2 + $0xe0] sm:$0xff] }
 0x165   : > { %v613_v31 = vld [vmem:[#allocation2 + $0x40] sm:$0xff] }
 0x166   : > { %2812 = vmatmul.mubr.msk.f32.gmra.mxu0 %vm272_vm1, %v613_v31  ;;  %v1150_v51 = vld [vmem:[#allocation2 + $0x41] sm:$0xff] }
 0x167   : > { %2827 = vmatmul.mubr.msk.f32.gmra.mxu1 %vm272_vm1, %v623_v32  ;;  %2840 = vmatprep.mubr.msk.f32.mxu0 %vm272_vm1, %v609_v30  ;;  %v1160_v2 = vld [vmem:[#allocation2 + $0xe1] sm:$0xff] }
 0x168   : > { %v1730_v26 = vld [vmem:[#allocation2 + $0xe2] sm:$0xff] }
 0x169   : > { %v624_v33 = vld [vmem:[#allocation2 + $0xf0] sm:$0xff] }
 0x16a   : > { %2841 = vmatmul.mubr.msk.f32.vlgmr.msra.gmra.mxu0 %vm272_vm1, %v3329_v52  ;;  %2829 = vmatprep.mubr.msk.f32.mxu1 %vm272_vm1, %v624_v33  ;;  %v2530_v52 = vld [vmem:[%s3933_s4 + $0x50] sm:$0xff] }
 0x16b   : > { %2843 = vmatprep.mubr.msk.f32.mxu0 %vm272_vm1, %v3372_v3  ;;  %v625_v35 = vld [vmem:[#allocation2 + $0x100] sm:$0xff]  ;;  %2897 = vmatpush3.msra.mxu0 %v2471_v19 }
 0x16c   : > { %2830 = vmatmul.mubr.msk.f32.gmra.mxu1 %vm272_vm1, %v625_v35  ;;  %2898 = vmatprep.subr.mxu0 %v2470_v34  ;;  %v1162_v6 = vld [vmem:[#allocation2 + $0x101] sm:$0xff] }
 0x16d   : > { %2872 = vmatprep.mubr.msk.f32.mxu1 %vm272_vm1, %v3372_v3  ;;  %2899 = vmatpush3.msra.mxu0 %v2470_v34  ;;  %v1161_v3 = vld [vmem:[#allocation2 + $0xf1] sm:$0xff]  ;;  %v1724_v19 = vld [vmem:[#allocation2 + $0x82] sm:$0xff] }
 0x16e   : > { %2844 = vmatmul.mubr.msk.f32.gmra.mxu0 %vm272_vm1, %v612_v24  ;;  %2900 = vmatprep.subr.mxu0 %v2469_v36  ;;  %v1732_v28 = vld [vmem:[#allocation2 + $0x102] sm:$0xff] }
 0x16f   : > { %2846 = vmatprep.mubr.msk.f32.mxu0 %vm272_vm1, %v613_v31  ;;  %2901 = vmatpush3.msra.mxu0 %v2469_v36 }
 0x170   : > { %2873 = vmatmul.mubr.msk.f32.vlgmr.msra.gmra.mxu1 %vm272_vm1, %v612_v24  ;;  %2902 = vmatprep.subr.mxu0 %v2468_v37  ;;  %v1728_v24 = vld [vmem:[#allocation2 + $0xc2] sm:$0xff] }
 0x171   : > { %2929 = vmatpush3.msra.mxu1 %v2491_v20  ;;  %2875 = vmatprep.mubr.msk.f32.mxu1 %vm272_vm1, %v613_v31  ;;  %v1725_v20 = vld [vmem:[#allocation2 + $0x92] sm:$0xff] }
 0x172   : > { %2847 = vmatmul.mubr.msk.f32.gmra.mxu0 %vm272_vm1, %v3343_v57  ;;  %2930 = vmatprep.subr.mxu1 %v2490_v38 }
 0x173   : > { %2849 = vmatprep.mubr.msk.f32.mxu0 %vm272_vm1, %v3386_v8  ;;  %2931 = vmatpush3.msra.mxu1 %v2490_v38 }
 0x174   : > { %2876 = vmatmul.mubr.msk.f32.gmra.mxu1 %vm272_vm1, %v3343_v57  ;;  %2932 = vmatprep.subr.mxu1 %v2489_v39  ;;  %v1153_v57 = vld [vmem:[#allocation2 + $0x71] sm:$0xff] }
 0x175   : > { %2878 = vmatprep.mubr.msk.f32.mxu1 %vm272_vm1, %v3386_v8  ;;  %2933 = vmatpush3.msra.mxu1 %v2489_v39  ;;  %v2548_v8 = vld [vmem:[%s3933_s4 + $0xa0] sm:$0xff] }
 0x176   : > { %2850 = vmatmul.mubr.msk.f32.gmra.mxu0 %vm272_vm1, %v3395_v11  ;;  %2934 = vmatprep.subr.mxu1 %v2488_v40 }
 0x177   : > { %2852 = vmatprep.mubr.msk.f32.mxu0 %vm272_vm1, %v3408_v15  ;;  %2903 = vmatpush3.msra.mxu0 %v2468_v37 }
 0x178   : > { %2879 = vmatmul.mubr.msk.f32.gmra.mxu1 %vm272_vm1, %v3395_v11  ;;  %2960 = vmatprep.subr.mxu0 %v2511_v41  ;;  %v1718_v11 = vld [vmem:[#allocation2 + $0x22] sm:$0xff] }
 0x179   : > { %2881 = vmatprep.mubr.msk.f32.mxu1 %vm272_vm1, %v3408_v15  ;;  %2935 = vmatpush3.msra.mxu1 %v2488_v40  ;;  %v1720_v15 = vld [vmem:[#allocation2 + $0x42] sm:$0xff] }
 0x17a   : > { %2853 = vmatmul.mubr.msk.f32.gmra.mxu0 %vm272_vm1, %v3415_v18  ;;  %2992 = vmatprep.subr.mxu1 %v2531_v42 }
 0x17b   : > { %2855 = vmatprep.mubr.msk.f32.mxu0 %vm272_vm1, %v3428_v22 }
 0x17c   : > { %2882 = vmatmul.mubr.msk.f32.gmra.mxu1 %vm272_vm1, %v3415_v18  ;;  %v1723_v18 = vld [vmem:[#allocation2 + $0x72] sm:$0xff] }
 0x17d   : > { %2884 = vmatprep.mubr.msk.f32.mxu1 %vm272_vm1, %v3428_v22  ;;  %v1727_v22 = vld [vmem:[#allocation2 + $0xb2] sm:$0xff] }
 0x17e   : > { %2856 = vmatmul.mubr.msk.f32.gmra.mxu0 %vm272_vm1, %v3432_v25 }
 0x17f   : > { %2858 = vmatprep.mubr.msk.f32.mxu0 %vm272_vm1, %v621_v27 }
 0x180   : > { %2885 = vmatmul.mubr.msk.f32.gmra.mxu1 %vm272_vm1, %v3432_v25  ;;  %v1729_v25 = vld [vmem:[#allocation2 + $0xd2] sm:$0xff] }
 0x181   : > { %2887 = vmatprep.mubr.msk.f32.mxu1 %vm272_vm1, %v621_v27  ;;  %v1731_v27 = vld [vmem:[#allocation2 + $0xf2] sm:$0xff] }
 0x182   : > { %2859 = vmatmul.mubr.msk.f32.gmra.mxu0 %vm272_vm1, %v622_v29 }
 0x183   : > { %2861 = vmatprep.mubr.msk.f32.mxu0 %vm272_vm1, %v623_v32 }
 0x184   : > { %2888 = vmatmul.mubr.msk.f32.gmra.mxu1 %vm272_vm1, %v622_v29  ;;  %v1733_v29 = vld [vmem:[#allocation2 + $0x112] sm:$0xff] }
 0x185   : > { %2890 = vmatprep.mubr.msk.f32.mxu1 %vm272_vm1, %v623_v32 }
 0x186   : > { %2862 = vmatmul.mubr.msk.f32.gmra.mxu0 %vm272_vm1, %v624_v33 }
 0x187   : > { %2904 = vmatprep.mubr.msk.f32.mxu0 %vm272_vm1, %v1146_v43 }
 0x188   : > { %2891 = vmatmul.mubr.msk.f32.gmra.mxu1 %vm272_vm1, %v624_v33 }
 0x189   : > { %2893 = vmatprep.mubr.msk.f32.mxu1 %vm272_vm1, %v625_v35 }
 0x18a   : > { %2905 = vmatmul.mubr.msk.f32.vlgmr.msra.gmra.mxu0 %vm272_vm1, %v1147_v44 }
 0x18b   : > { %2907 = vmatprep.mubr.msk.f32.mxu0 %vm272_vm1, %v3523_v47  ;;  %2961 = vmatpush3.msra.mxu0 %v2511_v41 }
 0x18c   : > { %2894 = vmatmul.mubr.msk.f32.gmra.mxu1 %vm272_vm1, %v626_v45  ;;  %2962 = vmatprep.subr.mxu0 %v2510_v46 }
 0x18d   : > { %2936 = vmatprep.mubr.msk.f32.mxu1 %vm272_vm1, %v1147_v44  ;;  %2963 = vmatpush3.msra.mxu0 %v2510_v46 }
 0x18e   : > { %2908 = vmatmul.mubr.msk.f32.gmra.mxu0 %vm272_vm1, %v1149_v49  ;;  %2964 = vmatprep.subr.mxu0 %v2509_v48 }
 0x18f   : > { %2910 = vmatprep.mubr.msk.f32.mxu0 %vm272_vm1, %v1150_v51  ;;  %2965 = vmatpush3.msra.mxu0 %v2509_v48 }
 0x190   : > { %2937 = vmatmul.mubr.msk.f32.vlgmr.msra.gmra.mxu1 %vm272_vm1, %v3523_v47  ;;  %2966 = vmatprep.subr.mxu0 %v2508_v50 }
 0x191   : > { %2993 = vmatpush3.msra.mxu1 %v2531_v42  ;;  %2939 = vmatprep.mubr.msk.f32.mxu1 %vm272_vm1, %v1149_v49 }
 0x192   : > { %2911 = vmatmul.mubr.msk.f32.gmra.mxu0 %vm272_vm1, %v1151_v53  ;;  %2994 = vmatprep.subr.mxu1 %v2530_v52 }
 0x193   : > { %2913 = vmatprep.mubr.msk.f32.mxu0 %vm272_vm1, %v1152_v55  ;;  %2995 = vmatpush3.msra.mxu1 %v2530_v52 }
 0x194   : > { %2940 = vmatmul.mubr.msk.f32.gmra.mxu1 %vm272_vm1, %v1150_v51  ;;  %2996 = vmatprep.subr.mxu1 %v2529_v54 }
 0x195   : > { %2942 = vmatprep.mubr.msk.f32.mxu1 %vm272_vm1, %v1151_v53  ;;  %2997 = vmatpush3.msra.mxu1 %v2529_v54 }
 0x196   : > { %2914 = vmatmul.mubr.msk.f32.gmra.mxu0 %vm272_vm1, %v1153_v57  ;;  %2998 = vmatprep.subr.mxu1 %v2528_v56 }
 0x197   : > { %2916 = vmatprep.mubr.msk.f32.mxu0 %vm272_vm1, %v1154_v59  ;;  %2967 = vmatpush3.msra.mxu0 %v2508_v50 }
 0x198   : > { %2943 = vmatmul.mubr.msk.f32.gmra.mxu1 %vm272_vm1, %v1152_v55  ;;  %3024 = vmatprep.subr.mxu0 %v2551_v58 }
 0x199   : > { %2945 = vmatprep.mubr.msk.f32.mxu1 %vm272_vm1, %v1153_v57  ;;  %2999 = vmatpush3.msra.mxu1 %v2528_v56 }
 0x19a   : > { %2917 = vmatmul.mubr.msk.f32.gmra.mxu0 %vm272_vm1, %v1155_v61  ;;  %3056 = vmatprep.subr.mxu1 %v2571_v60 }
 0x19b   : > { %2919 = vmatprep.mubr.msk.f32.mxu0 %vm272_vm1, %v1156_v62 }
 0x19c   : > { %2946 = vmatmul.mubr.msk.f32.gmra.mxu1 %vm272_vm1, %v1154_v59 }
 0x19d   : > { %2948 = vmatprep.mubr.msk.f32.mxu1 %vm272_vm1, %v1155_v61 }
 0x19e   : > { %2920 = vmatmul.mubr.msk.f32.gmra.mxu0 %vm272_vm1, %v1157_v63 }
 0x19f   : > { %2922 = vmatprep.mubr.msk.f32.mxu0 %vm272_vm1, %v1158_v0 }
 0x1a0   : > { %2949 = vmatmul.mubr.msk.f32.gmra.mxu1 %vm272_vm1, %v1156_v62 }
 0x1a1   : > { %2951 = vmatprep.mubr.msk.f32.mxu1 %vm272_vm1, %v1157_v63 }
 0x1a2   : > { %2923 = vmatmul.mubr.msk.f32.gmra.mxu0 %vm272_vm1, %v1159_v1 }
 0x1a3   : > { %2925 = vmatprep.mubr.msk.f32.mxu0 %vm272_vm1, %v1160_v2 }
 0x1a4   : > { %2952 = vmatmul.mubr.msk.f32.gmra.mxu1 %vm272_vm1, %v1158_v0 }
 0x1a5   : > { %2954 = vmatprep.mubr.msk.f32.mxu1 %vm272_vm1, %v1159_v1 }
 0x1a6   : > { %2926 = vmatmul.mubr.msk.f32.gmra.mxu0 %vm272_vm1, %v1161_v3 }
 0x1a7   : > { %2968 = vmatprep.mubr.msk.f32.mxu0 %vm272_vm1, %v3523_v47 }
 0x1a8   : > { %2955 = vmatmul.mubr.msk.f32.gmra.mxu1 %vm272_vm1, %v1160_v2 }
 0x1a9   : > { %2957 = vmatprep.mubr.msk.f32.mxu1 %vm272_vm1, %v1161_v3 }
 0x1aa   : > { %2969 = vmatmul.mubr.msk.f32.vlgmr.msra.gmra.mxu0 %vm272_vm1, %v1149_v49 }
 0x1ab   : > { %2971 = vmatprep.mubr.msk.f32.mxu0 %vm272_vm1, %v1150_v51  ;;  %3025 = vmatpush3.msra.mxu0 %v2551_v58 }
 0x1ac   : > { %2958 = vmatmul.mubr.msk.f32.gmra.mxu1 %vm272_vm1, %v1162_v6  ;;  %3026 = vmatprep.subr.mxu0 %v2550_v4 }
 0x1ad   : > { %3000 = vmatprep.mubr.msk.f32.mxu1 %vm272_vm1, %v1716_v5  ;;  %3027 = vmatpush3.msra.mxu0 %v2550_v4 }
 0x1ae   : > { %2972 = vmatmul.mubr.msk.f32.gmra.mxu0 %vm272_vm1, %v1151_v53  ;;  %3028 = vmatprep.subr.mxu0 %v2549_v7 }
 0x1af   : > { %2974 = vmatprep.mubr.msk.f32.mxu0 %vm272_vm1, %v1152_v55  ;;  %3029 = vmatpush3.msra.mxu0 %v2549_v7 }
 0x1b0   : > { %3001 = vmatmul.mubr.msk.f32.vlgmr.msra.gmra.mxu1 %vm272_vm1, %v1717_v9  ;;  %3030 = vmatprep.subr.mxu0 %v2548_v8 }
 0x1b1   : > { %3057 = vmatpush3.msra.mxu1 %v2571_v60  ;;  %3003 = vmatprep.mubr.msk.f32.mxu1 %vm272_vm1, %v1718_v11 }
 0x1b2   : > { %2975 = vmatmul.mubr.msk.f32.gmra.mxu0 %vm272_vm1, %v1153_v57  ;;  %3058 = vmatprep.subr.mxu1 %v2570_v10 }
 0x1b3   : > { %2977 = vmatprep.mubr.msk.f32.mxu0 %vm272_vm1, %v1154_v59  ;;  %3059 = vmatpush3.msra.mxu1 %v2570_v10 }
 0x1b4   : > { %3004 = vmatmul.mubr.msk.f32.gmra.mxu1 %vm272_vm1, %v1719_v13  ;;  %3060 = vmatprep.subr.mxu1 %v2569_v12 }
 0x1b5   : > { %3006 = vmatprep.mubr.msk.f32.mxu1 %vm272_vm1, %v1720_v15  ;;  %3061 = vmatpush3.msra.mxu1 %v2569_v12 }
 0x1b6   : > { %2978 = vmatmul.mubr.msk.f32.gmra.mxu0 %vm272_vm1, %v1155_v61  ;;  %3062 = vmatprep.subr.mxu1 %v2568_v14 }
 0x1b7   : > { %2980 = vmatprep.mubr.msk.f32.mxu0 %vm272_vm1, %v1156_v62  ;;  %3031 = vmatpush3.msra.mxu0 %v2548_v8 }
 0x1b8   : > { %3007 = vmatmul.mubr.msk.f32.gmra.mxu1 %vm272_vm1, %v1721_v16 }
 0x1b9   : > { %3009 = vmatprep.mubr.msk.f32.mxu1 %vm272_vm1, %v1722_v17  ;;  %3063 = vmatpush3.msra.mxu1 %v2568_v14 }
 0x1ba   : > { %2981 = vmatmul.mubr.msk.f32.gmra.mxu0 %vm272_vm1, %v1157_v63 }
 0x1bb   : > { %2983 = vmatprep.mubr.msk.f32.mxu0 %vm272_vm1, %v1158_v0 }
 0x1bc   : > { %3010 = vmatmul.mubr.msk.f32.gmra.mxu1 %vm272_vm1, %v1723_v18 }
 0x1bd   : > { %3012 = vmatprep.mubr.msk.f32.mxu1 %vm272_vm1, %v1724_v19 }
 0x1be   : > { %2984 = vmatmul.mubr.msk.f32.gmra.mxu0 %vm272_vm1, %v1159_v1 }
 0x1bf   : > { %2986 = vmatprep.mubr.msk.f32.mxu0 %vm272_vm1, %v1160_v2 }
 0x1c0   : > { %3013 = vmatmul.mubr.msk.f32.gmra.mxu1 %vm272_vm1, %v1725_v20 }
 0x1c1   : > { %3015 = vmatprep.mubr.msk.f32.mxu1 %vm272_vm1, %v1726_v21 }
 0x1c2   : > { %2987 = vmatmul.mubr.msk.f32.gmra.mxu0 %vm272_vm1, %v1161_v3 }
 0x1c3   : > { %2989 = vmatprep.mubr.msk.f32.mxu0 %vm272_vm1, %v1162_v6 }
 0x1c4   : > { %3016 = vmatmul.mubr.msk.f32.gmra.mxu1 %vm272_vm1, %v1727_v22 }
 0x1c5   : > { %3018 = vmatprep.mubr.msk.f32.mxu1 %vm272_vm1, %v1728_v24 }
 0x1c6   : > { %2990 = vmatmul.mubr.msk.f32.gmra.mxu0 %vm272_vm1, %v1163_v23 }
 0x1c7   : > { %3032 = vmatprep.mubr.msk.f32.mxu0 %vm272_vm1, %v1717_v9 }
 0x1c8   : > { %3019 = vmatmul.mubr.msk.f32.gmra.mxu1 %vm272_vm1, %v1729_v25 }
 0x1c9   : > { %3021 = vmatprep.mubr.msk.f32.mxu1 %vm272_vm1, %v1730_v26 }
 0x1ca   : > { %3033 = vmatmul.mubr.msk.f32.vlgmr.msra.gmra.mxu0 %vm272_vm1, %v1718_v11 }
 0x1cb   : > { %3035 = vmatprep.mubr.msk.f32.mxu0 %vm272_vm1, %v1719_v13 }
 0x1cc   : > { %3022 = vmatmul.mubr.msk.f32.gmra.mxu1 %vm272_vm1, %v1731_v27 }
 0x1cd   : > { %3064 = vmatprep.mubr.msk.f32.mxu1 %vm272_vm1, %v1718_v11 }
 0x1ce   : > { %3036 = vmatmul.mubr.msk.f32.gmra.mxu0 %vm272_vm1, %v1720_v15 }
 0x1cf   : > { %3038 = vmatprep.mubr.msk.f32.mxu0 %vm272_vm1, %v1721_v16 }
 0x1d0   : > { %3065 = vmatmul.mubr.msk.f32.vlgmr.msra.gmra.mxu1 %vm272_vm1, %v1719_v13 }
 0x1d1   : > { %3067 = vmatprep.mubr.msk.f32.mxu1 %vm272_vm1, %v1720_v15 }
 0x1d2   : > { %3039 = vmatmul.mubr.msk.f32.gmra.mxu0 %vm272_vm1, %v1722_v17 }
 0x1d3   : > { %3041 = vmatprep.mubr.msk.f32.mxu0 %vm272_vm1, %v1723_v18 }
 0x1d4   : > { %3068 = vmatmul.mubr.msk.f32.gmra.mxu1 %vm272_vm1, %v1721_v16 }
 0x1d5   : > { %3070 = vmatprep.mubr.msk.f32.mxu1 %vm272_vm1, %v1722_v17 }
 0x1d6   : > { %3042 = vmatmul.mubr.msk.f32.gmra.mxu0 %vm272_vm1, %v1724_v19 }
 0x1d7   : > { %3044 = vmatprep.mubr.msk.f32.mxu0 %vm272_vm1, %v1725_v20 }
 0x1d8   : > { %3071 = vmatmul.mubr.msk.f32.gmra.mxu1 %vm272_vm1, %v1723_v18 }
 0x1d9   : > { %3073 = vmatprep.mubr.msk.f32.mxu1 %vm272_vm1, %v1724_v19 }
 0x1da   : > { %3045 = vmatmul.mubr.msk.f32.gmra.mxu0 %vm272_vm1, %v1726_v21 }
 0x1db   : > { %3047 = vmatprep.mubr.msk.f32.mxu0 %vm272_vm1, %v1727_v22 }
 0x1dc   : > { %3074 = vmatmul.mubr.msk.f32.gmra.mxu1 %vm272_vm1, %v1725_v20 }
 0x1dd   : > { %3076 = vmatprep.mubr.msk.f32.mxu1 %vm272_vm1, %v1726_v21 }
 0x1de   : > { %3048 = vmatmul.mubr.msk.f32.gmra.mxu0 %vm272_vm1, %v1728_v24 }
 0x1df   : > { %3050 = vmatprep.mubr.msk.f32.mxu0 %vm272_vm1, %v1729_v25 }
 0x1e0   : > { %3077 = vmatmul.mubr.msk.f32.gmra.mxu1 %vm272_vm1, %v1727_v22 }
 0x1e1   : > { %3079 = vmatprep.mubr.msk.f32.mxu1 %vm272_vm1, %v1728_v24 }
 0x1e2   : > { %3051 = vmatmul.mubr.msk.f32.gmra.mxu0 %vm272_vm1, %v1730_v26 }
 0x1e3   : > { %3053 = vmatprep.mubr.msk.f32.mxu0 %vm272_vm1, %v1731_v27 }
 0x1e4   : > { %3080 = vmatmul.mubr.msk.f32.gmra.mxu1 %vm272_vm1, %v1729_v25 }
 0x1e5   : > { %3082 = vmatprep.mubr.msk.f32.mxu1 %vm272_vm1, %v1730_v26 }
 0x1e6   : > { %3054 = vmatmul.mubr.msk.f32.gmra.mxu0 %vm272_vm1, %v1732_v28 }
 0x1e8   : > { %3083 = vmatmul.mubr.msk.f32.gmra.mxu1 %vm272_vm1, %v1731_v27 }
 0x1e9   : > { %3085 = vmatprep.mubr.msk.f32.mxu1 %vm272_vm1, %v1732_v28 }
 0x1ec   : > { %3086 = vmatmul.mubr.msk.f32.gmra.mxu1 %vm272_vm1, %v1733_v29 }
 0x213   : > { %v2810_v35 = vpop.f32.mrf.mxu0 }
 0x215   : > { %v750_v38 = vpop.f32.mrf.mxu0 }
 0x217   : > { %v2816_v30 = vpop.f32.mrf.mxu1 }
 0x219   : > { %v770_v31 = vpop.f32.mrf.mxu1 }
 0x21b   : > { %v2819_v32 = vpop.f32.mrf.mxu1 }
 0x21d   : > { %v780_v33 = vpop.f32.mrf.mxu1 }
 0x21f   : > { %v2822_v34 = vpop.f32.mrf.mxu1 }
 0x221   : > { %v790_v36 = vpop.f32.mrf.mxu1 }
 0x223   : > { %v2825_v37 = vpop.f32.mrf.mxu1 }
 0x225   : > { %v800_v39 = vpop.f32.mrf.mxu1 }
 0x226   : > { %v2813_v40 = vpop.f32.mrf.mxu0 }
 0x227   : > { %v2828_v41 = vpop.f32.mrf.mxu1 }
 0x228   : > { %v760_v42 = vpop.f32.mrf.mxu0 }
 0x229   : > { %v810_v43 = vpop.f32.mrf.mxu1 }
 0x22a   : > { %v2842_v44 = vpop.f32.mrf.mxu0 }
 0x22b   : > { %v904_v45 = vadd.f32 %v2842_v44, %v2810_v35 }
 0x22c   : > { %v2831_v46 = vpop.f32.mrf.mxu1  ;;  %v898_v47 = vpop.f32.mrf.mxu0 }
 0x22d   : > { %v899_v48 = vadd.f32 %v898_v47, %v750_v38 }
 0x22e   : > { %v820_v49 = vpop.f32.mrf.mxu1  ;;  %v2845_v50 = vpop.f32.mrf.mxu0 }
 0x22f   : > { %v914_v51 = vadd.f32 %v2845_v50, %v2813_v40 }
 0x230   : > { %v908_v52 = vpop.f32.mrf.mxu0  ;;  %v2874_v53 = vpop.f32.mrf.mxu1 }
 0x231   : > { %v909_v54 = vadd.f32 %v908_v52, %v760_v42  ;;  %v3662_v55 = vadd.f32 %v2874_v53, %v904_v45 }
 0x232   : > { %v2848_v56 = vpop.f32.mrf.mxu0  ;;  %v1051_v57 = vpop.f32.mrf.mxu1 }
 0x233   : > { %v924_v58 = vadd.f32 %v2848_v56, %v2816_v30  ;;  %v3664_v59 = vadd.f32 %v1051_v57, %v899_v48 }
 0x234   : > { %v918_v60 = vpop.f32.mrf.mxu0  ;;  %v2877_v61 = vpop.f32.mrf.mxu1 }
 0x235   : > { %v919_v62 = vadd.f32 %v918_v60, %v770_v31  ;;  %v3666_v63 = vadd.f32 %v2877_v61, %v914_v51 }
 0x236   : > { %v2851_v0 = vpop.f32.mrf.mxu0  ;;  %v1061_v1 = vpop.f32.mrf.mxu1 }
 0x237   : > { %v934_v2 = vadd.f32 %v2851_v0, %v2819_v32  ;;  %v3668_v3 = vadd.f32 %v1061_v1, %v909_v54 }
 0x238   : > { %v928_v4 = vpop.f32.mrf.mxu0  ;;  %v2880_v5 = vpop.f32.mrf.mxu1 }
 0x239   : > { %v929_v6 = vadd.f32 %v928_v4, %v780_v33  ;;  %v3670_v7 = vadd.f32 %v2880_v5, %v924_v58 }
 0x23a   : > { %v2854_v8 = vpop.f32.mrf.mxu0  ;;  %v1071_v9 = vpop.f32.mrf.mxu1 }
 0x23b   : > { %v944_v10 = vadd.f32 %v2854_v8, %v2822_v34  ;;  %v3672_v11 = vadd.f32 %v1071_v9, %v919_v62 }
 0x23c   : > { %v938_v12 = vpop.f32.mrf.mxu0  ;;  %v2883_v13 = vpop.f32.mrf.mxu1 }
 0x23d   : > { %v939_v14 = vadd.f32 %v938_v12, %v790_v36  ;;  %v3674_v15 = vadd.f32 %v2883_v13, %v934_v2 }
 0x23e   : > { %v2857_v16 = vpop.f32.mrf.mxu0  ;;  %v1081_v17 = vpop.f32.mrf.mxu1 }
 0x23f   : > { %v954_v18 = vadd.f32 %v2857_v16, %v2825_v37  ;;  %v3676_v19 = vadd.f32 %v1081_v17, %v929_v6 }
 0x240   : > { %v948_v20 = vpop.f32.mrf.mxu0  ;;  %v2886_v21 = vpop.f32.mrf.mxu1 }
 0x241   : > { %v949_v22 = vadd.f32 %v948_v20, %v800_v39  ;;  %v3678_v23 = vadd.f32 %v2886_v21, %v944_v10 }
 0x242   : > { %v2860_v24 = vpop.f32.mrf.mxu0  ;;  %v1091_v25 = vpop.f32.mrf.mxu1 }
 0x243   : > { %v964_v26 = vadd.f32 %v2860_v24, %v2828_v41  ;;  %v3680_v27 = vadd.f32 %v1091_v25, %v939_v14 }
 0x244   : > { %v958_v28 = vpop.f32.mrf.mxu0  ;;  %v2889_v29 = vpop.f32.mrf.mxu1 }
 0x245   : > { %v959_v30 = vadd.f32 %v958_v28, %v810_v43  ;;  %v3682_v31 = vadd.f32 %v2889_v29, %v954_v18 }
 0x246   : > { %v2863_v32 = vpop.f32.mrf.mxu0  ;;  %v1101_v33 = vpop.f32.mrf.mxu1 }
 0x247   : > { %v974_v34 = vadd.f32 %v2863_v32, %v2831_v46  ;;  %v3684_v35 = vadd.f32 %v1101_v33, %v949_v22 }
 0x248   : > { %v968_v36 = vpop.f32.mrf.mxu0  ;;  %v2892_v37 = vpop.f32.mrf.mxu1 }
 0x249   : > { %v969_v38 = vadd.f32 %v968_v36, %v820_v49  ;;  %v3686_v39 = vadd.f32 %v2892_v37, %v964_v26 }
 0x24a   : > { %v1111_v40 = vpop.f32.mrf.mxu1  ;;  %v3688_v42 = vpop.f32.mrf.mxu0 }
 0x24b   : > { %3936 = vst [vmem:[#allocation3_spill] sm:$0xff] %v3686_v39  ;;  %v3690_v41 = vadd.f32 %v1111_v40, %v959_v30 }
 0x24c   : > { %v2895_v44 = vpop.f32.mrf.mxu1  ;;  %v3692_v45 = vpop.f32.mrf.mxu0 }
 0x24d   : > { %3937 = vst [vmem:[#allocation4_spill] sm:$0xff] %v3690_v41  ;;  %v3694_v43 = vadd.f32 %v2895_v44, %v974_v34 }
 0x24e   : > { %v1121_v47 = vpop.f32.mrf.mxu1  ;;  %v3696_v48 = vpop.f32.mrf.mxu0 }
 0x24f   : > { %3938 = vst [vmem:[#allocation5_spill] sm:$0xff] %v3694_v43  ;;  %v3698_v46 = vadd.f32 %v1121_v47, %v969_v38 }
 0x250   : > { %v3700_v50 = vpop.f32.mrf.mxu0  ;;  %v2938_v49 = vpop.f32.mrf.mxu1 }
 0x251   : > { %3939 = vst [vmem:[#allocation6_spill] sm:$0xff] %v3698_v46 }
 0x252   : > { %v3702_v51 = vpop.f32.mrf.mxu0  ;;  %v1452_v52 = vpop.f32.mrf.mxu1 }
 0x254   : > { %v3704_v53 = vpop.f32.mrf.mxu0  ;;  %v3706_v54 = vpop.f32.mrf.mxu1 }
 0x256   : > { %v3708_v56 = vpop.f32.mrf.mxu0  ;;  %v3710_v57 = vpop.f32.mrf.mxu1 }
 0x258   : > { %v3712_v58 = vpop.f32.mrf.mxu0  ;;  %v3714_v60 = vpop.f32.mrf.mxu1 }
 0x25a   : > { %v3716_v61 = vpop.f32.mrf.mxu0  ;;  %v3718_v62 = vpop.f32.mrf.mxu1 }
 0x25c   : > { %v3720_v0 = vpop.f32.mrf.mxu0  ;;  %v3722_v1 = vpop.f32.mrf.mxu1 }
 0x25e   : > { %v3724_v2 = vpop.f32.mrf.mxu0  ;;  %v3726_v4 = vpop.f32.mrf.mxu1 }
 0x260   : > { %v3728_v5 = vpop.f32.mrf.mxu0  ;;  %v3730_v6 = vpop.f32.mrf.mxu1 }
 0x262   : > { %v3732_v8 = vpop.f32.mrf.mxu0  ;;  %v3734_v9 = vpop.f32.mrf.mxu1 }
 0x263   : > { %3940 = vst [vmem:[#allocation7_spill] sm:$0xff] %v3732_v8 }
 0x264   : > { %v3736_v10 = vpop.f32.mrf.mxu0  ;;  %v3738_v12 = vpop.f32.mrf.mxu1 }
 0x265   : > { %3941 = vst [vmem:[#allocation8_spill] sm:$0xff] %v3736_v10 }
 0x266   : > { %v3740_v13 = vpop.f32.mrf.mxu0  ;;  %v3742_v14 = vpop.f32.mrf.mxu1 }
 0x267   : > { %3942 = vst [vmem:[#allocation9_spill] sm:$0xff] %v3740_v13  ;;  %3943 = vst [vmem:[#allocation10_spill] sm:$0xff] %v3742_v14 }
 0x268   : > { %v3744_v16 = vpop.f32.mrf.mxu0  ;;  %v3746_v17 = vpop.f32.mrf.mxu1 }
 0x269   : > { %3944 = vst [vmem:[#allocation11_spill] sm:$0xff] %v3744_v16  ;;  %3945 = vst [vmem:[#allocation12_spill] sm:$0xff] %v3746_v17 }
 0x26a   : > { %v3748_v18 = vpop.f32.mrf.mxu1  ;;  %v2970_v20 = vpop.f32.mrf.mxu0 }
 0x26b   : > { %3946 = vst [vmem:[#allocation13_spill] sm:$0xff] %v3748_v18 }
 0x26c   : > { %v3750_v21 = vpop.f32.mrf.mxu1  ;;  %v1621_v22 = vpop.f32.mrf.mxu0 }
 0x26d   : > { %3947 = vst [vmem:[#allocation14_spill] sm:$0xff] %v3750_v21 }
 0x26e   : > { %v3752_v24 = vpop.f32.mrf.mxu1  ;;  %v2973_v25 = vpop.f32.mrf.mxu0 }
 0x26f   : > { %3948 = vst [vmem:[#allocation15_spill] sm:$0xff] %v3752_v24 }
 0x270   : > { %v1631_v26 = vpop.f32.mrf.mxu0  ;;  %v3002_v28 = vpop.f32.mrf.mxu1 }
 0x272   : > { %v2976_v29 = vpop.f32.mrf.mxu0  ;;  %v1853_v30 = vpop.f32.mrf.mxu1 }
 0x274   : > { %v3754_v32 = vpop.f32.mrf.mxu0  ;;  %v3005_v33 = vpop.f32.mrf.mxu1 }
 0x276   : > { %v3756_v34 = vpop.f32.mrf.mxu0  ;;  %v1863_v36 = vpop.f32.mrf.mxu1 }
 0x278   : > { %v3758_v37 = vpop.f32.mrf.mxu0  ;;  %v3008_v38 = vpop.f32.mrf.mxu1 }
 0x27a   : > { %v3760_v40 = vpop.f32.mrf.mxu0  ;;  %v3762_v44 = vpop.f32.mrf.mxu1 }
 0x27c   : > { %v3764_v47 = vpop.f32.mrf.mxu0  ;;  %v3766_v24 = vpop.f32.mrf.mxu1 }
 0x27d   : > { %3949 = vst [vmem:[#allocation16_spill] sm:$0xff] %v3764_v47 }
 0x27e   : > { %v3768_v21 = vpop.f32.mrf.mxu0  ;;  %v3770_v16 = vpop.f32.mrf.mxu1 }
 0x27f   : > { %3950 = vst [vmem:[#allocation17_spill] sm:$0xff] %v3768_v21  ;;  %v1363_v21 = vadd.f32 %v3688_v42, %v3662_v55  ;;  %v1364_v55 = vadd.f32 %v3700_v50, %v3668_v3 }
 0x280   : > { %v3772_v46 = vpop.f32.mrf.mxu0  ;;  %v3774_v18 = vpop.f32.mrf.mxu1 }
 0x281   : > { %3951 = vst [vmem:[#allocation18_spill] sm:$0xff] %v3772_v46  ;;  %3952 = vst [vmem:[#allocation19_spill] sm:$0xff] %v3774_v18  ;;  %v1532_v39 = vadd.f32 %v2938_v49, %v1363_v21 }
 0x282   : > { %v3776_v13 = vpop.f32.mrf.mxu0  ;;  %v3778_v43 = vpop.f32.mrf.mxu1 }
 0x283   : > { %3953 = vst [vmem:[#allocation20_spill] sm:$0xff] %v3776_v13  ;;  %3954 = vst [vmem:[#allocation21_spill] sm:$0xff] %v3778_v43  ;;  %v1362_v13 = vadd.f32 %v3692_v45, %v3664_v59  ;;  %v1701_v18 = vadd.f32 %v2970_v20, %v1532_v39  ;;  %v1367_v59 = vadd.f32 %v3702_v51, %v3670_v7  ;;  %v3816_v7 = vld [vmem:[%s3934_s5] ss:$0 sm:$0xff] }
 0x284   : > { %v3780_v17 = vpop.f32.mrf.mxu0  ;;  %v3782_v10 = vpop.f32.mrf.mxu1 }
 0x285   : > { %3955 = vst [vmem:[#allocation22_spill] sm:$0xff] %v3780_v17  ;;  %3956 = vst [vmem:[#allocation23_spill] sm:$0xff] %v3782_v10  ;;  %v1365_v10 = vadd.f32 %v3696_v48, %v3666_v63  ;;  %v1533_v63 = vadd.f32 %v3710_v57, %v1364_v55  ;;  %v1536_v3 = vadd.f32 %v3714_v60, %v1367_v59 }
 0x286   : > { %v3784_v41 = vpop.f32.mrf.mxu0  ;;  %v3786_v14 = vpop.f32.mrf.mxu1 }
 0x287   : > { %3957 = vst [vmem:[#allocation24_spill] sm:$0xff] %v3784_v41  ;;  %3958 = vst [vmem:[#allocation25_spill] sm:$0xff] %v3786_v14  ;;  %v1531_v41 = vadd.f32 %v1452_v52, %v1362_v13  ;;  %v1534_v42 = vadd.f32 %v3706_v54, %v1365_v10  ;;  %v1366_v13 = vadd.f32 %v3704_v53, %v3672_v11 }
 0x288   : > { %v3790_v8 = vpop.f32.mrf.mxu0  ;;  %v3792_v46 = vpop.f32.mrf.mxu1  ;;  %v1702_v51 = vadd.f32 %v1631_v26, %v1533_v63  ;;  %v1369_v11 = vadd.f32 %v3708_v56, %v3674_v15  ;;  %v1705_v53 = vadd.f32 %v2976_v29, %v1536_v3  ;;  %v1372_v3 = vadd.f32 %v3728_v5, %v3684_v35  ;;  %v3966_v5 = vld [vmem:[#allocation17_spill] sm:$0xff] }
 0x289   : > { %3959 = vst [vmem:[#allocation26_spill] sm:$0xff] %v3790_v8  ;;  %3960 = vst [vmem:[#allocation27_spill] sm:$0xff] %v3792_v46  ;;  %v1700_v8 = vadd.f32 %v1621_v22, %v1531_v41  ;;  %v1933_v46 = vadd.f32 %v3002_v28, %v1701_v18  ;;  %v1703_v39 = vadd.f32 %v2973_v25, %v1534_v42 }
 0x28a   : > { %v3796_v43 = vpop.f32.mrf.mxu1  ;;  %v3034_v17 = vpop.f32.mrf.mxu0  ;;  %v1368_v22 = vadd.f32 %v3712_v58, %v3676_v19  ;;  %v1538_v25 = vadd.f32 %v3722_v1, %v1369_v11  ;;  %v1937_v28 = vadd.f32 %v3008_v38, %v1705_v53  ;;  %v1370_v42 = vadd.f32 %v3720_v0, %v3680_v27  ;;  %v3964_v11 = vld [vmem:[#allocation7_spill] sm:$0xff]  ;;  %v3965_v53 = vld [vmem:[#allocation10_spill] sm:$0xff] }
 0x28b   : > { %v1932_v48 = vadd.f32 %v1853_v30, %v1700_v8  ;;  %v2102_v52 = vadd.f32 %v3034_v17, %v1933_v46  ;;  %v1935_v54 = vadd.f32 %v3005_v33, %v1703_v39  ;;  %v1535_v46 = vadd.f32 %v3718_v62, %v1366_v13 }
 0x28c   : > { %v3800_v14 = vpop.f32.mrf.mxu1  ;;  %v2022_v47 = vpop.f32.mrf.mxu0  ;;  %v1934_v8 = vadd.f32 %v1863_v36, %v1702_v51  ;;  %v1371_v33 = vadd.f32 %v3716_v61, %v3678_v23  ;;  %v1537_v36 = vadd.f32 %v3726_v4, %v1368_v22  ;;  %v1707_v19 = vadd.f32 %v3756_v34, %v1538_v25  ;;  %v3968_v25 = vld [vmem:[#allocation4_spill] sm:$0xff] }
 0x28d   : > { %v2101_v10 = vadd.f32 %v2022_v47, %v1932_v48  ;;  %v1704_v26 = vadd.f32 %v3754_v32, %v1535_v46  ;;  %v1373_v39 = vadd.f32 %v3724_v2, %v3682_v31  ;;  %v1539_v27 = vadd.f32 %v3734_v9, %v1370_v42  ;;  %v3961_v2 = vld [vmem:[#allocation16_spill] sm:$0xff]  ;;  %v3975_v42 = vld [vmem:[#allocation13_spill] sm:$0xff] }
 0x28e   : > { %v3807_v45 = vpop.f32.mrf.mxu1  ;;  %v3037_v49 = vpop.f32.mrf.mxu0  ;;  %v1540_v23 = vadd.f32 %v3730_v6, %v1371_v33  ;;  %v1706_v61 = vadd.f32 %v3758_v37, %v1537_v36  ;;  %v1939_v59 = vadd.f32 %v3766_v24, %v1707_v19  ;;  %v1541_v35 = vadd.f32 %v3965_v53, %v1372_v3  ;;  %v3972_v36 = vld [vmem:[#allocation23_spill] sm:$0xff] }
 0x28f   : > { %v2104_v17 = vadd.f32 %v3037_v49, %v1935_v54  ;;  %v1936_v32 = vadd.f32 %v3762_v44, %v1704_v26  ;;  %v1542_v31 = vadd.f32 %v3738_v12, %v1373_v39  ;;  %v1708_v9 = vadd.f32 %v3961_v2, %v1539_v27  ;;  %v3969_v26 = vld [vmem:[#allocation8_spill] sm:$0xff] }
 0x290   : > { %v2032_v50 = vpop.f32.mrf.mxu0  ;;  %v3066_v41 = vpop.f32.mrf.mxu1  ;;  %v1709_v0 = vadd.f32 %v3760_v40, %v1540_v23  ;;  %v1938_v48 = vadd.f32 %v3770_v16, %v1706_v61  ;;  %v3976_v61 = vld [vmem:[#allocation20_spill] sm:$0xff]  ;;  %v3982_v2 = vld [vmem:[#allocation27_spill] sm:$0xff] }
 0x291   : > { %v2271_v18 = vadd.f32 %v3066_v41, %v2102_v52  ;;  %v2103_v62 = vadd.f32 %v2032_v50, %v1934_v8  ;;  %v3962_v41 = vld [vmem:[#allocation19_spill] sm:$0xff]  ;;  %v1711_v12 = vadd.f32 %v3966_v5, %v1542_v31  ;;  %v3967_v8 = vld [vmem:[#allocation21_spill] sm:$0xff] }
 0x292   : > { %v3040_v57 = vpop.f32.mrf.mxu0  ;;  %v2191_v60 = vpop.f32.mrf.mxu1  ;;  %v1941_v51 = vadd.f32 %v3962_v41, %v1709_v0  ;;  %v3978_v0 = vld [vmem:[#allocation6_spill] sm:$0xff] }
 0x293   : > { %v2294_v20 = vadd.f32 %v3816_v7, %v2271_v18  ;;  %v2270_v21 = vadd.f32 %v2191_v60, %v2101_v10  ;;  %v2106_v47 = vadd.f32 %v3040_v57, %v1937_v28  ;;  %v3963_v18 = vld [vmem:[#allocation3_spill] sm:$0xff]  ;;  %v1943_v19 = vadd.f32 %v3972_v36, %v1711_v12  ;;  %v3985_v12 = vld [vmem:[#allocation26_spill] sm:$0xff] }
 0x294   : > { %v2042_v15 = vpop.f32.mrf.mxu0  ;;  %v3069_v56 = vpop.f32.mrf.mxu1  ;;  %v1375_v46 = vadd.f32 %v3964_v11, %v3963_v18 }
 0x295   : > { %2310 = vst.msk [vmem:[%s3823_s7 + $0x8] sm:$0xff] %vm333_vm0, %v2294_v20  ;;  %v2293_v29 = vadd.f32 %v3816_v7, %v2270_v21  ;;  %v2273_v30 = vadd.f32 %v3069_v56, %v2104_v17  ;;  %v2105_v49 = vadd.f32 %v2042_v15, %v1936_v32  ;;  %v1940_v17 = vadd.f32 %v3967_v8, %v1708_v9  ;;  %v3970_v56 = vld [vmem:[#allocation12_spill] sm:$0xff] }
 0x296   : > { %v3043_v58 = vpop.f32.mrf.mxu0  ;;  %v2201_v1 = vpop.f32.mrf.mxu1  ;;  %v1374_v15 = vadd.f32 %v3969_v26, %v3968_v25  ;;  %v1544_v28 = vadd.f32 %v3970_v56, %v1375_v46 }
 0x297   : > { %2309 = vst.msk [vmem:[%s3823_s7] sm:$0xff] %vm333_vm0, %v2293_v29  ;;  %v2296_v38 = vadd.f32 %v3816_v7, %v2273_v30  ;;  %v2272_v55 = vadd.f32 %v2201_v1, %v2103_v62  ;;  %v2108_v52 = vadd.f32 %v3043_v58, %v1939_v59  ;;  %v3971_v62 = vld [vmem:[#allocation18_spill] sm:$0xff] }
 0x298   : > { %v2052_v4 = vpop.f32.mrf.mxu0  ;;  %v3072_v34 = vpop.f32.mrf.mxu1  ;;  %v1710_v29 = vadd.f32 %v3971_v62, %v1541_v35  ;;  %v1543_v23 = vadd.f32 %v3975_v42, %v1374_v15 }
 0x299   : > { %2312 = vst.msk [vmem:[%s3823_s7 + $0x18] sm:$0xff] %vm333_vm0, %v2296_v38  ;;  %v2295_v44 = vadd.f32 %v3816_v7, %v2272_v55  ;;  %v2275_v63 = vadd.f32 %v3072_v34, %v2106_v47  ;;  %v2107_v54 = vadd.f32 %v2052_v4, %v1938_v48  ;;  %v3973_v47 = vld [vmem:[#allocation5_spill] sm:$0xff]  ;;  %v1713_v4 = vadd.f32 %v3976_v61, %v1544_v28  ;;  %v3980_v48 = vld [vmem:[#allocation14_spill] sm:$0xff] }
 0x29a   : > { %v3046_v6 = vpop.f32.mrf.mxu0  ;;  %v2211_v37 = vpop.f32.mrf.mxu1  ;;  %v3974_v38 = vld [vmem:[#allocation9_spill] sm:$0xff] }
 0x29b   : > { %2311 = vst.msk [vmem:[%s3823_s7 + $0x10] sm:$0xff] %vm333_vm0, %v2295_v44  ;;  %v2298_v24 = vadd.f32 %v3816_v7, %v2275_v63  ;;  %v2274_v13 = vadd.f32 %v2211_v37, %v2105_v49  ;;  %v2110_v20 = vadd.f32 %v3046_v6, %v1941_v51  ;;  %v1377_v55 = vadd.f32 %v3974_v38, %v3973_v47  ;;  %v3977_v49 = vld [vmem:[#allocation25_spill] sm:$0xff]  ;;  %v3979_v6 = vld [vmem:[#allocation11_spill] sm:$0xff] }
 0x29c   : > { %v2062_v50 = vpop.f32.mrf.mxu0  ;;  %v3075_v40 = vpop.f32.mrf.mxu1  ;;  %v1942_v44 = vadd.f32 %v3977_v49, %v1710_v29  ;;  %v1376_v37 = vadd.f32 %v3979_v6, %v3978_v0  ;;  %v1945_v9 = vadd.f32 %v3982_v2, %v1713_v4  ;;  %v3983_v51 = vld [vmem:[#allocation15_spill] sm:$0xff] }
 0x29d   : > { %2314 = vst.msk [vmem:[%s3823_s7 + $0x28] sm:$0xff] %vm333_vm0, %v2298_v24  ;;  %v2297_v16 = vadd.f32 %v3816_v7, %v2274_v13  ;;  %v2277_v10 = vadd.f32 %v3075_v40, %v2108_v52  ;;  %v2109_v58 = vadd.f32 %v2062_v50, %v1940_v17  ;;  %v1546_v52 = vadd.f32 %v3980_v48, %v1377_v55  ;;  %v3981_v24 = vld [vmem:[#allocation22_spill] sm:$0xff] }
 0x29e   : > { %v3049_v57 = vpop.f32.mrf.mxu0  ;;  %v2221_v60 = vpop.f32.mrf.mxu1  ;;  %v1712_v13 = vadd.f32 %v3981_v24, %v1543_v23 }
 0x29f   : > { %2313 = vst.msk [vmem:[%s3823_s7 + $0x20] sm:$0xff] %vm333_vm0, %v2297_v16  ;;  %v2300_v21 = vadd.f32 %v3816_v7, %v2277_v10  ;;  %v2276_v22 = vadd.f32 %v2221_v60, %v2107_v54  ;;  %v2112_v63 = vadd.f32 %v3049_v57, %v1943_v19  ;;  %v1545_v54 = vadd.f32 %v3983_v51, %v1376_v37  ;;  %v3984_v16 = vld [vmem:[#allocation24_spill] sm:$0xff] }
 0x2a0   : > { %v2072_v30 = vpop.f32.mrf.mxu0  ;;  %v3078_v33 = vpop.f32.mrf.mxu1  ;;  %v1715_v10 = vadd.f32 %v3984_v16, %v1546_v52  ;;  %v1944_v46 = vadd.f32 %v3796_v43, %v1712_v13 }
 0x2a1   : > { %2316 = vst.msk [vmem:[%s3823_s7 + $0x38] sm:$0xff] %vm333_vm0, %v2300_v21  ;;  %v2299_v1 = vadd.f32 %v3816_v7, %v2276_v22  ;;  %v2279_v32 = vadd.f32 %v3078_v33, %v2110_v20  ;;  %v2111_v50 = vadd.f32 %v2072_v30, %v1942_v44  ;;  %v1714_v57 = vadd.f32 %v3985_v12, %v1545_v54 }
 0x2a2   : > { %v3052_v34 = vpop.f32.mrf.mxu0  ;;  %v2231_v59 = vpop.f32.mrf.mxu1  ;;  %v1947_v8 = vadd.f32 %v3800_v14, %v1715_v10 }
 0x2a3   : > { %2315 = vst.msk [vmem:[%s3823_s7 + $0x30] sm:$0xff] %vm333_vm0, %v2299_v1  ;;  %v2302_v39 = vadd.f32 %v3816_v7, %v2279_v32  ;;  %v2278_v27 = vadd.f32 %v2231_v59, %v2109_v58  ;;  %v2114_v53 = vadd.f32 %v3052_v34, %v1945_v9  ;;  %v1946_v25 = vadd.f32 %v3807_v45, %v1714_v57 }
 0x2a4   : > { %v2082_v3 = vpop.f32.mrf.mxu0  ;;  %v3081_v31 = vpop.f32.mrf.mxu1 }
 0x2a5   : > { %2318 = vst.msk [vmem:[%s3823_s7 + $0x48] sm:$0xff] %vm333_vm0, %v2302_v39  ;;  %v2301_v40 = vadd.f32 %v3816_v7, %v2278_v27  ;;  %v2281_v41 = vadd.f32 %v3081_v31, %v2112_v63  ;;  %v2113_v17 = vadd.f32 %v2082_v3, %v1944_v46 }
 0x2a6   : > { %v3055_v18 = vpop.f32.mrf.mxu0  ;;  %v2241_v11 = vpop.f32.mrf.mxu1 }
 0x2a7   : > { %2317 = vst.msk [vmem:[%s3823_s7 + $0x40] sm:$0xff] %vm333_vm0, %v2301_v40  ;;  %v2304_v35 = vadd.f32 %v3816_v7, %v2281_v41  ;;  %v2280_v5 = vadd.f32 %v2241_v11, %v2111_v50  ;;  %v2116_v26 = vadd.f32 %v3055_v18, %v1947_v8 }
 0x2a8   : > { %v3084_v60 = vpop.f32.mrf.mxu1  ;;  %v2092_v21 = vpop.f32.mrf.mxu0 }
 0x2a9   : > { %2320 = vst.msk [vmem:[%s3823_s7 + $0x58] sm:$0xff] %vm333_vm0, %v2304_v35  ;;  %v2303_v20 = vadd.f32 %v3816_v7, %v2280_v5  ;;  %v2283_v43 = vadd.f32 %v3084_v60, %v2114_v53  ;;  %v2115_v28 = vadd.f32 %v2092_v21, %v1946_v25 }
 0x2aa   : > { %v2251_v22 = vpop.f32.mrf.mxu1 }
 0x2ab   : > { %2319 = vst.msk [vmem:[%s3823_s7 + $0x50] sm:$0xff] %vm333_vm0, %v2303_v20  ;;  %v2306_v15 = vadd.f32 %v3816_v7, %v2283_v43  ;;  %v2282_v56 = vadd.f32 %v2251_v22, %v2113_v17 }
 0x2ac   : > { %v3087_v14 = vpop.f32.mrf.mxu1 }
 0x2ad   : > { %2322 = vst.msk [vmem:[%s3823_s7 + $0x68] sm:$0xff] %vm333_vm0, %v2306_v15  ;;  %v2305_v62 = vadd.f32 %v3816_v7, %v2282_v56  ;;  %v2285_v29 = vadd.f32 %v3087_v14, %v2116_v26 }
 0x2ae   : > { %v2261_v30 = vpop.f32.mrf.mxu1 }
 0x2af   : > { %2321 = vst.msk [vmem:[%s3823_s7 + $0x60] sm:$0xff] %vm333_vm0, %v2305_v62  ;;  %v2308_v33 = vadd.f32 %v3816_v7, %v2285_v29  ;;  %v2284_v45 = vadd.f32 %v2261_v30, %v2115_v28 }
 0x2b1   : > { %2324 = vst.msk [vmem:[%s3823_s7 + $0x78] sm:$0xff] %vm333_vm0, %v2308_v33  ;;  %v2307_v36 = vadd.f32 %v3816_v7, %v2284_v45 }
 0x2b3   : > { %2323 = vst.msk [vmem:[%s3823_s7 + $0x70] sm:$0xff] %vm333_vm0, %v2307_v36 }
 0x2b4 PF: > { %s16_s21 = sadd.s32 1, %s3113_s21  }
 0x2b5   : > { %p13_p4 = scmp.ge.s32.totalorder %s16_s21, 4  }
 0x2b7   :  { %15 = sbr.rel (!%p13_p4) target bundleno = 1 (0x1), region = 87 }

</bundles_post_ra>
